<compile_context>
chip_gen: v7x
topology: tpu7x:2x2x1
jax: 0.10.0
libtpu: 0.0.40
codegen_flags: <defaults>
</compile_context>

<pallas_src>
import math

import jax
import jax.numpy as jnp
from jax.experimental import pallas as pl
from jax.experimental.pallas import tpu as pltpu


_TILE_BYTES = 4 * 1024 * 1024        # ~4 MiB of live data per tile
_MIN_KERNEL_BYTES = 2 * 1024 * 1024  # below this, jnp.swapaxes is cheaper
_LANE = 128


def _transpose_tile_kernel(x_ref, o_ref):
    # x_ref: (TS, TH) tile, o_ref: (TH, TS) tile (batch dim squeezed away).
    o_ref[...] = x_ref[...].T


def _vmem_limit_bytes(default=48 * 1024 * 1024):
    """Scoped-VMEM limit: raise past the per-generation defaults, but leave
    headroom under physical VMEM (v7x has only 64 MiB per TensorCore)."""
    try:
        cap = pltpu.get_tpu_info().vmem_capacity_bytes
        return max(16 * 1024 * 1024, min(default, cap - 8 * 1024 * 1024))
    except Exception:
        return default


def _pick_tiles(S, H, itemsize, tile_bytes=_TILE_BYTES):
    """Pick (TS, TH): square-ish, ~tile_bytes of data, lane axes multiples of
    128 (both S and H are a lane axis on one side of the swap), with the edge
    tile rebalanced so it is never a <128-row sliver."""
    target_elems = max(_LANE * _LANE, tile_bytes // itemsize)
    side = max(_LANE, (int(math.isqrt(target_elems)) // _LANE) * _LANE)

    def one(dim):
        if dim <= side:
            return dim  # full-dim exception to the (8,128) rule
        n = pl.cdiv(dim, side)              # number of tiles at target size
        per = pl.cdiv(dim, n)               # balanced per-tile extent
        return min(side, ((per + _LANE - 1) // _LANE) * _LANE)

    return one(S), one(H)


def pallas_transpose(x, dim0, dim1):
    """Equivalent of torch.Tensor.transpose(dim0, dim1).

    Pallas kernel for the ViT readout case (3-D tensor, dims 1<->2); exact
    jnp.swapaxes fallback otherwise and for tiny inputs."""
    ndim = x.ndim
    dim0 = dim0 % ndim
    dim1 = dim1 % ndim
    if dim0 == dim1:
        return x

    if not (ndim == 3 and {dim0, dim1} == {1, 2}):
        # TODO(synk): general-rank transposes go through XLA; only the DPT/ViT
        # readout layout swap gets a dedicated kernel.
        return jnp.swapaxes(x, dim0, dim1)

    B, S, H = x.shape
    itemsize = jnp.dtype(x.dtype).itemsize
    total_bytes = B * S * H * itemsize
    if total_bytes < _MIN_KERNEL_BYTES or S < _LANE or H < _LANE:
        # Tiny / non-lane-dense: kernel would be pure step overhead + masked
        # stores; XLA folds the swap into the consumer for free.
        return jnp.swapaxes(x, 1, 2)

    TS, TH = _pick_tiles(S, H, itemsize)
    nS = pl.cdiv(S, TS)
    nH = pl.cdiv(H, TH)

    # Order grid axes largest-extent first so v7x megacore sharding lands on
    # a big axis (B is often 1-2 for ViT activations).
    axes = sorted([("s", nS), ("h", nH), ("b", B)], key=lambda t: t[1],
                  reverse=True)
    grid = tuple(n for _, n in axes)
    pos = {name: idx for idx, (name, _) in enumerate(axes)}

    def in_map(g0, g1, g2):
        g = (g0, g1, g2)
        return (g[pos["b"]], g[pos["s"]], g[pos["h"]])

    def out_map(g0, g1, g2):
        g = (g0, g1, g2)
        return (g[pos["b"]], g[pos["h"]], g[pos["s"]])

    cost = pl.CostEstimate(
        flops=0,
        transcendentals=0,
        bytes_accessed=2 * total_bytes,
    )

    return pl.pallas_call(
        _transpose_tile_kernel,
        out_shape=jax.ShapeDtypeStruct((B, H, S), x.dtype),
        grid_spec=pltpu.PrefetchScalarGridSpec(
            num_scalar_prefetch=0,
            grid=grid,
            in_specs=[pl.BlockSpec((pl.Squeezed(), TS, TH), in_map)],
            out_specs=pl.BlockSpec((pl.Squeezed(), TH, TS), out_map),
        ),
        compiler_params=pltpu.CompilerParams(
            dimension_semantics=("parallel", "parallel", "parallel"),
            vmem_limit_bytes=_vmem_limit_bytes(),
        ),
        cost_estimate=cost,
    )(x)


class Transpose:
    """Drop-in equivalent of the PyTorch Transpose module's forward."""

    def __init__(self, dim0, dim1):
        self.dim0 = dim0
        self.dim1 = dim1

    def __call__(self, x):
        return pallas_transpose(x, self.dim0, self.dim1)


def _check(x, dim0=1, dim1=2):
    out = jax.block_until_ready(pallas_transpose(x, dim0, dim1))
    ref = jnp.swapaxes(x, dim0, dim1)
    assert out.shape == ref.shape, (out.shape, ref.shape)
    assert bool(jnp.array_equal(out, ref)), "mismatch vs reference transpose"


if __name__ == "__main__":
    key = jax.random.PRNGKey(0)
    k0, k1, k2 = jax.random.split(key, 3)

    # 1) Tiny ViT-readout-like activation [B, S, H]: takes the small-input
    #    fallback path (pure overhead as a kernel).
    _check(jax.random.normal(k0, (2, 8, 32), dtype=jnp.float32), 1, 2)

    # 2) Typical DPT ViT-large readout shape (577 tokens, hidden 1024):
    #    kernel path with full-dim tiles (S=577 is not a multiple of 128).
    _check(jax.random.normal(k1, (2, 577, 1024), dtype=jnp.float32), 1, 2)

    # 3) bf16 tiled path with a rebalanced non-divisible edge tile
    #    (S=1600 -> two 896-row tiles, masked edge on the output write).
    x3 = jax.random.normal(k2, (1, 1600, 768), dtype=jnp.float32).astype(jnp.bfloat16)
    _check(x3, 1, 2)

    print("KERNEL_OK")
</pallas_src>

<mosaic_0001>
module attributes {stable_mosaic.version = 11 : i64} {
  func.func @_transpose_tile_kernel(%arg0: i32, %arg1: i32, %arg2: i32, %arg3: memref<1x577x1024xf32, #tpu.memory_space<vmem>>, %arg4: memref<1x1024x577xf32, #tpu.memory_space<vmem>>) attributes {dimension_semantics = [#tpu.dimension_semantics<parallel>, #tpu.dimension_semantics<parallel>, #tpu.dimension_semantics<parallel>], iteration_bounds = array<i64: 2, 1, 1>, scalar_prefetch = 0 : i64, scratch_operands = 0 : i64, tpu.core_type = #tpu.core_type<tc>, window_params = [{transform_indices = @transform_0, window_bounds = array<i64: 1, 577, 1024>}, {transform_indices = @transform_1, window_bounds = array<i64: 1, 1024, 577>}]} {
    %c0 = arith.constant 0 : index
    %c0_0 = arith.constant 0 : index
    %c0_1 = arith.constant 0 : index
    %0 = vector.load %arg3[%c0, %c0_0, %c0_1] : memref<1x577x1024xf32, #tpu.memory_space<vmem>>, vector<1x577x1024xf32>
    %1 = vector.shape_cast %0 : vector<1x577x1024xf32> to vector<577x1024xf32>
    %2 = tpu.transpose %1, [1, 0] : vector<577x1024xf32> -> vector<1024x577xf32>
    %c0_2 = arith.constant 0 : index
    %c0_3 = arith.constant 0 : index
    %c0_4 = arith.constant 0 : index
    %3 = vector.load %arg4[%c0_2, %c0_3, %c0_4] : memref<1x1024x577xf32, #tpu.memory_space<vmem>>, vector<1x1024x577xf32>
    %4 = vector.shape_cast %3 : vector<1x1024x577xf32> to vector<1024x577xf32>
    %5 = vector.shape_cast %2 : vector<1024x577xf32> to vector<1x1024x577xf32>
    tpu.vector_store %arg4[%c0_2, %c0_3, %c0_4], %5 {strides = array<i32>} : memref<1x1024x577xf32, #tpu.memory_space<vmem>>, vector<1x1024x577xf32>,
    return
  }
  func.func @transform_0(%arg0: i32, %arg1: i32, %arg2: i32) -> (i32, i32, i32) {
    %c0_i32 = arith.constant 0 : i32
    return %arg0, %arg1, %arg2 : i32, i32, i32
  }
  func.func @transform_1(%arg0: i32, %arg1: i32, %arg2: i32) -> (i32, i32, i32) {
    %c0_i32 = arith.constant 0 : i32
    return %arg0, %arg2, %arg1 : i32, i32, i32
  }
}

</mosaic_0001>

<bundles_post_ra>
// kernel: tpu_custom_call.1
= control target key start
LH: loop header
LB: loop body
LE: loop exit
PB: predicated region body
PF: predicated region fallthrough
CT: control target
= control target key end

     0   :  { %s2885_s6 = smov 0   ;;  %s2887_s7 = smov 0   ;;  %s4278_s0 = inlined_call_operand.vmem [shape: f32[2,577,1024], index: 0, kind: input, shape index: {}]   ;;  %s4279_s1 = inlined_call_operand.vmem [shape: f32[2,1024,577], index: 1, kind: output, shape index: {}]  }
   0x1   :  { %s2889_s8 = smov 0  }
   0x2 LB: > { %s30_s9 = sadd.s32 1, %s2869_s7  ;;  %p2819_p0 = scmp.ge.s32.totalorder %s2873_s8, 1  ;;  %s2873_s8 = sphi %s2889_s8, %s11_s8   ;;  %s2869_s7 = sphi %s2887_s7, %s4281_s7   ;;  %s2865_s6 = sphi %s2885_s6, %s4280_s6  }
   0x3   : > { %p32_p1 = scmp.ge.s32.totalorder %s30_s9, 2  ;;  %p125_p2 = scmp.lt.s32.totalorder %s2873_s8, 3 }
   0x5   : > { %s4283_s9 = smov (%p32_p1, %s30_s9), 0  ;;  %p126_p3 = pnand %p2819_p0, %p125_p2 }
   0x6   : > { %p165_p4 = scmp.lt.s32.totalorder (!%p126_p3), %s2865_s6, 1  ;;  %vm2063_vm0 = vcmask (!%p126_p3), 531456  }
   0x7   : > { %129 = sbr.rel (%p126_p3) target bundleno = 1425 (0x591), region = 24 }
   0xe   : > { %s4285_s6 = smov (!%p165_p4, %s2865_s6), 1 }
   0xf   : > { %s2824_s10 = smul.u32 4672, %s4285_s6 }
  0x10   : > { %s2825_s14 = smul.u32 5120, %s4285_s6 }
  0x11   : > { %s2909_s13 = scalar_lea.vmem %s4278_s0, %s2824_s10 }
  0x12   : > { %v196_v0 = vld [vmem:[%s2909_s13 + $0x8] sm:$0xff]  ;;  %v195_v1 = vld [vmem:[%s2909_s13] sm:$0xff]  ;;  %v198_v32 = vld [vmem:[%s2909_s13 + $0x18] sm:$0xff]  ;;  %s2981_s17 = scalar_lea.vmem %s4279_s1, %s2825_s14 }
  0x13   : > { %811 = vxpose.xlu1.b32.start [1/16] %v196_v0, 128  ;;  %779 = vxpose.xlu0.b32.start [1/16] %v195_v1, 128  ;;  %v204_v2 = vld [vmem:[%s2909_s13 + $0x48] sm:$0xff]  ;;  %v203_v3 = vld [vmem:[%s2909_s13 + $0x40] sm:$0xff]  ;;  %v197_v33 = vld [vmem:[%s2909_s13 + $0x10] sm:$0xff] }
  0x14   : > { %v212_v4 = vld [vmem:[%s2909_s13 + $0x88] sm:$0xff]  ;;  %v211_v5 = vld [vmem:[%s2909_s13 + $0x80] sm:$0xff]  ;;  %v206_v34 = vld [vmem:[%s2909_s13 + $0x58] sm:$0xff] }
  0x15   : > { %v220_v6 = vld [vmem:[%s2909_s13 + $0xc8] sm:$0xff]  ;;  %v219_v7 = vld [vmem:[%s2909_s13 + $0xc0] sm:$0xff]  ;;  %v205_v35 = vld [vmem:[%s2909_s13 + $0x50] sm:$0xff] }
  0x16   : > { %v228_v8 = vld [vmem:[%s2909_s13 + $0x108] sm:$0xff]  ;;  %v227_v9 = vld [vmem:[%s2909_s13 + $0x100] sm:$0xff]  ;;  %v214_v36 = vld [vmem:[%s2909_s13 + $0x98] sm:$0xff] }
  0x17   : > { %812 = vxpose.xlu1.b32.cont [2/16] %v204_v2, 128  ;;  %780 = vxpose.xlu0.b32.cont [2/16] %v203_v3, 128  ;;  %v236_v10 = vld [vmem:[%s2909_s13 + $0x148] sm:$0xff]  ;;  %v235_v11 = vld [vmem:[%s2909_s13 + $0x140] sm:$0xff]  ;;  %v213_v37 = vld [vmem:[%s2909_s13 + $0x90] sm:$0xff] }
  0x18   : > { %v244_v12 = vld [vmem:[%s2909_s13 + $0x188] sm:$0xff]  ;;  %v243_v13 = vld [vmem:[%s2909_s13 + $0x180] sm:$0xff]  ;;  %v222_v38 = vld [vmem:[%s2909_s13 + $0xd8] sm:$0xff] }
  0x19   : > { %v252_v14 = vld [vmem:[%s2909_s13 + $0x1c8] sm:$0xff]  ;;  %v251_v15 = vld [vmem:[%s2909_s13 + $0x1c0] sm:$0xff]  ;;  %v221_v39 = vld [vmem:[%s2909_s13 + $0xd0] sm:$0xff] }
  0x1a   : > { %v260_v16 = vld [vmem:[%s2909_s13 + $0x208] sm:$0xff]  ;;  %v259_v17 = vld [vmem:[%s2909_s13 + $0x200] sm:$0xff]  ;;  %v230_v40 = vld [vmem:[%s2909_s13 + $0x118] sm:$0xff] }
  0x1b   : > { %813 = vxpose.xlu1.b32.cont [3/16] %v212_v4, 128  ;;  %781 = vxpose.xlu0.b32.cont [3/16] %v211_v5, 128  ;;  %v268_v18 = vld [vmem:[%s2909_s13 + $0x248] sm:$0xff]  ;;  %v267_v19 = vld [vmem:[%s2909_s13 + $0x240] sm:$0xff]  ;;  %v229_v41 = vld [vmem:[%s2909_s13 + $0x110] sm:$0xff] }
  0x1c   : > { %v276_v20 = vld [vmem:[%s2909_s13 + $0x288] sm:$0xff]  ;;  %v275_v21 = vld [vmem:[%s2909_s13 + $0x280] sm:$0xff]  ;;  %v238_v42 = vld [vmem:[%s2909_s13 + $0x158] sm:$0xff] }
  0x1d   : > { %v284_v22 = vld [vmem:[%s2909_s13 + $0x2c8] sm:$0xff]  ;;  %v283_v23 = vld [vmem:[%s2909_s13 + $0x2c0] sm:$0xff]  ;;  %v237_v43 = vld [vmem:[%s2909_s13 + $0x150] sm:$0xff] }
  0x1e   : > { %v292_v24 = vld [vmem:[%s2909_s13 + $0x308] sm:$0xff]  ;;  %v291_v25 = vld [vmem:[%s2909_s13 + $0x300] sm:$0xff]  ;;  %v246_v44 = vld [vmem:[%s2909_s13 + $0x198] sm:$0xff] }
  0x1f   : > { %814 = vxpose.xlu1.b32.cont [4/16] %v220_v6, 128  ;;  %782 = vxpose.xlu0.b32.cont [4/16] %v219_v7, 128  ;;  %v300_v26 = vld [vmem:[%s2909_s13 + $0x348] sm:$0xff]  ;;  %v299_v27 = vld [vmem:[%s2909_s13 + $0x340] sm:$0xff]  ;;  %v245_v45 = vld [vmem:[%s2909_s13 + $0x190] sm:$0xff] }
  0x20   : > { %v308_v28 = vld [vmem:[%s2909_s13 + $0x388] sm:$0xff]  ;;  %v307_v29 = vld [vmem:[%s2909_s13 + $0x380] sm:$0xff]  ;;  %v254_v46 = vld [vmem:[%s2909_s13 + $0x1d8] sm:$0xff] }
  0x21   : > { %v316_v30 = vld [vmem:[%s2909_s13 + $0x3c8] sm:$0xff]  ;;  %v315_v31 = vld [vmem:[%s2909_s13 + $0x3c0] sm:$0xff]  ;;  %v253_v47 = vld [vmem:[%s2909_s13 + $0x1d0] sm:$0xff] }
  0x22   : > { %v262_v48 = vld [vmem:[%s2909_s13 + $0x218] sm:$0xff]  ;;  %v261_v49 = vld [vmem:[%s2909_s13 + $0x210] sm:$0xff]  ;;  %v200_v0 = vld [vmem:[%s2909_s13 + $0x28] sm:$0xff] }
  0x23   : > { %815 = vxpose.xlu1.b32.cont [5/16] %v228_v8, 128  ;;  %783 = vxpose.xlu0.b32.cont [5/16] %v227_v9, 128  ;;  %v270_v50 = vld [vmem:[%s2909_s13 + $0x258] sm:$0xff]  ;;  %v269_v51 = vld [vmem:[%s2909_s13 + $0x250] sm:$0xff]  ;;  %v199_v1 = vld [vmem:[%s2909_s13 + $0x20] sm:$0xff] }
  0x24   : > { %v278_v52 = vld [vmem:[%s2909_s13 + $0x298] sm:$0xff]  ;;  %v277_v53 = vld [vmem:[%s2909_s13 + $0x290] sm:$0xff]  ;;  %v208_v4 = vld [vmem:[%s2909_s13 + $0x68] sm:$0xff] }
  0x25   : > { %v286_v54 = vld [vmem:[%s2909_s13 + $0x2d8] sm:$0xff]  ;;  %v285_v55 = vld [vmem:[%s2909_s13 + $0x2d0] sm:$0xff]  ;;  %v207_v5 = vld [vmem:[%s2909_s13 + $0x60] sm:$0xff] }
  0x26   : > { %v294_v56 = vld [vmem:[%s2909_s13 + $0x318] sm:$0xff]  ;;  %v293_v57 = vld [vmem:[%s2909_s13 + $0x310] sm:$0xff]  ;;  %v216_v8 = vld [vmem:[%s2909_s13 + $0xa8] sm:$0xff] }
  0x27   : > { %816 = vxpose.xlu1.b32.cont [6/16] %v236_v10, 128  ;;  %784 = vxpose.xlu0.b32.cont [6/16] %v235_v11, 128  ;;  %v302_v58 = vld [vmem:[%s2909_s13 + $0x358] sm:$0xff]  ;;  %v301_v59 = vld [vmem:[%s2909_s13 + $0x350] sm:$0xff]  ;;  %v215_v9 = vld [vmem:[%s2909_s13 + $0xa0] sm:$0xff] }
  0x28   : > { %v310_v60 = vld [vmem:[%s2909_s13 + $0x398] sm:$0xff]  ;;  %v309_v61 = vld [vmem:[%s2909_s13 + $0x390] sm:$0xff] }
  0x29   : > { %v318_v62 = vld [vmem:[%s2909_s13 + $0x3d8] sm:$0xff]  ;;  %v317_v63 = vld [vmem:[%s2909_s13 + $0x3d0] sm:$0xff] }
  0x2b   : > { %817 = vxpose.xlu1.b32.cont [7/16] %v244_v12, 128  ;;  %785 = vxpose.xlu0.b32.cont [7/16] %v243_v13, 128  ;;  %v224_v12 = vld [vmem:[%s2909_s13 + $0xe8] sm:$0xff]  ;;  %v223_v13 = vld [vmem:[%s2909_s13 + $0xe0] sm:$0xff] }
  0x2f   : > { %818 = vxpose.xlu1.b32.cont [8/16] %v252_v14, 128  ;;  %786 = vxpose.xlu0.b32.cont [8/16] %v251_v15, 128 }
  0x33   : > { %819 = vxpose.xlu1.b32.cont [9/16] %v260_v16, 128  ;;  %787 = vxpose.xlu0.b32.cont [9/16] %v259_v17, 128  ;;  %v232_v16 = vld [vmem:[%s2909_s13 + $0x128] sm:$0xff]  ;;  %v231_v17 = vld [vmem:[%s2909_s13 + $0x120] sm:$0xff] }
  0x37   : > { %820 = vxpose.xlu1.b32.cont [10/16] %v268_v18, 128  ;;  %788 = vxpose.xlu0.b32.cont [10/16] %v267_v19, 128 }
  0x3b   : > { %821 = vxpose.xlu1.b32.cont [11/16] %v276_v20, 128  ;;  %789 = vxpose.xlu0.b32.cont [11/16] %v275_v21, 128  ;;  %v240_v20 = vld [vmem:[%s2909_s13 + $0x168] sm:$0xff]  ;;  %v239_v21 = vld [vmem:[%s2909_s13 + $0x160] sm:$0xff] }
  0x3f   : > { %822 = vxpose.xlu1.b32.cont [12/16] %v284_v22, 128  ;;  %790 = vxpose.xlu0.b32.cont [12/16] %v283_v23, 128 }
  0x43   : > { %823 = vxpose.xlu1.b32.cont [13/16] %v292_v24, 128  ;;  %791 = vxpose.xlu0.b32.cont [13/16] %v291_v25, 128  ;;  %v248_v24 = vld [vmem:[%s2909_s13 + $0x1a8] sm:$0xff]  ;;  %v247_v25 = vld [vmem:[%s2909_s13 + $0x1a0] sm:$0xff] }
  0x47   : > { %824 = vxpose.xlu1.b32.cont [14/16] %v300_v26, 128  ;;  %792 = vxpose.xlu0.b32.cont [14/16] %v299_v27, 128 }
  0x4b   : > { %825 = vxpose.xlu1.b32.cont [15/16] %v308_v28, 128  ;;  %793 = vxpose.xlu0.b32.cont [15/16] %v307_v29, 128  ;;  %v256_v28 = vld [vmem:[%s2909_s13 + $0x1e8] sm:$0xff]  ;;  %v255_v29 = vld [vmem:[%s2909_s13 + $0x1e0] sm:$0xff] }
  0x4f   : > { %826 = vxpose.xlu1.b32.end [16/16] %v316_v30, 128  ;;  %794 = vxpose.xlu0.b32.end [16/16] %v315_v31, 128 }
  0x53   : > { %875 = vxpose.xlu1.b32.start [1/16] %v198_v32, 128  ;;  %843 = vxpose.xlu0.b32.start [1/16] %v197_v33, 128  ;;  %v264_v32 = vld [vmem:[%s2909_s13 + $0x228] sm:$0xff]  ;;  %v263_v33 = vld [vmem:[%s2909_s13 + $0x220] sm:$0xff] }
  0x57   : > { %876 = vxpose.xlu1.b32.cont [2/16] %v206_v34, 128  ;;  %844 = vxpose.xlu0.b32.cont [2/16] %v205_v35, 128 }
  0x5b   : > { %877 = vxpose.xlu1.b32.cont [3/16] %v214_v36, 128  ;;  %845 = vxpose.xlu0.b32.cont [3/16] %v213_v37, 128  ;;  %v272_v36 = vld [vmem:[%s2909_s13 + $0x268] sm:$0xff]  ;;  %v271_v37 = vld [vmem:[%s2909_s13 + $0x260] sm:$0xff] }
  0x5f   : > { %878 = vxpose.xlu1.b32.cont [4/16] %v222_v38, 128  ;;  %846 = vxpose.xlu0.b32.cont [4/16] %v221_v39, 128 }
  0x63   : > { %879 = vxpose.xlu1.b32.cont [5/16] %v230_v40, 128  ;;  %847 = vxpose.xlu0.b32.cont [5/16] %v229_v41, 128  ;;  %v280_v40 = vld [vmem:[%s2909_s13 + $0x2a8] sm:$0xff]  ;;  %v279_v41 = vld [vmem:[%s2909_s13 + $0x2a0] sm:$0xff] }
  0x67   : > { %880 = vxpose.xlu1.b32.cont [6/16] %v238_v42, 128  ;;  %848 = vxpose.xlu0.b32.cont [6/16] %v237_v43, 128 }
  0x6b   : > { %881 = vxpose.xlu1.b32.cont [7/16] %v246_v44, 128  ;;  %849 = vxpose.xlu0.b32.cont [7/16] %v245_v45, 128  ;;  %v288_v44 = vld [vmem:[%s2909_s13 + $0x2e8] sm:$0xff]  ;;  %v287_v45 = vld [vmem:[%s2909_s13 + $0x2e0] sm:$0xff] }
  0x6f   : > { %882 = vxpose.xlu1.b32.cont [8/16] %v254_v46, 128  ;;  %850 = vxpose.xlu0.b32.cont [8/16] %v253_v47, 128 }
  0x73   : > { %883 = vxpose.xlu1.b32.cont [9/16] %v262_v48, 128  ;;  %851 = vxpose.xlu0.b32.cont [9/16] %v261_v49, 128  ;;  %v296_v48 = vld [vmem:[%s2909_s13 + $0x328] sm:$0xff]  ;;  %v295_v49 = vld [vmem:[%s2909_s13 + $0x320] sm:$0xff] }
  0x77   : > { %884 = vxpose.xlu1.b32.cont [10/16] %v270_v50, 128  ;;  %852 = vxpose.xlu0.b32.cont [10/16] %v269_v51, 128 }
  0x7b   : > { %885 = vxpose.xlu1.b32.cont [11/16] %v278_v52, 128  ;;  %853 = vxpose.xlu0.b32.cont [11/16] %v277_v53, 128  ;;  %v304_v52 = vld [vmem:[%s2909_s13 + $0x368] sm:$0xff]  ;;  %v303_v53 = vld [vmem:[%s2909_s13 + $0x360] sm:$0xff] }
  0x7f   : > { %886 = vxpose.xlu1.b32.cont [12/16] %v286_v54, 128  ;;  %854 = vxpose.xlu0.b32.cont [12/16] %v285_v55, 128 }
  0x83   : > { %887 = vxpose.xlu1.b32.cont [13/16] %v294_v56, 128  ;;  %855 = vxpose.xlu0.b32.cont [13/16] %v293_v57, 128  ;;  %v312_v56 = vld [vmem:[%s2909_s13 + $0x3a8] sm:$0xff]  ;;  %v311_v57 = vld [vmem:[%s2909_s13 + $0x3a0] sm:$0xff] }
  0x87   : > { %888 = vxpose.xlu1.b32.cont [14/16] %v302_v58, 128  ;;  %856 = vxpose.xlu0.b32.cont [14/16] %v301_v59, 128 }
  0x8b   : > { %889 = vxpose.xlu1.b32.cont [15/16] %v310_v60, 128  ;;  %857 = vxpose.xlu0.b32.cont [15/16] %v309_v61, 128  ;;  %v320_v60 = vld [vmem:[%s2909_s13 + $0x3e8] sm:$0xff]  ;;  %v319_v61 = vld [vmem:[%s2909_s13 + $0x3e0] sm:$0xff] }
  0x8f   : > { %890 = vxpose.xlu1.b32.end [16/16] %v318_v62, 128  ;;  %858 = vxpose.xlu0.b32.end [16/16] %v317_v63, 128 }
  0x93   : > { %939 = vxpose.xlu1.b32.start [1/16] %v200_v0, 128  ;;  %v827_v2 = vpop.trf.xlu1  ;;  %907 = vxpose.xlu0.b32.start [1/16] %v199_v1, 128  ;;  %v795_v3 = vpop.trf.xlu0  ;;  %v202_v0 = vld [vmem:[%s2909_s13 + $0x38] sm:$0xff]  ;;  %v201_v1 = vld [vmem:[%s2909_s13 + $0x30] sm:$0xff] }
  0x94   : > { %2140 = vst [vmem:[%s2981_s17 + $0x280] sm:$0xff] %v827_v2  ;;  %2059 = vst [vmem:[%s2981_s17] sm:$0xff] %v795_v3 }
  0x97   : > { %940 = vxpose.xlu1.b32.cont [2/16] %v208_v4, 128  ;;  %v828_v6 = vpop.trf.xlu1  ;;  %908 = vxpose.xlu0.b32.cont [2/16] %v207_v5, 128  ;;  %v796_v7 = vpop.trf.xlu0  ;;  %v210_v4 = vld [vmem:[%s2909_s13 + $0x78] sm:$0xff]  ;;  %v209_v5 = vld [vmem:[%s2909_s13 + $0x70] sm:$0xff] }
  0x98   : > { %2145 = vst [vmem:[%s2981_s17 + $0x2a8] sm:$0xff] %v828_v6  ;;  %2065 = vst [vmem:[%s2981_s17 + $0x28] sm:$0xff] %v796_v7 }
  0x9b   : > { %941 = vxpose.xlu1.b32.cont [3/16] %v216_v8, 128  ;;  %v829_v10 = vpop.trf.xlu1  ;;  %909 = vxpose.xlu0.b32.cont [3/16] %v215_v9, 128  ;;  %v797_v11 = vpop.trf.xlu0  ;;  %v218_v8 = vld [vmem:[%s2909_s13 + $0xb8] sm:$0xff]  ;;  %v217_v9 = vld [vmem:[%s2909_s13 + $0xb0] sm:$0xff] }
  0x9c   : > { %2150 = vst [vmem:[%s2981_s17 + $0x2d0] sm:$0xff] %v829_v10  ;;  %2070 = vst [vmem:[%s2981_s17 + $0x50] sm:$0xff] %v797_v11 }
  0x9f   : > { %942 = vxpose.xlu1.b32.cont [4/16] %v224_v12, 128  ;;  %v830_v14 = vpop.trf.xlu1  ;;  %910 = vxpose.xlu0.b32.cont [4/16] %v223_v13, 128  ;;  %v798_v15 = vpop.trf.xlu0  ;;  %v226_v12 = vld [vmem:[%s2909_s13 + $0xf8] sm:$0xff]  ;;  %v225_v13 = vld [vmem:[%s2909_s13 + $0xf0] sm:$0xff] }
  0xa0   : > { %2155 = vst [vmem:[%s2981_s17 + $0x2f8] sm:$0xff] %v830_v14  ;;  %2075 = vst [vmem:[%s2981_s17 + $0x78] sm:$0xff] %v798_v15 }
  0xa3   : > { %943 = vxpose.xlu1.b32.cont [5/16] %v232_v16, 128  ;;  %v831_v18 = vpop.trf.xlu1  ;;  %911 = vxpose.xlu0.b32.cont [5/16] %v231_v17, 128  ;;  %v799_v19 = vpop.trf.xlu0  ;;  %v234_v16 = vld [vmem:[%s2909_s13 + $0x138] sm:$0xff]  ;;  %v233_v17 = vld [vmem:[%s2909_s13 + $0x130] sm:$0xff] }
  0xa4   : > { %2160 = vst [vmem:[%s2981_s17 + $0x320] sm:$0xff] %v831_v18  ;;  %2080 = vst [vmem:[%s2981_s17 + $0xa0] sm:$0xff] %v799_v19 }
  0xa7   : > { %944 = vxpose.xlu1.b32.cont [6/16] %v240_v20, 128  ;;  %v832_v22 = vpop.trf.xlu1  ;;  %912 = vxpose.xlu0.b32.cont [6/16] %v239_v21, 128  ;;  %v800_v23 = vpop.trf.xlu0  ;;  %v242_v20 = vld [vmem:[%s2909_s13 + $0x178] sm:$0xff]  ;;  %v241_v21 = vld [vmem:[%s2909_s13 + $0x170] sm:$0xff] }
  0xa8   : > { %2165 = vst [vmem:[%s2981_s17 + $0x348] sm:$0xff] %v832_v22  ;;  %2085 = vst [vmem:[%s2981_s17 + $0xc8] sm:$0xff] %v800_v23 }
  0xab   : > { %945 = vxpose.xlu1.b32.cont [7/16] %v248_v24, 128  ;;  %v833_v26 = vpop.trf.xlu1  ;;  %913 = vxpose.xlu0.b32.cont [7/16] %v247_v25, 128  ;;  %v801_v27 = vpop.trf.xlu0  ;;  %v250_v24 = vld [vmem:[%s2909_s13 + $0x1b8] sm:$0xff]  ;;  %v249_v25 = vld [vmem:[%s2909_s13 + $0x1b0] sm:$0xff] }
  0xac   : > { %2170 = vst [vmem:[%s2981_s17 + $0x370] sm:$0xff] %v833_v26  ;;  %2090 = vst [vmem:[%s2981_s17 + $0xf0] sm:$0xff] %v801_v27 }
  0xaf   : > { %946 = vxpose.xlu1.b32.cont [8/16] %v256_v28, 128  ;;  %v834_v30 = vpop.trf.xlu1  ;;  %914 = vxpose.xlu0.b32.cont [8/16] %v255_v29, 128  ;;  %v802_v31 = vpop.trf.xlu0  ;;  %v258_v28 = vld [vmem:[%s2909_s13 + $0x1f8] sm:$0xff]  ;;  %v257_v29 = vld [vmem:[%s2909_s13 + $0x1f0] sm:$0xff] }
  0xb0   : > { %2175 = vst [vmem:[%s2981_s17 + $0x398] sm:$0xff] %v834_v30  ;;  %2095 = vst [vmem:[%s2981_s17 + $0x118] sm:$0xff] %v802_v31 }
  0xb3   : > { %947 = vxpose.xlu1.b32.cont [9/16] %v264_v32, 128  ;;  %v835_v34 = vpop.trf.xlu1  ;;  %915 = vxpose.xlu0.b32.cont [9/16] %v263_v33, 128  ;;  %v803_v35 = vpop.trf.xlu0  ;;  %v266_v32 = vld [vmem:[%s2909_s13 + $0x238] sm:$0xff]  ;;  %v265_v33 = vld [vmem:[%s2909_s13 + $0x230] sm:$0xff] }
  0xb4   : > { %2180 = vst [vmem:[%s2981_s17 + $0x3c0] sm:$0xff] %v835_v34  ;;  %2100 = vst [vmem:[%s2981_s17 + $0x140] sm:$0xff] %v803_v35 }
  0xb7   : > { %948 = vxpose.xlu1.b32.cont [10/16] %v272_v36, 128  ;;  %v836_v38 = vpop.trf.xlu1  ;;  %916 = vxpose.xlu0.b32.cont [10/16] %v271_v37, 128  ;;  %v804_v39 = vpop.trf.xlu0  ;;  %v274_v36 = vld [vmem:[%s2909_s13 + $0x278] sm:$0xff]  ;;  %v273_v37 = vld [vmem:[%s2909_s13 + $0x270] sm:$0xff] }
  0xb8   : > { %2185 = vst [vmem:[%s2981_s17 + $0x3e8] sm:$0xff] %v836_v38  ;;  %2105 = vst [vmem:[%s2981_s17 + $0x168] sm:$0xff] %v804_v39 }
  0xbb   : > { %949 = vxpose.xlu1.b32.cont [11/16] %v280_v40, 128  ;;  %v837_v42 = vpop.trf.xlu1  ;;  %917 = vxpose.xlu0.b32.cont [11/16] %v279_v41, 128  ;;  %v805_v43 = vpop.trf.xlu0  ;;  %v282_v40 = vld [vmem:[%s2909_s13 + $0x2b8] sm:$0xff]  ;;  %v281_v41 = vld [vmem:[%s2909_s13 + $0x2b0] sm:$0xff] }
  0xbc   : > { %2190 = vst [vmem:[%s2981_s17 + $0x410] sm:$0xff] %v837_v42  ;;  %2110 = vst [vmem:[%s2981_s17 + $0x190] sm:$0xff] %v805_v43 }
  0xbf   : > { %950 = vxpose.xlu1.b32.cont [12/16] %v288_v44, 128  ;;  %v838_v46 = vpop.trf.xlu1  ;;  %918 = vxpose.xlu0.b32.cont [12/16] %v287_v45, 128  ;;  %v806_v47 = vpop.trf.xlu0  ;;  %v290_v44 = vld [vmem:[%s2909_s13 + $0x2f8] sm:$0xff]  ;;  %v289_v45 = vld [vmem:[%s2909_s13 + $0x2f0] sm:$0xff] }
  0xc0   : > { %2195 = vst [vmem:[%s2981_s17 + $0x438] sm:$0xff] %v838_v46  ;;  %2115 = vst [vmem:[%s2981_s17 + $0x1b8] sm:$0xff] %v806_v47 }
  0xc3   : > { %951 = vxpose.xlu1.b32.cont [13/16] %v296_v48, 128  ;;  %v839_v50 = vpop.trf.xlu1  ;;  %919 = vxpose.xlu0.b32.cont [13/16] %v295_v49, 128  ;;  %v807_v51 = vpop.trf.xlu0  ;;  %v298_v48 = vld [vmem:[%s2909_s13 + $0x338] sm:$0xff]  ;;  %v297_v49 = vld [vmem:[%s2909_s13 + $0x330] sm:$0xff] }
  0xc4   : > { %2200 = vst [vmem:[%s2981_s17 + $0x460] sm:$0xff] %v839_v50  ;;  %2120 = vst [vmem:[%s2981_s17 + $0x1e0] sm:$0xff] %v807_v51 }
  0xc7   : > { %952 = vxpose.xlu1.b32.cont [14/16] %v304_v52, 128  ;;  %v840_v54 = vpop.trf.xlu1  ;;  %920 = vxpose.xlu0.b32.cont [14/16] %v303_v53, 128  ;;  %v808_v55 = vpop.trf.xlu0  ;;  %v306_v52 = vld [vmem:[%s2909_s13 + $0x378] sm:$0xff]  ;;  %v305_v53 = vld [vmem:[%s2909_s13 + $0x370] sm:$0xff] }
  0xc8   : > { %2205 = vst [vmem:[%s2981_s17 + $0x488] sm:$0xff] %v840_v54  ;;  %2125 = vst [vmem:[%s2981_s17 + $0x208] sm:$0xff] %v808_v55 }
  0xcb   : > { %953 = vxpose.xlu1.b32.cont [15/16] %v312_v56, 128  ;;  %v841_v58 = vpop.trf.xlu1  ;;  %921 = vxpose.xlu0.b32.cont [15/16] %v311_v57, 128  ;;  %v809_v59 = vpop.trf.xlu0  ;;  %v314_v56 = vld [vmem:[%s2909_s13 + $0x3b8] sm:$0xff]  ;;  %v313_v57 = vld [vmem:[%s2909_s13 + $0x3b0] sm:$0xff] }
  0xcc   : > { %2210 = vst [vmem:[%s2981_s17 + $0x4b0] sm:$0xff] %v841_v58  ;;  %2130 = vst [vmem:[%s2981_s17 + $0x230] sm:$0xff] %v809_v59 }
  0xcf   : > { %954 = vxpose.xlu1.b32.end [16/16] %v320_v60, 128  ;;  %v842_v62 = vpop.trf.xlu1  ;;  %922 = vxpose.xlu0.b32.end [16/16] %v319_v61, 128  ;;  %v810_v63 = vpop.trf.xlu0  ;;  %v322_v60 = vld [vmem:[%s2909_s13 + $0x3f8] sm:$0xff]  ;;  %v321_v61 = vld [vmem:[%s2909_s13 + $0x3f0] sm:$0xff] }
  0xd0   : > { %2215 = vst [vmem:[%s2981_s17 + $0x4d8] sm:$0xff] %v842_v62  ;;  %2135 = vst [vmem:[%s2981_s17 + $0x258] sm:$0xff] %v810_v63 }
  0xd3   : > { %1003 = vxpose.xlu1.b32.start [1/16] %v202_v0, 128  ;;  %v891_v2 = vpop.trf.xlu1  ;;  %971 = vxpose.xlu0.b32.start [1/16] %v201_v1, 128  ;;  %v859_v3 = vpop.trf.xlu0  ;;  %v324_v0 = vld [vmem:[%s2909_s13 + $0x408] sm:$0xff]  ;;  %v323_v1 = vld [vmem:[%s2909_s13 + $0x400] sm:$0xff] }
  0xd4   : > { %2300 = vst [vmem:[%s2981_s17 + $0x780] sm:$0xff] %v891_v2  ;;  %2220 = vst [vmem:[%s2981_s17 + $0x500] sm:$0xff] %v859_v3 }
  0xd7   : > { %1004 = vxpose.xlu1.b32.cont [2/16] %v210_v4, 128  ;;  %v892_v6 = vpop.trf.xlu1  ;;  %972 = vxpose.xlu0.b32.cont [2/16] %v209_v5, 128  ;;  %v860_v7 = vpop.trf.xlu0  ;;  %v332_v4 = vld [vmem:[%s2909_s13 + $0x448] sm:$0xff]  ;;  %v331_v5 = vld [vmem:[%s2909_s13 + $0x440] sm:$0xff] }
  0xd8   : > { %2305 = vst [vmem:[%s2981_s17 + $0x7a8] sm:$0xff] %v892_v6  ;;  %2225 = vst [vmem:[%s2981_s17 + $0x528] sm:$0xff] %v860_v7 }
  0xdb   : > { %1005 = vxpose.xlu1.b32.cont [3/16] %v218_v8, 128  ;;  %v893_v10 = vpop.trf.xlu1  ;;  %973 = vxpose.xlu0.b32.cont [3/16] %v217_v9, 128  ;;  %v861_v11 = vpop.trf.xlu0  ;;  %v340_v8 = vld [vmem:[%s2909_s13 + $0x488] sm:$0xff]  ;;  %v339_v9 = vld [vmem:[%s2909_s13 + $0x480] sm:$0xff] }
  0xdc   : > { %2310 = vst [vmem:[%s2981_s17 + $0x7d0] sm:$0xff] %v893_v10  ;;  %2230 = vst [vmem:[%s2981_s17 + $0x550] sm:$0xff] %v861_v11 }
  0xdf   : > { %1006 = vxpose.xlu1.b32.cont [4/16] %v226_v12, 128  ;;  %v894_v14 = vpop.trf.xlu1  ;;  %974 = vxpose.xlu0.b32.cont [4/16] %v225_v13, 128  ;;  %v862_v15 = vpop.trf.xlu0  ;;  %v348_v12 = vld [vmem:[%s2909_s13 + $0x4c8] sm:$0xff]  ;;  %v347_v13 = vld [vmem:[%s2909_s13 + $0x4c0] sm:$0xff] }
  0xe0   : > { %2315 = vst [vmem:[%s2981_s17 + $0x7f8] sm:$0xff] %v894_v14  ;;  %2235 = vst [vmem:[%s2981_s17 + $0x578] sm:$0xff] %v862_v15 }
  0xe3   : > { %1007 = vxpose.xlu1.b32.cont [5/16] %v234_v16, 128  ;;  %v895_v18 = vpop.trf.xlu1  ;;  %975 = vxpose.xlu0.b32.cont [5/16] %v233_v17, 128  ;;  %v863_v19 = vpop.trf.xlu0  ;;  %v356_v16 = vld [vmem:[%s2909_s13 + $0x508] sm:$0xff]  ;;  %v355_v17 = vld [vmem:[%s2909_s13 + $0x500] sm:$0xff] }
  0xe4   : > { %2320 = vst [vmem:[%s2981_s17 + $0x820] sm:$0xff] %v895_v18  ;;  %2240 = vst [vmem:[%s2981_s17 + $0x5a0] sm:$0xff] %v863_v19 }
  0xe7   : > { %1008 = vxpose.xlu1.b32.cont [6/16] %v242_v20, 128  ;;  %v896_v22 = vpop.trf.xlu1  ;;  %976 = vxpose.xlu0.b32.cont [6/16] %v241_v21, 128  ;;  %v864_v23 = vpop.trf.xlu0  ;;  %v364_v20 = vld [vmem:[%s2909_s13 + $0x548] sm:$0xff]  ;;  %v363_v21 = vld [vmem:[%s2909_s13 + $0x540] sm:$0xff] }
  0xe8   : > { %2325 = vst [vmem:[%s2981_s17 + $0x848] sm:$0xff] %v896_v22  ;;  %2245 = vst [vmem:[%s2981_s17 + $0x5c8] sm:$0xff] %v864_v23 }
  0xeb   : > { %1009 = vxpose.xlu1.b32.cont [7/16] %v250_v24, 128  ;;  %v897_v26 = vpop.trf.xlu1  ;;  %977 = vxpose.xlu0.b32.cont [7/16] %v249_v25, 128  ;;  %v865_v27 = vpop.trf.xlu0  ;;  %v372_v24 = vld [vmem:[%s2909_s13 + $0x588] sm:$0xff]  ;;  %v371_v25 = vld [vmem:[%s2909_s13 + $0x580] sm:$0xff] }
  0xec   : > { %2330 = vst [vmem:[%s2981_s17 + $0x870] sm:$0xff] %v897_v26  ;;  %2250 = vst [vmem:[%s2981_s17 + $0x5f0] sm:$0xff] %v865_v27 }
  0xef   : > { %1010 = vxpose.xlu1.b32.cont [8/16] %v258_v28, 128  ;;  %v898_v30 = vpop.trf.xlu1  ;;  %978 = vxpose.xlu0.b32.cont [8/16] %v257_v29, 128  ;;  %v866_v31 = vpop.trf.xlu0  ;;  %v380_v28 = vld [vmem:[%s2909_s13 + $0x5c8] sm:$0xff]  ;;  %v379_v29 = vld [vmem:[%s2909_s13 + $0x5c0] sm:$0xff] }
  0xf0   : > { %2335 = vst [vmem:[%s2981_s17 + $0x898] sm:$0xff] %v898_v30  ;;  %2255 = vst [vmem:[%s2981_s17 + $0x618] sm:$0xff] %v866_v31 }
  0xf3   : > { %1011 = vxpose.xlu1.b32.cont [9/16] %v266_v32, 128  ;;  %v899_v34 = vpop.trf.xlu1  ;;  %979 = vxpose.xlu0.b32.cont [9/16] %v265_v33, 128  ;;  %v867_v35 = vpop.trf.xlu0  ;;  %v388_v32 = vld [vmem:[%s2909_s13 + $0x608] sm:$0xff]  ;;  %v387_v33 = vld [vmem:[%s2909_s13 + $0x600] sm:$0xff] }
  0xf4   : > { %2340 = vst [vmem:[%s2981_s17 + $0x8c0] sm:$0xff] %v899_v34  ;;  %2260 = vst [vmem:[%s2981_s17 + $0x640] sm:$0xff] %v867_v35 }
  0xf7   : > { %1012 = vxpose.xlu1.b32.cont [10/16] %v274_v36, 128  ;;  %v900_v38 = vpop.trf.xlu1  ;;  %980 = vxpose.xlu0.b32.cont [10/16] %v273_v37, 128  ;;  %v868_v39 = vpop.trf.xlu0  ;;  %v396_v36 = vld [vmem:[%s2909_s13 + $0x648] sm:$0xff]  ;;  %v395_v37 = vld [vmem:[%s2909_s13 + $0x640] sm:$0xff] }
  0xf8   : > { %2345 = vst [vmem:[%s2981_s17 + $0x8e8] sm:$0xff] %v900_v38  ;;  %2265 = vst [vmem:[%s2981_s17 + $0x668] sm:$0xff] %v868_v39 }
  0xfb   : > { %1013 = vxpose.xlu1.b32.cont [11/16] %v282_v40, 128  ;;  %v901_v42 = vpop.trf.xlu1  ;;  %981 = vxpose.xlu0.b32.cont [11/16] %v281_v41, 128  ;;  %v869_v43 = vpop.trf.xlu0  ;;  %v404_v40 = vld [vmem:[%s2909_s13 + $0x688] sm:$0xff]  ;;  %v403_v41 = vld [vmem:[%s2909_s13 + $0x680] sm:$0xff] }
  0xfc   : > { %2350 = vst [vmem:[%s2981_s17 + $0x910] sm:$0xff] %v901_v42  ;;  %2270 = vst [vmem:[%s2981_s17 + $0x690] sm:$0xff] %v869_v43 }
  0xff   : > { %1014 = vxpose.xlu1.b32.cont [12/16] %v290_v44, 128  ;;  %v902_v46 = vpop.trf.xlu1  ;;  %982 = vxpose.xlu0.b32.cont [12/16] %v289_v45, 128  ;;  %v870_v47 = vpop.trf.xlu0  ;;  %v412_v44 = vld [vmem:[%s2909_s13 + $0x6c8] sm:$0xff]  ;;  %v411_v45 = vld [vmem:[%s2909_s13 + $0x6c0] sm:$0xff] }
 0x100   : > { %2355 = vst [vmem:[%s2981_s17 + $0x938] sm:$0xff] %v902_v46  ;;  %2275 = vst [vmem:[%s2981_s17 + $0x6b8] sm:$0xff] %v870_v47 }
 0x103   : > { %1015 = vxpose.xlu1.b32.cont [13/16] %v298_v48, 128  ;;  %v903_v50 = vpop.trf.xlu1  ;;  %983 = vxpose.xlu0.b32.cont [13/16] %v297_v49, 128  ;;  %v871_v51 = vpop.trf.xlu0  ;;  %v420_v48 = vld [vmem:[%s2909_s13 + $0x708] sm:$0xff]  ;;  %v419_v49 = vld [vmem:[%s2909_s13 + $0x700] sm:$0xff] }
 0x104   : > { %2360 = vst [vmem:[%s2981_s17 + $0x960] sm:$0xff] %v903_v50  ;;  %2280 = vst [vmem:[%s2981_s17 + $0x6e0] sm:$0xff] %v871_v51 }
 0x107   : > { %1016 = vxpose.xlu1.b32.cont [14/16] %v306_v52, 128  ;;  %v904_v54 = vpop.trf.xlu1  ;;  %984 = vxpose.xlu0.b32.cont [14/16] %v305_v53, 128  ;;  %v872_v55 = vpop.trf.xlu0  ;;  %v428_v52 = vld [vmem:[%s2909_s13 + $0x748] sm:$0xff]  ;;  %v427_v53 = vld [vmem:[%s2909_s13 + $0x740] sm:$0xff] }
 0x108   : > { %2365 = vst [vmem:[%s2981_s17 + $0x988] sm:$0xff] %v904_v54  ;;  %2285 = vst [vmem:[%s2981_s17 + $0x708] sm:$0xff] %v872_v55 }
 0x10b   : > { %1017 = vxpose.xlu1.b32.cont [15/16] %v314_v56, 128  ;;  %v905_v58 = vpop.trf.xlu1  ;;  %985 = vxpose.xlu0.b32.cont [15/16] %v313_v57, 128  ;;  %v873_v59 = vpop.trf.xlu0  ;;  %v436_v56 = vld [vmem:[%s2909_s13 + $0x788] sm:$0xff]  ;;  %v435_v57 = vld [vmem:[%s2909_s13 + $0x780] sm:$0xff] }
 0x10c   : > { %2370 = vst [vmem:[%s2981_s17 + $0x9b0] sm:$0xff] %v905_v58  ;;  %2290 = vst [vmem:[%s2981_s17 + $0x730] sm:$0xff] %v873_v59 }
 0x10f   : > { %1018 = vxpose.xlu1.b32.end [16/16] %v322_v60, 128  ;;  %v906_v62 = vpop.trf.xlu1  ;;  %986 = vxpose.xlu0.b32.end [16/16] %v321_v61, 128  ;;  %v874_v63 = vpop.trf.xlu0  ;;  %v444_v60 = vld [vmem:[%s2909_s13 + $0x7c8] sm:$0xff]  ;;  %v443_v61 = vld [vmem:[%s2909_s13 + $0x7c0] sm:$0xff] }
 0x110   : > { %2375 = vst [vmem:[%s2981_s17 + $0x9d8] sm:$0xff] %v906_v62  ;;  %2295 = vst [vmem:[%s2981_s17 + $0x758] sm:$0xff] %v874_v63 }
 0x113   : > { %1067 = vxpose.xlu1.b32.start [1/16] %v324_v0, 128  ;;  %v955_v2 = vpop.trf.xlu1  ;;  %1035 = vxpose.xlu0.b32.start [1/16] %v323_v1, 128  ;;  %v923_v3 = vpop.trf.xlu0  ;;  %v326_v0 = vld [vmem:[%s2909_s13 + $0x418] sm:$0xff]  ;;  %v325_v1 = vld [vmem:[%s2909_s13 + $0x410] sm:$0xff] }
 0x114   : > { %2460 = vst [vmem:[%s2981_s17 + $0xc80] sm:$0xff] %v955_v2  ;;  %2380 = vst [vmem:[%s2981_s17 + $0xa00] sm:$0xff] %v923_v3 }
 0x117   : > { %1068 = vxpose.xlu1.b32.cont [2/16] %v332_v4, 128  ;;  %v956_v6 = vpop.trf.xlu1  ;;  %1036 = vxpose.xlu0.b32.cont [2/16] %v331_v5, 128  ;;  %v924_v7 = vpop.trf.xlu0  ;;  %v334_v4 = vld [vmem:[%s2909_s13 + $0x458] sm:$0xff]  ;;  %v333_v5 = vld [vmem:[%s2909_s13 + $0x450] sm:$0xff] }
 0x118   : > { %2465 = vst [vmem:[%s2981_s17 + $0xca8] sm:$0xff] %v956_v6  ;;  %2385 = vst [vmem:[%s2981_s17 + $0xa28] sm:$0xff] %v924_v7 }
 0x11b   : > { %1069 = vxpose.xlu1.b32.cont [3/16] %v340_v8, 128  ;;  %v957_v10 = vpop.trf.xlu1  ;;  %1037 = vxpose.xlu0.b32.cont [3/16] %v339_v9, 128  ;;  %v925_v11 = vpop.trf.xlu0  ;;  %v342_v8 = vld [vmem:[%s2909_s13 + $0x498] sm:$0xff]  ;;  %v341_v9 = vld [vmem:[%s2909_s13 + $0x490] sm:$0xff] }
 0x11c   : > { %2470 = vst [vmem:[%s2981_s17 + $0xcd0] sm:$0xff] %v957_v10  ;;  %2390 = vst [vmem:[%s2981_s17 + $0xa50] sm:$0xff] %v925_v11 }
 0x11f   : > { %1070 = vxpose.xlu1.b32.cont [4/16] %v348_v12, 128  ;;  %v958_v14 = vpop.trf.xlu1  ;;  %1038 = vxpose.xlu0.b32.cont [4/16] %v347_v13, 128  ;;  %v926_v15 = vpop.trf.xlu0  ;;  %v350_v12 = vld [vmem:[%s2909_s13 + $0x4d8] sm:$0xff]  ;;  %v349_v13 = vld [vmem:[%s2909_s13 + $0x4d0] sm:$0xff] }
 0x120   : > { %2475 = vst [vmem:[%s2981_s17 + $0xcf8] sm:$0xff] %v958_v14  ;;  %2395 = vst [vmem:[%s2981_s17 + $0xa78] sm:$0xff] %v926_v15 }
 0x123   : > { %1071 = vxpose.xlu1.b32.cont [5/16] %v356_v16, 128  ;;  %v959_v18 = vpop.trf.xlu1  ;;  %1039 = vxpose.xlu0.b32.cont [5/16] %v355_v17, 128  ;;  %v927_v19 = vpop.trf.xlu0  ;;  %v358_v16 = vld [vmem:[%s2909_s13 + $0x518] sm:$0xff]  ;;  %v357_v17 = vld [vmem:[%s2909_s13 + $0x510] sm:$0xff] }
 0x124   : > { %2480 = vst [vmem:[%s2981_s17 + $0xd20] sm:$0xff] %v959_v18  ;;  %2400 = vst [vmem:[%s2981_s17 + $0xaa0] sm:$0xff] %v927_v19 }
 0x127   : > { %1072 = vxpose.xlu1.b32.cont [6/16] %v364_v20, 128  ;;  %v960_v22 = vpop.trf.xlu1  ;;  %1040 = vxpose.xlu0.b32.cont [6/16] %v363_v21, 128  ;;  %v928_v23 = vpop.trf.xlu0  ;;  %v366_v20 = vld [vmem:[%s2909_s13 + $0x558] sm:$0xff]  ;;  %v365_v21 = vld [vmem:[%s2909_s13 + $0x550] sm:$0xff] }
 0x128   : > { %2485 = vst [vmem:[%s2981_s17 + $0xd48] sm:$0xff] %v960_v22  ;;  %2405 = vst [vmem:[%s2981_s17 + $0xac8] sm:$0xff] %v928_v23 }
 0x12b   : > { %1073 = vxpose.xlu1.b32.cont [7/16] %v372_v24, 128  ;;  %v961_v26 = vpop.trf.xlu1  ;;  %1041 = vxpose.xlu0.b32.cont [7/16] %v371_v25, 128  ;;  %v929_v27 = vpop.trf.xlu0  ;;  %v374_v24 = vld [vmem:[%s2909_s13 + $0x598] sm:$0xff]  ;;  %v373_v25 = vld [vmem:[%s2909_s13 + $0x590] sm:$0xff] }
 0x12c   : > { %2490 = vst [vmem:[%s2981_s17 + $0xd70] sm:$0xff] %v961_v26  ;;  %2410 = vst [vmem:[%s2981_s17 + $0xaf0] sm:$0xff] %v929_v27 }
 0x12f   : > { %1074 = vxpose.xlu1.b32.cont [8/16] %v380_v28, 128  ;;  %v962_v30 = vpop.trf.xlu1  ;;  %1042 = vxpose.xlu0.b32.cont [8/16] %v379_v29, 128  ;;  %v930_v31 = vpop.trf.xlu0  ;;  %v382_v28 = vld [vmem:[%s2909_s13 + $0x5d8] sm:$0xff]  ;;  %v381_v29 = vld [vmem:[%s2909_s13 + $0x5d0] sm:$0xff] }
 0x130   : > { %2495 = vst [vmem:[%s2981_s17 + $0xd98] sm:$0xff] %v962_v30  ;;  %2415 = vst [vmem:[%s2981_s17 + $0xb18] sm:$0xff] %v930_v31 }
 0x133   : > { %1075 = vxpose.xlu1.b32.cont [9/16] %v388_v32, 128  ;;  %v963_v34 = vpop.trf.xlu1  ;;  %1043 = vxpose.xlu0.b32.cont [9/16] %v387_v33, 128  ;;  %v931_v35 = vpop.trf.xlu0  ;;  %v390_v32 = vld [vmem:[%s2909_s13 + $0x618] sm:$0xff]  ;;  %v389_v33 = vld [vmem:[%s2909_s13 + $0x610] sm:$0xff] }
 0x134   : > { %2500 = vst [vmem:[%s2981_s17 + $0xdc0] sm:$0xff] %v963_v34  ;;  %2420 = vst [vmem:[%s2981_s17 + $0xb40] sm:$0xff] %v931_v35 }
 0x137   : > { %1076 = vxpose.xlu1.b32.cont [10/16] %v396_v36, 128  ;;  %v964_v38 = vpop.trf.xlu1  ;;  %1044 = vxpose.xlu0.b32.cont [10/16] %v395_v37, 128  ;;  %v932_v39 = vpop.trf.xlu0  ;;  %v398_v36 = vld [vmem:[%s2909_s13 + $0x658] sm:$0xff]  ;;  %v397_v37 = vld [vmem:[%s2909_s13 + $0x650] sm:$0xff] }
 0x138   : > { %2505 = vst [vmem:[%s2981_s17 + $0xde8] sm:$0xff] %v964_v38  ;;  %2425 = vst [vmem:[%s2981_s17 + $0xb68] sm:$0xff] %v932_v39 }
 0x13b   : > { %1077 = vxpose.xlu1.b32.cont [11/16] %v404_v40, 128  ;;  %v965_v42 = vpop.trf.xlu1  ;;  %1045 = vxpose.xlu0.b32.cont [11/16] %v403_v41, 128  ;;  %v933_v43 = vpop.trf.xlu0  ;;  %v406_v40 = vld [vmem:[%s2909_s13 + $0x698] sm:$0xff]  ;;  %v405_v41 = vld [vmem:[%s2909_s13 + $0x690] sm:$0xff] }
 0x13c   : > { %2510 = vst [vmem:[%s2981_s17 + $0xe10] sm:$0xff] %v965_v42  ;;  %2430 = vst [vmem:[%s2981_s17 + $0xb90] sm:$0xff] %v933_v43 }
 0x13f   : > { %1078 = vxpose.xlu1.b32.cont [12/16] %v412_v44, 128  ;;  %v966_v46 = vpop.trf.xlu1  ;;  %1046 = vxpose.xlu0.b32.cont [12/16] %v411_v45, 128  ;;  %v934_v47 = vpop.trf.xlu0  ;;  %v414_v44 = vld [vmem:[%s2909_s13 + $0x6d8] sm:$0xff]  ;;  %v413_v45 = vld [vmem:[%s2909_s13 + $0x6d0] sm:$0xff] }
 0x140   : > { %2515 = vst [vmem:[%s2981_s17 + $0xe38] sm:$0xff] %v966_v46  ;;  %2435 = vst [vmem:[%s2981_s17 + $0xbb8] sm:$0xff] %v934_v47 }
 0x143   : > { %1079 = vxpose.xlu1.b32.cont [13/16] %v420_v48, 128  ;;  %v967_v50 = vpop.trf.xlu1  ;;  %1047 = vxpose.xlu0.b32.cont [13/16] %v419_v49, 128  ;;  %v935_v51 = vpop.trf.xlu0  ;;  %v422_v48 = vld [vmem:[%s2909_s13 + $0x718] sm:$0xff]  ;;  %v421_v49 = vld [vmem:[%s2909_s13 + $0x710] sm:$0xff] }
 0x144   : > { %2520 = vst [vmem:[%s2981_s17 + $0xe60] sm:$0xff] %v967_v50  ;;  %2440 = vst [vmem:[%s2981_s17 + $0xbe0] sm:$0xff] %v935_v51 }
 0x147   : > { %1080 = vxpose.xlu1.b32.cont [14/16] %v428_v52, 128  ;;  %v968_v54 = vpop.trf.xlu1  ;;  %1048 = vxpose.xlu0.b32.cont [14/16] %v427_v53, 128  ;;  %v936_v55 = vpop.trf.xlu0  ;;  %v430_v52 = vld [vmem:[%s2909_s13 + $0x758] sm:$0xff]  ;;  %v429_v53 = vld [vmem:[%s2909_s13 + $0x750] sm:$0xff] }
 0x148   : > { %2525 = vst [vmem:[%s2981_s17 + $0xe88] sm:$0xff] %v968_v54  ;;  %2445 = vst [vmem:[%s2981_s17 + $0xc08] sm:$0xff] %v936_v55 }
 0x14b   : > { %1081 = vxpose.xlu1.b32.cont [15/16] %v436_v56, 128  ;;  %v969_v58 = vpop.trf.xlu1  ;;  %1049 = vxpose.xlu0.b32.cont [15/16] %v435_v57, 128  ;;  %v937_v59 = vpop.trf.xlu0  ;;  %v438_v56 = vld [vmem:[%s2909_s13 + $0x798] sm:$0xff]  ;;  %v437_v57 = vld [vmem:[%s2909_s13 + $0x790] sm:$0xff] }
 0x14c   : > { %2530 = vst [vmem:[%s2981_s17 + $0xeb0] sm:$0xff] %v969_v58  ;;  %2450 = vst [vmem:[%s2981_s17 + $0xc30] sm:$0xff] %v937_v59 }
 0x14f   : > { %1082 = vxpose.xlu1.b32.end [16/16] %v444_v60, 128  ;;  %v970_v62 = vpop.trf.xlu1  ;;  %1050 = vxpose.xlu0.b32.end [16/16] %v443_v61, 128  ;;  %v938_v63 = vpop.trf.xlu0  ;;  %v446_v60 = vld [vmem:[%s2909_s13 + $0x7d8] sm:$0xff]  ;;  %v445_v61 = vld [vmem:[%s2909_s13 + $0x7d0] sm:$0xff] }
 0x150   : > { %2535 = vst [vmem:[%s2981_s17 + $0xed8] sm:$0xff] %v970_v62  ;;  %2455 = vst [vmem:[%s2981_s17 + $0xc58] sm:$0xff] %v938_v63 }
 0x153   : > { %1131 = vxpose.xlu1.b32.start [1/16] %v326_v0, 128  ;;  %v1019_v2 = vpop.trf.xlu1  ;;  %1099 = vxpose.xlu0.b32.start [1/16] %v325_v1, 128  ;;  %v987_v3 = vpop.trf.xlu0  ;;  %v328_v0 = vld [vmem:[%s2909_s13 + $0x428] sm:$0xff]  ;;  %v327_v1 = vld [vmem:[%s2909_s13 + $0x420] sm:$0xff] }
 0x154   : > { %2620 = vst [vmem:[%s2981_s17 + $0x1180] sm:$0xff] %v1019_v2  ;;  %2540 = vst [vmem:[%s2981_s17 + $0xf00] sm:$0xff] %v987_v3 }
 0x157   : > { %1132 = vxpose.xlu1.b32.cont [2/16] %v334_v4, 128  ;;  %v1020_v6 = vpop.trf.xlu1  ;;  %1100 = vxpose.xlu0.b32.cont [2/16] %v333_v5, 128  ;;  %v988_v7 = vpop.trf.xlu0  ;;  %v336_v4 = vld [vmem:[%s2909_s13 + $0x468] sm:$0xff]  ;;  %v335_v5 = vld [vmem:[%s2909_s13 + $0x460] sm:$0xff] }
 0x158   : > { %2625 = vst [vmem:[%s2981_s17 + $0x11a8] sm:$0xff] %v1020_v6  ;;  %2545 = vst [vmem:[%s2981_s17 + $0xf28] sm:$0xff] %v988_v7 }
 0x15b   : > { %1133 = vxpose.xlu1.b32.cont [3/16] %v342_v8, 128  ;;  %v1021_v10 = vpop.trf.xlu1  ;;  %1101 = vxpose.xlu0.b32.cont [3/16] %v341_v9, 128  ;;  %v989_v11 = vpop.trf.xlu0  ;;  %v344_v8 = vld [vmem:[%s2909_s13 + $0x4a8] sm:$0xff]  ;;  %v343_v9 = vld [vmem:[%s2909_s13 + $0x4a0] sm:$0xff] }
 0x15c   : > { %2630 = vst [vmem:[%s2981_s17 + $0x11d0] sm:$0xff] %v1021_v10  ;;  %2550 = vst [vmem:[%s2981_s17 + $0xf50] sm:$0xff] %v989_v11 }
 0x15f   : > { %1134 = vxpose.xlu1.b32.cont [4/16] %v350_v12, 128  ;;  %v1022_v14 = vpop.trf.xlu1  ;;  %1102 = vxpose.xlu0.b32.cont [4/16] %v349_v13, 128  ;;  %v990_v15 = vpop.trf.xlu0  ;;  %v352_v12 = vld [vmem:[%s2909_s13 + $0x4e8] sm:$0xff]  ;;  %v351_v13 = vld [vmem:[%s2909_s13 + $0x4e0] sm:$0xff] }
 0x160   : > { %2635 = vst [vmem:[%s2981_s17 + $0x11f8] sm:$0xff] %v1022_v14  ;;  %2555 = vst [vmem:[%s2981_s17 + $0xf78] sm:$0xff] %v990_v15 }
 0x163   : > { %1135 = vxpose.xlu1.b32.cont [5/16] %v358_v16, 128  ;;  %v1023_v18 = vpop.trf.xlu1  ;;  %1103 = vxpose.xlu0.b32.cont [5/16] %v357_v17, 128  ;;  %v991_v19 = vpop.trf.xlu0  ;;  %v360_v16 = vld [vmem:[%s2909_s13 + $0x528] sm:$0xff]  ;;  %v359_v17 = vld [vmem:[%s2909_s13 + $0x520] sm:$0xff] }
 0x164   : > { %2640 = vst [vmem:[%s2981_s17 + $0x1220] sm:$0xff] %v1023_v18  ;;  %2560 = vst [vmem:[%s2981_s17 + $0xfa0] sm:$0xff] %v991_v19 }
 0x167   : > { %1136 = vxpose.xlu1.b32.cont [6/16] %v366_v20, 128  ;;  %v1024_v22 = vpop.trf.xlu1  ;;  %1104 = vxpose.xlu0.b32.cont [6/16] %v365_v21, 128  ;;  %v992_v23 = vpop.trf.xlu0  ;;  %v368_v20 = vld [vmem:[%s2909_s13 + $0x568] sm:$0xff]  ;;  %v367_v21 = vld [vmem:[%s2909_s13 + $0x560] sm:$0xff] }
 0x168   : > { %2645 = vst [vmem:[%s2981_s17 + $0x1248] sm:$0xff] %v1024_v22  ;;  %2565 = vst [vmem:[%s2981_s17 + $0xfc8] sm:$0xff] %v992_v23 }
 0x16b   : > { %1137 = vxpose.xlu1.b32.cont [7/16] %v374_v24, 128  ;;  %v1025_v26 = vpop.trf.xlu1  ;;  %1105 = vxpose.xlu0.b32.cont [7/16] %v373_v25, 128  ;;  %v993_v27 = vpop.trf.xlu0  ;;  %v376_v24 = vld [vmem:[%s2909_s13 + $0x5a8] sm:$0xff]  ;;  %v375_v25 = vld [vmem:[%s2909_s13 + $0x5a0] sm:$0xff] }
 0x16c   : > { %2650 = vst [vmem:[%s2981_s17 + $0x1270] sm:$0xff] %v1025_v26  ;;  %2570 = vst [vmem:[%s2981_s17 + $0xff0] sm:$0xff] %v993_v27 }
 0x16f   : > { %1138 = vxpose.xlu1.b32.cont [8/16] %v382_v28, 128  ;;  %v1026_v30 = vpop.trf.xlu1  ;;  %1106 = vxpose.xlu0.b32.cont [8/16] %v381_v29, 128  ;;  %v994_v31 = vpop.trf.xlu0  ;;  %v384_v28 = vld [vmem:[%s2909_s13 + $0x5e8] sm:$0xff]  ;;  %v383_v29 = vld [vmem:[%s2909_s13 + $0x5e0] sm:$0xff] }
 0x170   : > { %2655 = vst [vmem:[%s2981_s17 + $0x1298] sm:$0xff] %v1026_v30  ;;  %2575 = vst [vmem:[%s2981_s17 + $0x1018] sm:$0xff] %v994_v31 }
 0x173   : > { %1139 = vxpose.xlu1.b32.cont [9/16] %v390_v32, 128  ;;  %v1027_v34 = vpop.trf.xlu1  ;;  %1107 = vxpose.xlu0.b32.cont [9/16] %v389_v33, 128  ;;  %v995_v35 = vpop.trf.xlu0  ;;  %v392_v32 = vld [vmem:[%s2909_s13 + $0x628] sm:$0xff]  ;;  %v391_v33 = vld [vmem:[%s2909_s13 + $0x620] sm:$0xff] }
 0x174   : > { %2660 = vst [vmem:[%s2981_s17 + $0x12c0] sm:$0xff] %v1027_v34  ;;  %2580 = vst [vmem:[%s2981_s17 + $0x1040] sm:$0xff] %v995_v35 }
 0x177   : > { %1140 = vxpose.xlu1.b32.cont [10/16] %v398_v36, 128  ;;  %v1028_v38 = vpop.trf.xlu1  ;;  %1108 = vxpose.xlu0.b32.cont [10/16] %v397_v37, 128  ;;  %v996_v39 = vpop.trf.xlu0  ;;  %v400_v36 = vld [vmem:[%s2909_s13 + $0x668] sm:$0xff]  ;;  %v399_v37 = vld [vmem:[%s2909_s13 + $0x660] sm:$0xff] }
 0x178   : > { %2665 = vst [vmem:[%s2981_s17 + $0x12e8] sm:$0xff] %v1028_v38  ;;  %2585 = vst [vmem:[%s2981_s17 + $0x1068] sm:$0xff] %v996_v39 }
 0x17b   : > { %1141 = vxpose.xlu1.b32.cont [11/16] %v406_v40, 128  ;;  %v1029_v42 = vpop.trf.xlu1  ;;  %1109 = vxpose.xlu0.b32.cont [11/16] %v405_v41, 128  ;;  %v997_v43 = vpop.trf.xlu0  ;;  %v408_v40 = vld [vmem:[%s2909_s13 + $0x6a8] sm:$0xff]  ;;  %v407_v41 = vld [vmem:[%s2909_s13 + $0x6a0] sm:$0xff] }
 0x17c   : > { %2670 = vst [vmem:[%s2981_s17 + $0x1310] sm:$0xff] %v1029_v42  ;;  %2590 = vst [vmem:[%s2981_s17 + $0x1090] sm:$0xff] %v997_v43 }
 0x17f   : > { %1142 = vxpose.xlu1.b32.cont [12/16] %v414_v44, 128  ;;  %v1030_v46 = vpop.trf.xlu1  ;;  %1110 = vxpose.xlu0.b32.cont [12/16] %v413_v45, 128  ;;  %v998_v47 = vpop.trf.xlu0  ;;  %v416_v44 = vld [vmem:[%s2909_s13 + $0x6e8] sm:$0xff]  ;;  %v415_v45 = vld [vmem:[%s2909_s13 + $0x6e0] sm:$0xff] }
 0x180   : > { %2675 = vst [vmem:[%s2981_s17 + $0x1338] sm:$0xff] %v1030_v46  ;;  %2595 = vst [vmem:[%s2981_s17 + $0x10b8] sm:$0xff] %v998_v47 }
 0x183   : > { %1143 = vxpose.xlu1.b32.cont [13/16] %v422_v48, 128  ;;  %v1031_v50 = vpop.trf.xlu1  ;;  %1111 = vxpose.xlu0.b32.cont [13/16] %v421_v49, 128  ;;  %v999_v51 = vpop.trf.xlu0  ;;  %v424_v48 = vld [vmem:[%s2909_s13 + $0x728] sm:$0xff]  ;;  %v423_v49 = vld [vmem:[%s2909_s13 + $0x720] sm:$0xff] }
 0x184   : > { %2680 = vst [vmem:[%s2981_s17 + $0x1360] sm:$0xff] %v1031_v50  ;;  %2600 = vst [vmem:[%s2981_s17 + $0x10e0] sm:$0xff] %v999_v51 }
 0x187   : > { %1144 = vxpose.xlu1.b32.cont [14/16] %v430_v52, 128  ;;  %v1032_v54 = vpop.trf.xlu1  ;;  %1112 = vxpose.xlu0.b32.cont [14/16] %v429_v53, 128  ;;  %v1000_v55 = vpop.trf.xlu0  ;;  %v432_v52 = vld [vmem:[%s2909_s13 + $0x768] sm:$0xff]  ;;  %v431_v53 = vld [vmem:[%s2909_s13 + $0x760] sm:$0xff] }
 0x188   : > { %2685 = vst [vmem:[%s2981_s17 + $0x1388] sm:$0xff] %v1032_v54  ;;  %2605 = vst [vmem:[%s2981_s17 + $0x1108] sm:$0xff] %v1000_v55 }
 0x18b   : > { %1145 = vxpose.xlu1.b32.cont [15/16] %v438_v56, 128  ;;  %v1033_v58 = vpop.trf.xlu1  ;;  %1113 = vxpose.xlu0.b32.cont [15/16] %v437_v57, 128  ;;  %v1001_v59 = vpop.trf.xlu0  ;;  %v440_v56 = vld [vmem:[%s2909_s13 + $0x7a8] sm:$0xff]  ;;  %v439_v57 = vld [vmem:[%s2909_s13 + $0x7a0] sm:$0xff] }
 0x18c   : > { %2690 = vst [vmem:[%s2981_s17 + $0x13b0] sm:$0xff] %v1033_v58  ;;  %2610 = vst [vmem:[%s2981_s17 + $0x1130] sm:$0xff] %v1001_v59 }
 0x18f   : > { %1146 = vxpose.xlu1.b32.end [16/16] %v446_v60, 128  ;;  %v1034_v62 = vpop.trf.xlu1  ;;  %1114 = vxpose.xlu0.b32.end [16/16] %v445_v61, 128  ;;  %v1002_v63 = vpop.trf.xlu0  ;;  %v448_v60 = vld [vmem:[%s2909_s13 + $0x7e8] sm:$0xff]  ;;  %v447_v61 = vld [vmem:[%s2909_s13 + $0x7e0] sm:$0xff] }
 0x190   : > { %2695 = vst [vmem:[%s2981_s17 + $0x13d8] sm:$0xff] %v1034_v62  ;;  %2615 = vst [vmem:[%s2981_s17 + $0x1158] sm:$0xff] %v1002_v63 }
 0x193   : > { %1195 = vxpose.xlu1.b32.start [1/16] %v328_v0, 128  ;;  %v1083_v2 = vpop.trf.xlu1  ;;  %1163 = vxpose.xlu0.b32.start [1/16] %v327_v1, 128  ;;  %v1051_v3 = vpop.trf.xlu0  ;;  %v330_v0 = vld [vmem:[%s2909_s13 + $0x438] sm:$0xff]  ;;  %v329_v1 = vld [vmem:[%s2909_s13 + $0x430] sm:$0xff] }
 0x194   : > { %2141 = vst [vmem:[%s2981_s17 + $0x288] sm:$0xff] %v1083_v2  ;;  %2060 = vst [vmem:[%s2981_s17 + $0x8] sm:$0xff] %v1051_v3 }
 0x197   : > { %1196 = vxpose.xlu1.b32.cont [2/16] %v336_v4, 128  ;;  %v1084_v6 = vpop.trf.xlu1  ;;  %1164 = vxpose.xlu0.b32.cont [2/16] %v335_v5, 128  ;;  %v1052_v7 = vpop.trf.xlu0  ;;  %v338_v4 = vld [vmem:[%s2909_s13 + $0x478] sm:$0xff]  ;;  %v337_v5 = vld [vmem:[%s2909_s13 + $0x470] sm:$0xff] }
 0x198   : > { %2146 = vst [vmem:[%s2981_s17 + $0x2b0] sm:$0xff] %v1084_v6  ;;  %2066 = vst [vmem:[%s2981_s17 + $0x30] sm:$0xff] %v1052_v7 }
 0x19b   : > { %1197 = vxpose.xlu1.b32.cont [3/16] %v344_v8, 128  ;;  %v1085_v10 = vpop.trf.xlu1  ;;  %1165 = vxpose.xlu0.b32.cont [3/16] %v343_v9, 128  ;;  %v1053_v11 = vpop.trf.xlu0  ;;  %v346_v8 = vld [vmem:[%s2909_s13 + $0x4b8] sm:$0xff]  ;;  %v345_v9 = vld [vmem:[%s2909_s13 + $0x4b0] sm:$0xff] }
 0x19c   : > { %2151 = vst [vmem:[%s2981_s17 + $0x2d8] sm:$0xff] %v1085_v10  ;;  %2071 = vst [vmem:[%s2981_s17 + $0x58] sm:$0xff] %v1053_v11 }
 0x19f   : > { %1198 = vxpose.xlu1.b32.cont [4/16] %v352_v12, 128  ;;  %v1086_v14 = vpop.trf.xlu1  ;;  %1166 = vxpose.xlu0.b32.cont [4/16] %v351_v13, 128  ;;  %v1054_v15 = vpop.trf.xlu0  ;;  %v354_v12 = vld [vmem:[%s2909_s13 + $0x4f8] sm:$0xff]  ;;  %v353_v13 = vld [vmem:[%s2909_s13 + $0x4f0] sm:$0xff] }
 0x1a0   : > { %2156 = vst [vmem:[%s2981_s17 + $0x300] sm:$0xff] %v1086_v14  ;;  %2076 = vst [vmem:[%s2981_s17 + $0x80] sm:$0xff] %v1054_v15 }
 0x1a3   : > { %1199 = vxpose.xlu1.b32.cont [5/16] %v360_v16, 128  ;;  %v1087_v18 = vpop.trf.xlu1  ;;  %1167 = vxpose.xlu0.b32.cont [5/16] %v359_v17, 128  ;;  %v1055_v19 = vpop.trf.xlu0  ;;  %v362_v16 = vld [vmem:[%s2909_s13 + $0x538] sm:$0xff]  ;;  %v361_v17 = vld [vmem:[%s2909_s13 + $0x530] sm:$0xff] }
 0x1a4   : > { %2161 = vst [vmem:[%s2981_s17 + $0x328] sm:$0xff] %v1087_v18  ;;  %2081 = vst [vmem:[%s2981_s17 + $0xa8] sm:$0xff] %v1055_v19 }
 0x1a7   : > { %1200 = vxpose.xlu1.b32.cont [6/16] %v368_v20, 128  ;;  %v1088_v22 = vpop.trf.xlu1  ;;  %1168 = vxpose.xlu0.b32.cont [6/16] %v367_v21, 128  ;;  %v1056_v23 = vpop.trf.xlu0  ;;  %v370_v20 = vld [vmem:[%s2909_s13 + $0x578] sm:$0xff]  ;;  %v369_v21 = vld [vmem:[%s2909_s13 + $0x570] sm:$0xff] }
 0x1a8   : > { %2166 = vst [vmem:[%s2981_s17 + $0x350] sm:$0xff] %v1088_v22  ;;  %2086 = vst [vmem:[%s2981_s17 + $0xd0] sm:$0xff] %v1056_v23 }
 0x1ab   : > { %1201 = vxpose.xlu1.b32.cont [7/16] %v376_v24, 128  ;;  %v1089_v26 = vpop.trf.xlu1  ;;  %1169 = vxpose.xlu0.b32.cont [7/16] %v375_v25, 128  ;;  %v1057_v27 = vpop.trf.xlu0  ;;  %v378_v24 = vld [vmem:[%s2909_s13 + $0x5b8] sm:$0xff]  ;;  %v377_v25 = vld [vmem:[%s2909_s13 + $0x5b0] sm:$0xff] }
 0x1ac   : > { %2171 = vst [vmem:[%s2981_s17 + $0x378] sm:$0xff] %v1089_v26  ;;  %2091 = vst [vmem:[%s2981_s17 + $0xf8] sm:$0xff] %v1057_v27 }
 0x1af   : > { %1202 = vxpose.xlu1.b32.cont [8/16] %v384_v28, 128  ;;  %v1090_v30 = vpop.trf.xlu1  ;;  %1170 = vxpose.xlu0.b32.cont [8/16] %v383_v29, 128  ;;  %v1058_v31 = vpop.trf.xlu0  ;;  %v386_v28 = vld [vmem:[%s2909_s13 + $0x5f8] sm:$0xff]  ;;  %v385_v29 = vld [vmem:[%s2909_s13 + $0x5f0] sm:$0xff] }
 0x1b0   : > { %2176 = vst [vmem:[%s2981_s17 + $0x3a0] sm:$0xff] %v1090_v30  ;;  %2096 = vst [vmem:[%s2981_s17 + $0x120] sm:$0xff] %v1058_v31 }
 0x1b3   : > { %1203 = vxpose.xlu1.b32.cont [9/16] %v392_v32, 128  ;;  %v1091_v34 = vpop.trf.xlu1  ;;  %1171 = vxpose.xlu0.b32.cont [9/16] %v391_v33, 128  ;;  %v1059_v35 = vpop.trf.xlu0  ;;  %v394_v32 = vld [vmem:[%s2909_s13 + $0x638] sm:$0xff]  ;;  %v393_v33 = vld [vmem:[%s2909_s13 + $0x630] sm:$0xff] }
 0x1b4   : > { %2181 = vst [vmem:[%s2981_s17 + $0x3c8] sm:$0xff] %v1091_v34  ;;  %2101 = vst [vmem:[%s2981_s17 + $0x148] sm:$0xff] %v1059_v35 }
 0x1b7   : > { %1204 = vxpose.xlu1.b32.cont [10/16] %v400_v36, 128  ;;  %v1092_v38 = vpop.trf.xlu1  ;;  %1172 = vxpose.xlu0.b32.cont [10/16] %v399_v37, 128  ;;  %v1060_v39 = vpop.trf.xlu0  ;;  %v402_v36 = vld [vmem:[%s2909_s13 + $0x678] sm:$0xff]  ;;  %v401_v37 = vld [vmem:[%s2909_s13 + $0x670] sm:$0xff] }
 0x1b8   : > { %2186 = vst [vmem:[%s2981_s17 + $0x3f0] sm:$0xff] %v1092_v38  ;;  %2106 = vst [vmem:[%s2981_s17 + $0x170] sm:$0xff] %v1060_v39 }
 0x1bb   : > { %1205 = vxpose.xlu1.b32.cont [11/16] %v408_v40, 128  ;;  %v1093_v42 = vpop.trf.xlu1  ;;  %1173 = vxpose.xlu0.b32.cont [11/16] %v407_v41, 128  ;;  %v1061_v43 = vpop.trf.xlu0  ;;  %v410_v40 = vld [vmem:[%s2909_s13 + $0x6b8] sm:$0xff]  ;;  %v409_v41 = vld [vmem:[%s2909_s13 + $0x6b0] sm:$0xff] }
 0x1bc   : > { %2191 = vst [vmem:[%s2981_s17 + $0x418] sm:$0xff] %v1093_v42  ;;  %2111 = vst [vmem:[%s2981_s17 + $0x198] sm:$0xff] %v1061_v43 }
 0x1bf   : > { %1206 = vxpose.xlu1.b32.cont [12/16] %v416_v44, 128  ;;  %v1094_v46 = vpop.trf.xlu1  ;;  %1174 = vxpose.xlu0.b32.cont [12/16] %v415_v45, 128  ;;  %v1062_v47 = vpop.trf.xlu0  ;;  %v418_v44 = vld [vmem:[%s2909_s13 + $0x6f8] sm:$0xff]  ;;  %v417_v45 = vld [vmem:[%s2909_s13 + $0x6f0] sm:$0xff] }
 0x1c0   : > { %2196 = vst [vmem:[%s2981_s17 + $0x440] sm:$0xff] %v1094_v46  ;;  %2116 = vst [vmem:[%s2981_s17 + $0x1c0] sm:$0xff] %v1062_v47 }
 0x1c3   : > { %1207 = vxpose.xlu1.b32.cont [13/16] %v424_v48, 128  ;;  %v1095_v50 = vpop.trf.xlu1  ;;  %1175 = vxpose.xlu0.b32.cont [13/16] %v423_v49, 128  ;;  %v1063_v51 = vpop.trf.xlu0  ;;  %v426_v48 = vld [vmem:[%s2909_s13 + $0x738] sm:$0xff]  ;;  %v425_v49 = vld [vmem:[%s2909_s13 + $0x730] sm:$0xff] }
 0x1c4   : > { %2201 = vst [vmem:[%s2981_s17 + $0x468] sm:$0xff] %v1095_v50  ;;  %2121 = vst [vmem:[%s2981_s17 + $0x1e8] sm:$0xff] %v1063_v51 }
 0x1c7   : > { %1208 = vxpose.xlu1.b32.cont [14/16] %v432_v52, 128  ;;  %v1096_v54 = vpop.trf.xlu1  ;;  %1176 = vxpose.xlu0.b32.cont [14/16] %v431_v53, 128  ;;  %v1064_v55 = vpop.trf.xlu0  ;;  %v434_v52 = vld [vmem:[%s2909_s13 + $0x778] sm:$0xff]  ;;  %v433_v53 = vld [vmem:[%s2909_s13 + $0x770] sm:$0xff] }
 0x1c8   : > { %2206 = vst [vmem:[%s2981_s17 + $0x490] sm:$0xff] %v1096_v54  ;;  %2126 = vst [vmem:[%s2981_s17 + $0x210] sm:$0xff] %v1064_v55 }
 0x1cb   : > { %1209 = vxpose.xlu1.b32.cont [15/16] %v440_v56, 128  ;;  %v1097_v58 = vpop.trf.xlu1  ;;  %1177 = vxpose.xlu0.b32.cont [15/16] %v439_v57, 128  ;;  %v1065_v59 = vpop.trf.xlu0  ;;  %v442_v56 = vld [vmem:[%s2909_s13 + $0x7b8] sm:$0xff]  ;;  %v441_v57 = vld [vmem:[%s2909_s13 + $0x7b0] sm:$0xff] }
 0x1cc   : > { %2211 = vst [vmem:[%s2981_s17 + $0x4b8] sm:$0xff] %v1097_v58  ;;  %2131 = vst [vmem:[%s2981_s17 + $0x238] sm:$0xff] %v1065_v59 }
 0x1cf   : > { %1210 = vxpose.xlu1.b32.end [16/16] %v448_v60, 128  ;;  %v1098_v62 = vpop.trf.xlu1  ;;  %1178 = vxpose.xlu0.b32.end [16/16] %v447_v61, 128  ;;  %v1066_v63 = vpop.trf.xlu0  ;;  %v450_v60 = vld [vmem:[%s2909_s13 + $0x7f8] sm:$0xff]  ;;  %v449_v61 = vld [vmem:[%s2909_s13 + $0x7f0] sm:$0xff] }
 0x1d0   : > { %2216 = vst [vmem:[%s2981_s17 + $0x4e0] sm:$0xff] %v1098_v62  ;;  %2136 = vst [vmem:[%s2981_s17 + $0x260] sm:$0xff] %v1066_v63 }
 0x1d3   : > { %1259 = vxpose.xlu1.b32.start [1/16] %v330_v0, 128  ;;  %v1147_v2 = vpop.trf.xlu1  ;;  %1227 = vxpose.xlu0.b32.start [1/16] %v329_v1, 128  ;;  %v1115_v3 = vpop.trf.xlu0  ;;  %v452_v0 = vld [vmem:[%s2909_s13 + $0x808] sm:$0xff]  ;;  %v451_v1 = vld [vmem:[%s2909_s13 + $0x800] sm:$0xff] }
 0x1d4   : > { %2301 = vst [vmem:[%s2981_s17 + $0x788] sm:$0xff] %v1147_v2  ;;  %2221 = vst [vmem:[%s2981_s17 + $0x508] sm:$0xff] %v1115_v3 }
 0x1d7   : > { %1260 = vxpose.xlu1.b32.cont [2/16] %v338_v4, 128  ;;  %v1148_v6 = vpop.trf.xlu1  ;;  %1228 = vxpose.xlu0.b32.cont [2/16] %v337_v5, 128  ;;  %v1116_v7 = vpop.trf.xlu0  ;;  %v460_v4 = vld [vmem:[%s2909_s13 + $0x848] sm:$0xff]  ;;  %v459_v5 = vld [vmem:[%s2909_s13 + $0x840] sm:$0xff] }
 0x1d8   : > { %2306 = vst [vmem:[%s2981_s17 + $0x7b0] sm:$0xff] %v1148_v6  ;;  %2226 = vst [vmem:[%s2981_s17 + $0x530] sm:$0xff] %v1116_v7 }
 0x1db   : > { %1261 = vxpose.xlu1.b32.cont [3/16] %v346_v8, 128  ;;  %v1149_v10 = vpop.trf.xlu1  ;;  %1229 = vxpose.xlu0.b32.cont [3/16] %v345_v9, 128  ;;  %v1117_v11 = vpop.trf.xlu0  ;;  %v468_v8 = vld [vmem:[%s2909_s13 + $0x888] sm:$0xff]  ;;  %v467_v9 = vld [vmem:[%s2909_s13 + $0x880] sm:$0xff] }
 0x1dc   : > { %2311 = vst [vmem:[%s2981_s17 + $0x7d8] sm:$0xff] %v1149_v10  ;;  %2231 = vst [vmem:[%s2981_s17 + $0x558] sm:$0xff] %v1117_v11 }
 0x1df   : > { %1262 = vxpose.xlu1.b32.cont [4/16] %v354_v12, 128  ;;  %v1150_v14 = vpop.trf.xlu1  ;;  %1230 = vxpose.xlu0.b32.cont [4/16] %v353_v13, 128  ;;  %v1118_v15 = vpop.trf.xlu0  ;;  %v476_v12 = vld [vmem:[%s2909_s13 + $0x8c8] sm:$0xff]  ;;  %v475_v13 = vld [vmem:[%s2909_s13 + $0x8c0] sm:$0xff] }
 0x1e0   : > { %2316 = vst [vmem:[%s2981_s17 + $0x800] sm:$0xff] %v1150_v14  ;;  %2236 = vst [vmem:[%s2981_s17 + $0x580] sm:$0xff] %v1118_v15 }
 0x1e3   : > { %1263 = vxpose.xlu1.b32.cont [5/16] %v362_v16, 128  ;;  %v1151_v18 = vpop.trf.xlu1  ;;  %1231 = vxpose.xlu0.b32.cont [5/16] %v361_v17, 128  ;;  %v1119_v19 = vpop.trf.xlu0  ;;  %v484_v16 = vld [vmem:[%s2909_s13 + $0x908] sm:$0xff]  ;;  %v483_v17 = vld [vmem:[%s2909_s13 + $0x900] sm:$0xff] }
 0x1e4   : > { %2321 = vst [vmem:[%s2981_s17 + $0x828] sm:$0xff] %v1151_v18  ;;  %2241 = vst [vmem:[%s2981_s17 + $0x5a8] sm:$0xff] %v1119_v19 }
 0x1e7   : > { %1264 = vxpose.xlu1.b32.cont [6/16] %v370_v20, 128  ;;  %v1152_v22 = vpop.trf.xlu1  ;;  %1232 = vxpose.xlu0.b32.cont [6/16] %v369_v21, 128  ;;  %v1120_v23 = vpop.trf.xlu0  ;;  %v492_v20 = vld [vmem:[%s2909_s13 + $0x948] sm:$0xff]  ;;  %v491_v21 = vld [vmem:[%s2909_s13 + $0x940] sm:$0xff] }
 0x1e8   : > { %2326 = vst [vmem:[%s2981_s17 + $0x850] sm:$0xff] %v1152_v22  ;;  %2246 = vst [vmem:[%s2981_s17 + $0x5d0] sm:$0xff] %v1120_v23 }
 0x1eb   : > { %1265 = vxpose.xlu1.b32.cont [7/16] %v378_v24, 128  ;;  %v1153_v26 = vpop.trf.xlu1  ;;  %1233 = vxpose.xlu0.b32.cont [7/16] %v377_v25, 128  ;;  %v1121_v27 = vpop.trf.xlu0  ;;  %v500_v24 = vld [vmem:[%s2909_s13 + $0x988] sm:$0xff]  ;;  %v499_v25 = vld [vmem:[%s2909_s13 + $0x980] sm:$0xff] }
 0x1ec   : > { %2331 = vst [vmem:[%s2981_s17 + $0x878] sm:$0xff] %v1153_v26  ;;  %2251 = vst [vmem:[%s2981_s17 + $0x5f8] sm:$0xff] %v1121_v27 }
 0x1ef   : > { %1266 = vxpose.xlu1.b32.cont [8/16] %v386_v28, 128  ;;  %v1154_v30 = vpop.trf.xlu1  ;;  %1234 = vxpose.xlu0.b32.cont [8/16] %v385_v29, 128  ;;  %v1122_v31 = vpop.trf.xlu0  ;;  %v508_v28 = vld [vmem:[%s2909_s13 + $0x9c8] sm:$0xff]  ;;  %v507_v29 = vld [vmem:[%s2909_s13 + $0x9c0] sm:$0xff] }
 0x1f0   : > { %2336 = vst [vmem:[%s2981_s17 + $0x8a0] sm:$0xff] %v1154_v30  ;;  %2256 = vst [vmem:[%s2981_s17 + $0x620] sm:$0xff] %v1122_v31 }
 0x1f3   : > { %1267 = vxpose.xlu1.b32.cont [9/16] %v394_v32, 128  ;;  %v1155_v34 = vpop.trf.xlu1  ;;  %1235 = vxpose.xlu0.b32.cont [9/16] %v393_v33, 128  ;;  %v1123_v35 = vpop.trf.xlu0  ;;  %v516_v32 = vld [vmem:[%s2909_s13 + $0xa08] sm:$0xff]  ;;  %v515_v33 = vld [vmem:[%s2909_s13 + $0xa00] sm:$0xff] }
 0x1f4   : > { %2341 = vst [vmem:[%s2981_s17 + $0x8c8] sm:$0xff] %v1155_v34  ;;  %2261 = vst [vmem:[%s2981_s17 + $0x648] sm:$0xff] %v1123_v35 }
 0x1f7   : > { %1268 = vxpose.xlu1.b32.cont [10/16] %v402_v36, 128  ;;  %v1156_v38 = vpop.trf.xlu1  ;;  %1236 = vxpose.xlu0.b32.cont [10/16] %v401_v37, 128  ;;  %v1124_v39 = vpop.trf.xlu0  ;;  %v524_v36 = vld [vmem:[%s2909_s13 + $0xa48] sm:$0xff]  ;;  %v523_v37 = vld [vmem:[%s2909_s13 + $0xa40] sm:$0xff] }
 0x1f8   : > { %2346 = vst [vmem:[%s2981_s17 + $0x8f0] sm:$0xff] %v1156_v38  ;;  %2266 = vst [vmem:[%s2981_s17 + $0x670] sm:$0xff] %v1124_v39 }
 0x1fb   : > { %1269 = vxpose.xlu1.b32.cont [11/16] %v410_v40, 128  ;;  %v1157_v42 = vpop.trf.xlu1  ;;  %1237 = vxpose.xlu0.b32.cont [11/16] %v409_v41, 128  ;;  %v1125_v43 = vpop.trf.xlu0  ;;  %v532_v40 = vld [vmem:[%s2909_s13 + $0xa88] sm:$0xff]  ;;  %v531_v41 = vld [vmem:[%s2909_s13 + $0xa80] sm:$0xff] }
 0x1fc   : > { %2351 = vst [vmem:[%s2981_s17 + $0x918] sm:$0xff] %v1157_v42  ;;  %2271 = vst [vmem:[%s2981_s17 + $0x698] sm:$0xff] %v1125_v43 }
 0x1ff   : > { %1270 = vxpose.xlu1.b32.cont [12/16] %v418_v44, 128  ;;  %v1158_v46 = vpop.trf.xlu1  ;;  %1238 = vxpose.xlu0.b32.cont [12/16] %v417_v45, 128  ;;  %v1126_v47 = vpop.trf.xlu0  ;;  %v540_v44 = vld [vmem:[%s2909_s13 + $0xac8] sm:$0xff]  ;;  %v539_v45 = vld [vmem:[%s2909_s13 + $0xac0] sm:$0xff] }
 0x200   : > { %2356 = vst [vmem:[%s2981_s17 + $0x940] sm:$0xff] %v1158_v46  ;;  %2276 = vst [vmem:[%s2981_s17 + $0x6c0] sm:$0xff] %v1126_v47 }
 0x203   : > { %1271 = vxpose.xlu1.b32.cont [13/16] %v426_v48, 128  ;;  %v1159_v50 = vpop.trf.xlu1  ;;  %1239 = vxpose.xlu0.b32.cont [13/16] %v425_v49, 128  ;;  %v1127_v51 = vpop.trf.xlu0  ;;  %v548_v48 = vld [vmem:[%s2909_s13 + $0xb08] sm:$0xff]  ;;  %v547_v49 = vld [vmem:[%s2909_s13 + $0xb00] sm:$0xff] }
 0x204   : > { %2361 = vst [vmem:[%s2981_s17 + $0x968] sm:$0xff] %v1159_v50  ;;  %2281 = vst [vmem:[%s2981_s17 + $0x6e8] sm:$0xff] %v1127_v51 }
 0x207   : > { %1272 = vxpose.xlu1.b32.cont [14/16] %v434_v52, 128  ;;  %v1160_v54 = vpop.trf.xlu1  ;;  %1240 = vxpose.xlu0.b32.cont [14/16] %v433_v53, 128  ;;  %v1128_v55 = vpop.trf.xlu0  ;;  %v556_v52 = vld [vmem:[%s2909_s13 + $0xb48] sm:$0xff]  ;;  %v555_v53 = vld [vmem:[%s2909_s13 + $0xb40] sm:$0xff] }
 0x208   : > { %2366 = vst [vmem:[%s2981_s17 + $0x990] sm:$0xff] %v1160_v54  ;;  %2286 = vst [vmem:[%s2981_s17 + $0x710] sm:$0xff] %v1128_v55 }
 0x20b   : > { %1273 = vxpose.xlu1.b32.cont [15/16] %v442_v56, 128  ;;  %v1161_v58 = vpop.trf.xlu1  ;;  %1241 = vxpose.xlu0.b32.cont [15/16] %v441_v57, 128  ;;  %v1129_v59 = vpop.trf.xlu0  ;;  %v564_v56 = vld [vmem:[%s2909_s13 + $0xb88] sm:$0xff]  ;;  %v563_v57 = vld [vmem:[%s2909_s13 + $0xb80] sm:$0xff] }
 0x20c   : > { %2371 = vst [vmem:[%s2981_s17 + $0x9b8] sm:$0xff] %v1161_v58  ;;  %2291 = vst [vmem:[%s2981_s17 + $0x738] sm:$0xff] %v1129_v59 }
 0x20f   : > { %1274 = vxpose.xlu1.b32.end [16/16] %v450_v60, 128  ;;  %v1162_v62 = vpop.trf.xlu1  ;;  %1242 = vxpose.xlu0.b32.end [16/16] %v449_v61, 128  ;;  %v1130_v63 = vpop.trf.xlu0  ;;  %v572_v60 = vld [vmem:[%s2909_s13 + $0xbc8] sm:$0xff]  ;;  %v571_v61 = vld [vmem:[%s2909_s13 + $0xbc0] sm:$0xff] }
 0x210   : > { %2376 = vst [vmem:[%s2981_s17 + $0x9e0] sm:$0xff] %v1162_v62  ;;  %2296 = vst [vmem:[%s2981_s17 + $0x760] sm:$0xff] %v1130_v63 }
 0x213   : > { %1323 = vxpose.xlu1.b32.start [1/16] %v452_v0, 128  ;;  %v1211_v2 = vpop.trf.xlu1  ;;  %1291 = vxpose.xlu0.b32.start [1/16] %v451_v1, 128  ;;  %v1179_v3 = vpop.trf.xlu0  ;;  %v454_v0 = vld [vmem:[%s2909_s13 + $0x818] sm:$0xff]  ;;  %v453_v1 = vld [vmem:[%s2909_s13 + $0x810] sm:$0xff] }
 0x214   : > { %2461 = vst [vmem:[%s2981_s17 + $0xc88] sm:$0xff] %v1211_v2  ;;  %2381 = vst [vmem:[%s2981_s17 + $0xa08] sm:$0xff] %v1179_v3 }
 0x217   : > { %1324 = vxpose.xlu1.b32.cont [2/16] %v460_v4, 128  ;;  %v1212_v6 = vpop.trf.xlu1  ;;  %1292 = vxpose.xlu0.b32.cont [2/16] %v459_v5, 128  ;;  %v1180_v7 = vpop.trf.xlu0  ;;  %v462_v4 = vld [vmem:[%s2909_s13 + $0x858] sm:$0xff]  ;;  %v461_v5 = vld [vmem:[%s2909_s13 + $0x850] sm:$0xff] }
 0x218   : > { %2466 = vst [vmem:[%s2981_s17 + $0xcb0] sm:$0xff] %v1212_v6  ;;  %2386 = vst [vmem:[%s2981_s17 + $0xa30] sm:$0xff] %v1180_v7 }
 0x21b   : > { %1325 = vxpose.xlu1.b32.cont [3/16] %v468_v8, 128  ;;  %v1213_v10 = vpop.trf.xlu1  ;;  %1293 = vxpose.xlu0.b32.cont [3/16] %v467_v9, 128  ;;  %v1181_v11 = vpop.trf.xlu0  ;;  %v470_v8 = vld [vmem:[%s2909_s13 + $0x898] sm:$0xff]  ;;  %v469_v9 = vld [vmem:[%s2909_s13 + $0x890] sm:$0xff] }
 0x21c   : > { %2471 = vst [vmem:[%s2981_s17 + $0xcd8] sm:$0xff] %v1213_v10  ;;  %2391 = vst [vmem:[%s2981_s17 + $0xa58] sm:$0xff] %v1181_v11 }
 0x21f   : > { %1326 = vxpose.xlu1.b32.cont [4/16] %v476_v12, 128  ;;  %v1214_v14 = vpop.trf.xlu1  ;;  %1294 = vxpose.xlu0.b32.cont [4/16] %v475_v13, 128  ;;  %v1182_v15 = vpop.trf.xlu0  ;;  %v478_v12 = vld [vmem:[%s2909_s13 + $0x8d8] sm:$0xff]  ;;  %v477_v13 = vld [vmem:[%s2909_s13 + $0x8d0] sm:$0xff] }
 0x220   : > { %2476 = vst [vmem:[%s2981_s17 + $0xd00] sm:$0xff] %v1214_v14  ;;  %2396 = vst [vmem:[%s2981_s17 + $0xa80] sm:$0xff] %v1182_v15 }
 0x223   : > { %1327 = vxpose.xlu1.b32.cont [5/16] %v484_v16, 128  ;;  %v1215_v18 = vpop.trf.xlu1  ;;  %1295 = vxpose.xlu0.b32.cont [5/16] %v483_v17, 128  ;;  %v1183_v19 = vpop.trf.xlu0  ;;  %v486_v16 = vld [vmem:[%s2909_s13 + $0x918] sm:$0xff]  ;;  %v485_v17 = vld [vmem:[%s2909_s13 + $0x910] sm:$0xff] }
 0x224   : > { %2481 = vst [vmem:[%s2981_s17 + $0xd28] sm:$0xff] %v1215_v18  ;;  %2401 = vst [vmem:[%s2981_s17 + $0xaa8] sm:$0xff] %v1183_v19 }
 0x227   : > { %1328 = vxpose.xlu1.b32.cont [6/16] %v492_v20, 128  ;;  %v1216_v22 = vpop.trf.xlu1  ;;  %1296 = vxpose.xlu0.b32.cont [6/16] %v491_v21, 128  ;;  %v1184_v23 = vpop.trf.xlu0  ;;  %v494_v20 = vld [vmem:[%s2909_s13 + $0x958] sm:$0xff]  ;;  %v493_v21 = vld [vmem:[%s2909_s13 + $0x950] sm:$0xff] }
 0x228   : > { %2486 = vst [vmem:[%s2981_s17 + $0xd50] sm:$0xff] %v1216_v22  ;;  %2406 = vst [vmem:[%s2981_s17 + $0xad0] sm:$0xff] %v1184_v23 }
 0x22b   : > { %1329 = vxpose.xlu1.b32.cont [7/16] %v500_v24, 128  ;;  %v1217_v26 = vpop.trf.xlu1  ;;  %1297 = vxpose.xlu0.b32.cont [7/16] %v499_v25, 128  ;;  %v1185_v27 = vpop.trf.xlu0  ;;  %v502_v24 = vld [vmem:[%s2909_s13 + $0x998] sm:$0xff]  ;;  %v501_v25 = vld [vmem:[%s2909_s13 + $0x990] sm:$0xff] }
 0x22c   : > { %2491 = vst [vmem:[%s2981_s17 + $0xd78] sm:$0xff] %v1217_v26  ;;  %2411 = vst [vmem:[%s2981_s17 + $0xaf8] sm:$0xff] %v1185_v27 }
 0x22f   : > { %1330 = vxpose.xlu1.b32.cont [8/16] %v508_v28, 128  ;;  %v1218_v30 = vpop.trf.xlu1  ;;  %1298 = vxpose.xlu0.b32.cont [8/16] %v507_v29, 128  ;;  %v1186_v31 = vpop.trf.xlu0  ;;  %v510_v28 = vld [vmem:[%s2909_s13 + $0x9d8] sm:$0xff]  ;;  %v509_v29 = vld [vmem:[%s2909_s13 + $0x9d0] sm:$0xff] }
 0x230   : > { %2496 = vst [vmem:[%s2981_s17 + $0xda0] sm:$0xff] %v1218_v30  ;;  %2416 = vst [vmem:[%s2981_s17 + $0xb20] sm:$0xff] %v1186_v31 }
 0x233   : > { %1331 = vxpose.xlu1.b32.cont [9/16] %v516_v32, 128  ;;  %v1219_v34 = vpop.trf.xlu1  ;;  %1299 = vxpose.xlu0.b32.cont [9/16] %v515_v33, 128  ;;  %v1187_v35 = vpop.trf.xlu0  ;;  %v518_v32 = vld [vmem:[%s2909_s13 + $0xa18] sm:$0xff]  ;;  %v517_v33 = vld [vmem:[%s2909_s13 + $0xa10] sm:$0xff] }
 0x234   : > { %2501 = vst [vmem:[%s2981_s17 + $0xdc8] sm:$0xff] %v1219_v34  ;;  %2421 = vst [vmem:[%s2981_s17 + $0xb48] sm:$0xff] %v1187_v35 }
 0x237   : > { %1332 = vxpose.xlu1.b32.cont [10/16] %v524_v36, 128  ;;  %v1220_v38 = vpop.trf.xlu1  ;;  %1300 = vxpose.xlu0.b32.cont [10/16] %v523_v37, 128  ;;  %v1188_v39 = vpop.trf.xlu0  ;;  %v526_v36 = vld [vmem:[%s2909_s13 + $0xa58] sm:$0xff]  ;;  %v525_v37 = vld [vmem:[%s2909_s13 + $0xa50] sm:$0xff] }
 0x238   : > { %2506 = vst [vmem:[%s2981_s17 + $0xdf0] sm:$0xff] %v1220_v38  ;;  %2426 = vst [vmem:[%s2981_s17 + $0xb70] sm:$0xff] %v1188_v39 }
 0x23b   : > { %1333 = vxpose.xlu1.b32.cont [11/16] %v532_v40, 128  ;;  %v1221_v42 = vpop.trf.xlu1  ;;  %1301 = vxpose.xlu0.b32.cont [11/16] %v531_v41, 128  ;;  %v1189_v43 = vpop.trf.xlu0  ;;  %v534_v40 = vld [vmem:[%s2909_s13 + $0xa98] sm:$0xff]  ;;  %v533_v41 = vld [vmem:[%s2909_s13 + $0xa90] sm:$0xff] }
 0x23c   : > { %2511 = vst [vmem:[%s2981_s17 + $0xe18] sm:$0xff] %v1221_v42  ;;  %2431 = vst [vmem:[%s2981_s17 + $0xb98] sm:$0xff] %v1189_v43 }
 0x23f   : > { %1334 = vxpose.xlu1.b32.cont [12/16] %v540_v44, 128  ;;  %v1222_v46 = vpop.trf.xlu1  ;;  %1302 = vxpose.xlu0.b32.cont [12/16] %v539_v45, 128  ;;  %v1190_v47 = vpop.trf.xlu0  ;;  %v542_v44 = vld [vmem:[%s2909_s13 + $0xad8] sm:$0xff]  ;;  %v541_v45 = vld [vmem:[%s2909_s13 + $0xad0] sm:$0xff] }
 0x240   : > { %2516 = vst [vmem:[%s2981_s17 + $0xe40] sm:$0xff] %v1222_v46  ;;  %2436 = vst [vmem:[%s2981_s17 + $0xbc0] sm:$0xff] %v1190_v47 }
 0x243   : > { %1335 = vxpose.xlu1.b32.cont [13/16] %v548_v48, 128  ;;  %v1223_v50 = vpop.trf.xlu1  ;;  %1303 = vxpose.xlu0.b32.cont [13/16] %v547_v49, 128  ;;  %v1191_v51 = vpop.trf.xlu0  ;;  %v550_v48 = vld [vmem:[%s2909_s13 + $0xb18] sm:$0xff]  ;;  %v549_v49 = vld [vmem:[%s2909_s13 + $0xb10] sm:$0xff] }
 0x244   : > { %2521 = vst [vmem:[%s2981_s17 + $0xe68] sm:$0xff] %v1223_v50  ;;  %2441 = vst [vmem:[%s2981_s17 + $0xbe8] sm:$0xff] %v1191_v51 }
 0x247   : > { %1336 = vxpose.xlu1.b32.cont [14/16] %v556_v52, 128  ;;  %v1224_v54 = vpop.trf.xlu1  ;;  %1304 = vxpose.xlu0.b32.cont [14/16] %v555_v53, 128  ;;  %v1192_v55 = vpop.trf.xlu0  ;;  %v558_v52 = vld [vmem:[%s2909_s13 + $0xb58] sm:$0xff]  ;;  %v557_v53 = vld [vmem:[%s2909_s13 + $0xb50] sm:$0xff] }
 0x248   : > { %2526 = vst [vmem:[%s2981_s17 + $0xe90] sm:$0xff] %v1224_v54  ;;  %2446 = vst [vmem:[%s2981_s17 + $0xc10] sm:$0xff] %v1192_v55 }
 0x24b   : > { %1337 = vxpose.xlu1.b32.cont [15/16] %v564_v56, 128  ;;  %v1225_v58 = vpop.trf.xlu1  ;;  %1305 = vxpose.xlu0.b32.cont [15/16] %v563_v57, 128  ;;  %v1193_v59 = vpop.trf.xlu0  ;;  %v566_v56 = vld [vmem:[%s2909_s13 + $0xb98] sm:$0xff]  ;;  %v565_v57 = vld [vmem:[%s2909_s13 + $0xb90] sm:$0xff] }
 0x24c   : > { %2531 = vst [vmem:[%s2981_s17 + $0xeb8] sm:$0xff] %v1225_v58  ;;  %2451 = vst [vmem:[%s2981_s17 + $0xc38] sm:$0xff] %v1193_v59 }
 0x24f   : > { %1338 = vxpose.xlu1.b32.end [16/16] %v572_v60, 128  ;;  %v1226_v62 = vpop.trf.xlu1  ;;  %1306 = vxpose.xlu0.b32.end [16/16] %v571_v61, 128  ;;  %v1194_v63 = vpop.trf.xlu0  ;;  %v574_v60 = vld [vmem:[%s2909_s13 + $0xbd8] sm:$0xff]  ;;  %v573_v61 = vld [vmem:[%s2909_s13 + $0xbd0] sm:$0xff] }
 0x250   : > { %2536 = vst [vmem:[%s2981_s17 + $0xee0] sm:$0xff] %v1226_v62  ;;  %2456 = vst [vmem:[%s2981_s17 + $0xc60] sm:$0xff] %v1194_v63 }
 0x253   : > { %1387 = vxpose.xlu1.b32.start [1/16] %v454_v0, 128  ;;  %v1275_v2 = vpop.trf.xlu1  ;;  %1355 = vxpose.xlu0.b32.start [1/16] %v453_v1, 128  ;;  %v1243_v3 = vpop.trf.xlu0  ;;  %v456_v0 = vld [vmem:[%s2909_s13 + $0x828] sm:$0xff]  ;;  %v455_v1 = vld [vmem:[%s2909_s13 + $0x820] sm:$0xff] }
 0x254   : > { %2621 = vst [vmem:[%s2981_s17 + $0x1188] sm:$0xff] %v1275_v2  ;;  %2541 = vst [vmem:[%s2981_s17 + $0xf08] sm:$0xff] %v1243_v3 }
 0x257   : > { %1388 = vxpose.xlu1.b32.cont [2/16] %v462_v4, 128  ;;  %v1276_v6 = vpop.trf.xlu1  ;;  %1356 = vxpose.xlu0.b32.cont [2/16] %v461_v5, 128  ;;  %v1244_v7 = vpop.trf.xlu0  ;;  %v464_v4 = vld [vmem:[%s2909_s13 + $0x868] sm:$0xff]  ;;  %v463_v5 = vld [vmem:[%s2909_s13 + $0x860] sm:$0xff] }
 0x258   : > { %2626 = vst [vmem:[%s2981_s17 + $0x11b0] sm:$0xff] %v1276_v6  ;;  %2546 = vst [vmem:[%s2981_s17 + $0xf30] sm:$0xff] %v1244_v7 }
 0x25b   : > { %1389 = vxpose.xlu1.b32.cont [3/16] %v470_v8, 128  ;;  %v1277_v10 = vpop.trf.xlu1  ;;  %1357 = vxpose.xlu0.b32.cont [3/16] %v469_v9, 128  ;;  %v1245_v11 = vpop.trf.xlu0  ;;  %v472_v8 = vld [vmem:[%s2909_s13 + $0x8a8] sm:$0xff]  ;;  %v471_v9 = vld [vmem:[%s2909_s13 + $0x8a0] sm:$0xff] }
 0x25c   : > { %2631 = vst [vmem:[%s2981_s17 + $0x11d8] sm:$0xff] %v1277_v10  ;;  %2551 = vst [vmem:[%s2981_s17 + $0xf58] sm:$0xff] %v1245_v11 }
 0x25f   : > { %1390 = vxpose.xlu1.b32.cont [4/16] %v478_v12, 128  ;;  %v1278_v14 = vpop.trf.xlu1  ;;  %1358 = vxpose.xlu0.b32.cont [4/16] %v477_v13, 128  ;;  %v1246_v15 = vpop.trf.xlu0  ;;  %v480_v12 = vld [vmem:[%s2909_s13 + $0x8e8] sm:$0xff]  ;;  %v479_v13 = vld [vmem:[%s2909_s13 + $0x8e0] sm:$0xff] }
 0x260   : > { %2636 = vst [vmem:[%s2981_s17 + $0x1200] sm:$0xff] %v1278_v14  ;;  %2556 = vst [vmem:[%s2981_s17 + $0xf80] sm:$0xff] %v1246_v15 }
 0x263   : > { %1391 = vxpose.xlu1.b32.cont [5/16] %v486_v16, 128  ;;  %v1279_v18 = vpop.trf.xlu1  ;;  %1359 = vxpose.xlu0.b32.cont [5/16] %v485_v17, 128  ;;  %v1247_v19 = vpop.trf.xlu0  ;;  %v488_v16 = vld [vmem:[%s2909_s13 + $0x928] sm:$0xff]  ;;  %v487_v17 = vld [vmem:[%s2909_s13 + $0x920] sm:$0xff] }
 0x264   : > { %2641 = vst [vmem:[%s2981_s17 + $0x1228] sm:$0xff] %v1279_v18  ;;  %2561 = vst [vmem:[%s2981_s17 + $0xfa8] sm:$0xff] %v1247_v19 }
 0x267   : > { %1392 = vxpose.xlu1.b32.cont [6/16] %v494_v20, 128  ;;  %v1280_v22 = vpop.trf.xlu1  ;;  %1360 = vxpose.xlu0.b32.cont [6/16] %v493_v21, 128  ;;  %v1248_v23 = vpop.trf.xlu0  ;;  %v496_v20 = vld [vmem:[%s2909_s13 + $0x968] sm:$0xff]  ;;  %v495_v21 = vld [vmem:[%s2909_s13 + $0x960] sm:$0xff] }
 0x268   : > { %2646 = vst [vmem:[%s2981_s17 + $0x1250] sm:$0xff] %v1280_v22  ;;  %2566 = vst [vmem:[%s2981_s17 + $0xfd0] sm:$0xff] %v1248_v23 }
 0x26b   : > { %1393 = vxpose.xlu1.b32.cont [7/16] %v502_v24, 128  ;;  %v1281_v26 = vpop.trf.xlu1  ;;  %1361 = vxpose.xlu0.b32.cont [7/16] %v501_v25, 128  ;;  %v1249_v27 = vpop.trf.xlu0  ;;  %v504_v24 = vld [vmem:[%s2909_s13 + $0x9a8] sm:$0xff]  ;;  %v503_v25 = vld [vmem:[%s2909_s13 + $0x9a0] sm:$0xff] }
 0x26c   : > { %2651 = vst [vmem:[%s2981_s17 + $0x1278] sm:$0xff] %v1281_v26  ;;  %2571 = vst [vmem:[%s2981_s17 + $0xff8] sm:$0xff] %v1249_v27 }
 0x26f   : > { %1394 = vxpose.xlu1.b32.cont [8/16] %v510_v28, 128  ;;  %v1282_v30 = vpop.trf.xlu1  ;;  %1362 = vxpose.xlu0.b32.cont [8/16] %v509_v29, 128  ;;  %v1250_v31 = vpop.trf.xlu0  ;;  %v512_v28 = vld [vmem:[%s2909_s13 + $0x9e8] sm:$0xff]  ;;  %v511_v29 = vld [vmem:[%s2909_s13 + $0x9e0] sm:$0xff] }
 0x270   : > { %2656 = vst [vmem:[%s2981_s17 + $0x12a0] sm:$0xff] %v1282_v30  ;;  %2576 = vst [vmem:[%s2981_s17 + $0x1020] sm:$0xff] %v1250_v31 }
 0x273   : > { %1395 = vxpose.xlu1.b32.cont [9/16] %v518_v32, 128  ;;  %v1283_v34 = vpop.trf.xlu1  ;;  %1363 = vxpose.xlu0.b32.cont [9/16] %v517_v33, 128  ;;  %v1251_v35 = vpop.trf.xlu0  ;;  %v520_v32 = vld [vmem:[%s2909_s13 + $0xa28] sm:$0xff]  ;;  %v519_v33 = vld [vmem:[%s2909_s13 + $0xa20] sm:$0xff] }
 0x274   : > { %2661 = vst [vmem:[%s2981_s17 + $0x12c8] sm:$0xff] %v1283_v34  ;;  %2581 = vst [vmem:[%s2981_s17 + $0x1048] sm:$0xff] %v1251_v35 }
 0x277   : > { %1396 = vxpose.xlu1.b32.cont [10/16] %v526_v36, 128  ;;  %v1284_v38 = vpop.trf.xlu1  ;;  %1364 = vxpose.xlu0.b32.cont [10/16] %v525_v37, 128  ;;  %v1252_v39 = vpop.trf.xlu0  ;;  %v528_v36 = vld [vmem:[%s2909_s13 + $0xa68] sm:$0xff]  ;;  %v527_v37 = vld [vmem:[%s2909_s13 + $0xa60] sm:$0xff] }
 0x278   : > { %2666 = vst [vmem:[%s2981_s17 + $0x12f0] sm:$0xff] %v1284_v38  ;;  %2586 = vst [vmem:[%s2981_s17 + $0x1070] sm:$0xff] %v1252_v39 }
 0x27b   : > { %1397 = vxpose.xlu1.b32.cont [11/16] %v534_v40, 128  ;;  %v1285_v42 = vpop.trf.xlu1  ;;  %1365 = vxpose.xlu0.b32.cont [11/16] %v533_v41, 128  ;;  %v1253_v43 = vpop.trf.xlu0  ;;  %v536_v40 = vld [vmem:[%s2909_s13 + $0xaa8] sm:$0xff]  ;;  %v535_v41 = vld [vmem:[%s2909_s13 + $0xaa0] sm:$0xff] }
 0x27c   : > { %2671 = vst [vmem:[%s2981_s17 + $0x1318] sm:$0xff] %v1285_v42  ;;  %2591 = vst [vmem:[%s2981_s17 + $0x1098] sm:$0xff] %v1253_v43 }
 0x27f   : > { %1398 = vxpose.xlu1.b32.cont [12/16] %v542_v44, 128  ;;  %v1286_v46 = vpop.trf.xlu1  ;;  %1366 = vxpose.xlu0.b32.cont [12/16] %v541_v45, 128  ;;  %v1254_v47 = vpop.trf.xlu0  ;;  %v544_v44 = vld [vmem:[%s2909_s13 + $0xae8] sm:$0xff]  ;;  %v543_v45 = vld [vmem:[%s2909_s13 + $0xae0] sm:$0xff] }
 0x280   : > { %2676 = vst [vmem:[%s2981_s17 + $0x1340] sm:$0xff] %v1286_v46  ;;  %2596 = vst [vmem:[%s2981_s17 + $0x10c0] sm:$0xff] %v1254_v47 }
 0x283   : > { %1399 = vxpose.xlu1.b32.cont [13/16] %v550_v48, 128  ;;  %v1287_v50 = vpop.trf.xlu1  ;;  %1367 = vxpose.xlu0.b32.cont [13/16] %v549_v49, 128  ;;  %v1255_v51 = vpop.trf.xlu0  ;;  %v552_v48 = vld [vmem:[%s2909_s13 + $0xb28] sm:$0xff]  ;;  %v551_v49 = vld [vmem:[%s2909_s13 + $0xb20] sm:$0xff] }
 0x284   : > { %2681 = vst [vmem:[%s2981_s17 + $0x1368] sm:$0xff] %v1287_v50  ;;  %2601 = vst [vmem:[%s2981_s17 + $0x10e8] sm:$0xff] %v1255_v51 }
 0x287   : > { %1400 = vxpose.xlu1.b32.cont [14/16] %v558_v52, 128  ;;  %v1288_v54 = vpop.trf.xlu1  ;;  %1368 = vxpose.xlu0.b32.cont [14/16] %v557_v53, 128  ;;  %v1256_v55 = vpop.trf.xlu0  ;;  %v560_v52 = vld [vmem:[%s2909_s13 + $0xb68] sm:$0xff]  ;;  %v559_v53 = vld [vmem:[%s2909_s13 + $0xb60] sm:$0xff] }
 0x288   : > { %2686 = vst [vmem:[%s2981_s17 + $0x1390] sm:$0xff] %v1288_v54  ;;  %2606 = vst [vmem:[%s2981_s17 + $0x1110] sm:$0xff] %v1256_v55 }
 0x28b   : > { %1401 = vxpose.xlu1.b32.cont [15/16] %v566_v56, 128  ;;  %v1289_v58 = vpop.trf.xlu1  ;;  %1369 = vxpose.xlu0.b32.cont [15/16] %v565_v57, 128  ;;  %v1257_v59 = vpop.trf.xlu0  ;;  %v568_v56 = vld [vmem:[%s2909_s13 + $0xba8] sm:$0xff]  ;;  %v567_v57 = vld [vmem:[%s2909_s13 + $0xba0] sm:$0xff] }
 0x28c   : > { %2691 = vst [vmem:[%s2981_s17 + $0x13b8] sm:$0xff] %v1289_v58  ;;  %2611 = vst [vmem:[%s2981_s17 + $0x1138] sm:$0xff] %v1257_v59 }
 0x28f   : > { %1402 = vxpose.xlu1.b32.end [16/16] %v574_v60, 128  ;;  %v1290_v62 = vpop.trf.xlu1  ;;  %1370 = vxpose.xlu0.b32.end [16/16] %v573_v61, 128  ;;  %v1258_v63 = vpop.trf.xlu0  ;;  %v576_v60 = vld [vmem:[%s2909_s13 + $0xbe8] sm:$0xff]  ;;  %v575_v61 = vld [vmem:[%s2909_s13 + $0xbe0] sm:$0xff] }
 0x290   : > { %2696 = vst [vmem:[%s2981_s17 + $0x13e0] sm:$0xff] %v1290_v62  ;;  %2616 = vst [vmem:[%s2981_s17 + $0x1160] sm:$0xff] %v1258_v63 }
 0x293   : > { %1451 = vxpose.xlu1.b32.start [1/16] %v456_v0, 128  ;;  %v1339_v2 = vpop.trf.xlu1  ;;  %1419 = vxpose.xlu0.b32.start [1/16] %v455_v1, 128  ;;  %v1307_v3 = vpop.trf.xlu0  ;;  %v458_v0 = vld [vmem:[%s2909_s13 + $0x838] sm:$0xff]  ;;  %v457_v1 = vld [vmem:[%s2909_s13 + $0x830] sm:$0xff] }
 0x294   : > { %2142 = vst [vmem:[%s2981_s17 + $0x290] sm:$0xff] %v1339_v2  ;;  %2061 = vst [vmem:[%s2981_s17 + $0x10] sm:$0xff] %v1307_v3 }
 0x297   : > { %1452 = vxpose.xlu1.b32.cont [2/16] %v464_v4, 128  ;;  %v1340_v6 = vpop.trf.xlu1  ;;  %1420 = vxpose.xlu0.b32.cont [2/16] %v463_v5, 128  ;;  %v1308_v7 = vpop.trf.xlu0  ;;  %v466_v4 = vld [vmem:[%s2909_s13 + $0x878] sm:$0xff]  ;;  %v465_v5 = vld [vmem:[%s2909_s13 + $0x870] sm:$0xff] }
 0x298   : > { %2147 = vst [vmem:[%s2981_s17 + $0x2b8] sm:$0xff] %v1340_v6  ;;  %2067 = vst [vmem:[%s2981_s17 + $0x38] sm:$0xff] %v1308_v7 }
 0x29b   : > { %1453 = vxpose.xlu1.b32.cont [3/16] %v472_v8, 128  ;;  %v1341_v10 = vpop.trf.xlu1  ;;  %1421 = vxpose.xlu0.b32.cont [3/16] %v471_v9, 128  ;;  %v1309_v11 = vpop.trf.xlu0  ;;  %v474_v8 = vld [vmem:[%s2909_s13 + $0x8b8] sm:$0xff]  ;;  %v473_v9 = vld [vmem:[%s2909_s13 + $0x8b0] sm:$0xff] }
 0x29c   : > { %2152 = vst [vmem:[%s2981_s17 + $0x2e0] sm:$0xff] %v1341_v10  ;;  %2072 = vst [vmem:[%s2981_s17 + $0x60] sm:$0xff] %v1309_v11 }
 0x29f   : > { %1454 = vxpose.xlu1.b32.cont [4/16] %v480_v12, 128  ;;  %v1342_v14 = vpop.trf.xlu1  ;;  %1422 = vxpose.xlu0.b32.cont [4/16] %v479_v13, 128  ;;  %v1310_v15 = vpop.trf.xlu0  ;;  %v482_v12 = vld [vmem:[%s2909_s13 + $0x8f8] sm:$0xff]  ;;  %v481_v13 = vld [vmem:[%s2909_s13 + $0x8f0] sm:$0xff] }
 0x2a0   : > { %2157 = vst [vmem:[%s2981_s17 + $0x308] sm:$0xff] %v1342_v14  ;;  %2077 = vst [vmem:[%s2981_s17 + $0x88] sm:$0xff] %v1310_v15 }
 0x2a3   : > { %1455 = vxpose.xlu1.b32.cont [5/16] %v488_v16, 128  ;;  %v1343_v18 = vpop.trf.xlu1  ;;  %1423 = vxpose.xlu0.b32.cont [5/16] %v487_v17, 128  ;;  %v1311_v19 = vpop.trf.xlu0  ;;  %v490_v16 = vld [vmem:[%s2909_s13 + $0x938] sm:$0xff]  ;;  %v489_v17 = vld [vmem:[%s2909_s13 + $0x930] sm:$0xff] }
 0x2a4   : > { %2162 = vst [vmem:[%s2981_s17 + $0x330] sm:$0xff] %v1343_v18  ;;  %2082 = vst [vmem:[%s2981_s17 + $0xb0] sm:$0xff] %v1311_v19 }
 0x2a7   : > { %1456 = vxpose.xlu1.b32.cont [6/16] %v496_v20, 128  ;;  %v1344_v22 = vpop.trf.xlu1  ;;  %1424 = vxpose.xlu0.b32.cont [6/16] %v495_v21, 128  ;;  %v1312_v23 = vpop.trf.xlu0  ;;  %v498_v20 = vld [vmem:[%s2909_s13 + $0x978] sm:$0xff]  ;;  %v497_v21 = vld [vmem:[%s2909_s13 + $0x970] sm:$0xff] }
 0x2a8   : > { %2167 = vst [vmem:[%s2981_s17 + $0x358] sm:$0xff] %v1344_v22  ;;  %2087 = vst [vmem:[%s2981_s17 + $0xd8] sm:$0xff] %v1312_v23 }
 0x2ab   : > { %1457 = vxpose.xlu1.b32.cont [7/16] %v504_v24, 128  ;;  %v1345_v26 = vpop.trf.xlu1  ;;  %1425 = vxpose.xlu0.b32.cont [7/16] %v503_v25, 128  ;;  %v1313_v27 = vpop.trf.xlu0  ;;  %v506_v24 = vld [vmem:[%s2909_s13 + $0x9b8] sm:$0xff]  ;;  %v505_v25 = vld [vmem:[%s2909_s13 + $0x9b0] sm:$0xff] }
 0x2ac   : > { %2172 = vst [vmem:[%s2981_s17 + $0x380] sm:$0xff] %v1345_v26  ;;  %2092 = vst [vmem:[%s2981_s17 + $0x100] sm:$0xff] %v1313_v27 }
 0x2af   : > { %1458 = vxpose.xlu1.b32.cont [8/16] %v512_v28, 128  ;;  %v1346_v30 = vpop.trf.xlu1  ;;  %1426 = vxpose.xlu0.b32.cont [8/16] %v511_v29, 128  ;;  %v1314_v31 = vpop.trf.xlu0  ;;  %v514_v28 = vld [vmem:[%s2909_s13 + $0x9f8] sm:$0xff]  ;;  %v513_v29 = vld [vmem:[%s2909_s13 + $0x9f0] sm:$0xff] }
 0x2b0   : > { %2177 = vst [vmem:[%s2981_s17 + $0x3a8] sm:$0xff] %v1346_v30  ;;  %2097 = vst [vmem:[%s2981_s17 + $0x128] sm:$0xff] %v1314_v31 }
 0x2b3   : > { %1459 = vxpose.xlu1.b32.cont [9/16] %v520_v32, 128  ;;  %v1347_v34 = vpop.trf.xlu1  ;;  %1427 = vxpose.xlu0.b32.cont [9/16] %v519_v33, 128  ;;  %v1315_v35 = vpop.trf.xlu0  ;;  %v522_v32 = vld [vmem:[%s2909_s13 + $0xa38] sm:$0xff]  ;;  %v521_v33 = vld [vmem:[%s2909_s13 + $0xa30] sm:$0xff] }
 0x2b4   : > { %2182 = vst [vmem:[%s2981_s17 + $0x3d0] sm:$0xff] %v1347_v34  ;;  %2102 = vst [vmem:[%s2981_s17 + $0x150] sm:$0xff] %v1315_v35 }
 0x2b7   : > { %1460 = vxpose.xlu1.b32.cont [10/16] %v528_v36, 128  ;;  %v1348_v38 = vpop.trf.xlu1  ;;  %1428 = vxpose.xlu0.b32.cont [10/16] %v527_v37, 128  ;;  %v1316_v39 = vpop.trf.xlu0  ;;  %v530_v36 = vld [vmem:[%s2909_s13 + $0xa78] sm:$0xff]  ;;  %v529_v37 = vld [vmem:[%s2909_s13 + $0xa70] sm:$0xff] }
 0x2b8   : > { %2187 = vst [vmem:[%s2981_s17 + $0x3f8] sm:$0xff] %v1348_v38  ;;  %2107 = vst [vmem:[%s2981_s17 + $0x178] sm:$0xff] %v1316_v39 }
 0x2bb   : > { %1461 = vxpose.xlu1.b32.cont [11/16] %v536_v40, 128  ;;  %v1349_v42 = vpop.trf.xlu1  ;;  %1429 = vxpose.xlu0.b32.cont [11/16] %v535_v41, 128  ;;  %v1317_v43 = vpop.trf.xlu0  ;;  %v538_v40 = vld [vmem:[%s2909_s13 + $0xab8] sm:$0xff]  ;;  %v537_v41 = vld [vmem:[%s2909_s13 + $0xab0] sm:$0xff] }
 0x2bc   : > { %2192 = vst [vmem:[%s2981_s17 + $0x420] sm:$0xff] %v1349_v42  ;;  %2112 = vst [vmem:[%s2981_s17 + $0x1a0] sm:$0xff] %v1317_v43 }
 0x2bf   : > { %1462 = vxpose.xlu1.b32.cont [12/16] %v544_v44, 128  ;;  %v1350_v46 = vpop.trf.xlu1  ;;  %1430 = vxpose.xlu0.b32.cont [12/16] %v543_v45, 128  ;;  %v1318_v47 = vpop.trf.xlu0  ;;  %v546_v44 = vld [vmem:[%s2909_s13 + $0xaf8] sm:$0xff]  ;;  %v545_v45 = vld [vmem:[%s2909_s13 + $0xaf0] sm:$0xff] }
 0x2c0   : > { %2197 = vst [vmem:[%s2981_s17 + $0x448] sm:$0xff] %v1350_v46  ;;  %2117 = vst [vmem:[%s2981_s17 + $0x1c8] sm:$0xff] %v1318_v47 }
 0x2c3   : > { %1463 = vxpose.xlu1.b32.cont [13/16] %v552_v48, 128  ;;  %v1351_v50 = vpop.trf.xlu1  ;;  %1431 = vxpose.xlu0.b32.cont [13/16] %v551_v49, 128  ;;  %v1319_v51 = vpop.trf.xlu0  ;;  %v554_v48 = vld [vmem:[%s2909_s13 + $0xb38] sm:$0xff]  ;;  %v553_v49 = vld [vmem:[%s2909_s13 + $0xb30] sm:$0xff] }
 0x2c4   : > { %2202 = vst [vmem:[%s2981_s17 + $0x470] sm:$0xff] %v1351_v50  ;;  %2122 = vst [vmem:[%s2981_s17 + $0x1f0] sm:$0xff] %v1319_v51 }
 0x2c7   : > { %1464 = vxpose.xlu1.b32.cont [14/16] %v560_v52, 128  ;;  %v1352_v54 = vpop.trf.xlu1  ;;  %1432 = vxpose.xlu0.b32.cont [14/16] %v559_v53, 128  ;;  %v1320_v55 = vpop.trf.xlu0  ;;  %v562_v52 = vld [vmem:[%s2909_s13 + $0xb78] sm:$0xff]  ;;  %v561_v53 = vld [vmem:[%s2909_s13 + $0xb70] sm:$0xff] }
 0x2c8   : > { %2207 = vst [vmem:[%s2981_s17 + $0x498] sm:$0xff] %v1352_v54  ;;  %2127 = vst [vmem:[%s2981_s17 + $0x218] sm:$0xff] %v1320_v55 }
 0x2cb   : > { %1465 = vxpose.xlu1.b32.cont [15/16] %v568_v56, 128  ;;  %v1353_v58 = vpop.trf.xlu1  ;;  %1433 = vxpose.xlu0.b32.cont [15/16] %v567_v57, 128  ;;  %v1321_v59 = vpop.trf.xlu0  ;;  %v570_v56 = vld [vmem:[%s2909_s13 + $0xbb8] sm:$0xff]  ;;  %v569_v57 = vld [vmem:[%s2909_s13 + $0xbb0] sm:$0xff] }
 0x2cc   : > { %2212 = vst [vmem:[%s2981_s17 + $0x4c0] sm:$0xff] %v1353_v58  ;;  %2132 = vst [vmem:[%s2981_s17 + $0x240] sm:$0xff] %v1321_v59 }
 0x2cf   : > { %1466 = vxpose.xlu1.b32.end [16/16] %v576_v60, 128  ;;  %v1354_v62 = vpop.trf.xlu1  ;;  %1434 = vxpose.xlu0.b32.end [16/16] %v575_v61, 128  ;;  %v1322_v63 = vpop.trf.xlu0  ;;  %v578_v60 = vld [vmem:[%s2909_s13 + $0xbf8] sm:$0xff]  ;;  %v577_v61 = vld [vmem:[%s2909_s13 + $0xbf0] sm:$0xff] }
 0x2d0   : > { %2217 = vst [vmem:[%s2981_s17 + $0x4e8] sm:$0xff] %v1354_v62  ;;  %2137 = vst [vmem:[%s2981_s17 + $0x268] sm:$0xff] %v1322_v63 }
 0x2d3   : > { %1515 = vxpose.xlu1.b32.start [1/16] %v458_v0, 128  ;;  %v1403_v2 = vpop.trf.xlu1  ;;  %1483 = vxpose.xlu0.b32.start [1/16] %v457_v1, 128  ;;  %v1371_v3 = vpop.trf.xlu0  ;;  %v580_v0 = vld [vmem:[%s2909_s13 + $0xc08] sm:$0xff]  ;;  %v579_v1 = vld [vmem:[%s2909_s13 + $0xc00] sm:$0xff] }
 0x2d4   : > { %2302 = vst [vmem:[%s2981_s17 + $0x790] sm:$0xff] %v1403_v2  ;;  %2222 = vst [vmem:[%s2981_s17 + $0x510] sm:$0xff] %v1371_v3 }
 0x2d7   : > { %1516 = vxpose.xlu1.b32.cont [2/16] %v466_v4, 128  ;;  %v1404_v6 = vpop.trf.xlu1  ;;  %1484 = vxpose.xlu0.b32.cont [2/16] %v465_v5, 128  ;;  %v1372_v7 = vpop.trf.xlu0  ;;  %v588_v4 = vld [vmem:[%s2909_s13 + $0xc48] sm:$0xff]  ;;  %v587_v5 = vld [vmem:[%s2909_s13 + $0xc40] sm:$0xff] }
 0x2d8   : > { %2307 = vst [vmem:[%s2981_s17 + $0x7b8] sm:$0xff] %v1404_v6  ;;  %2227 = vst [vmem:[%s2981_s17 + $0x538] sm:$0xff] %v1372_v7 }
 0x2db   : > { %1517 = vxpose.xlu1.b32.cont [3/16] %v474_v8, 128  ;;  %v1405_v10 = vpop.trf.xlu1  ;;  %1485 = vxpose.xlu0.b32.cont [3/16] %v473_v9, 128  ;;  %v1373_v11 = vpop.trf.xlu0  ;;  %v596_v8 = vld [vmem:[%s2909_s13 + $0xc88] sm:$0xff]  ;;  %v595_v9 = vld [vmem:[%s2909_s13 + $0xc80] sm:$0xff] }
 0x2dc   : > { %2312 = vst [vmem:[%s2981_s17 + $0x7e0] sm:$0xff] %v1405_v10  ;;  %2232 = vst [vmem:[%s2981_s17 + $0x560] sm:$0xff] %v1373_v11 }
 0x2df   : > { %1518 = vxpose.xlu1.b32.cont [4/16] %v482_v12, 128  ;;  %v1406_v14 = vpop.trf.xlu1  ;;  %1486 = vxpose.xlu0.b32.cont [4/16] %v481_v13, 128  ;;  %v1374_v15 = vpop.trf.xlu0  ;;  %v604_v12 = vld [vmem:[%s2909_s13 + $0xcc8] sm:$0xff]  ;;  %v603_v13 = vld [vmem:[%s2909_s13 + $0xcc0] sm:$0xff] }
 0x2e0   : > { %2317 = vst [vmem:[%s2981_s17 + $0x808] sm:$0xff] %v1406_v14  ;;  %2237 = vst [vmem:[%s2981_s17 + $0x588] sm:$0xff] %v1374_v15 }
 0x2e3   : > { %1519 = vxpose.xlu1.b32.cont [5/16] %v490_v16, 128  ;;  %v1407_v18 = vpop.trf.xlu1  ;;  %1487 = vxpose.xlu0.b32.cont [5/16] %v489_v17, 128  ;;  %v1375_v19 = vpop.trf.xlu0  ;;  %v612_v16 = vld [vmem:[%s2909_s13 + $0xd08] sm:$0xff]  ;;  %v611_v17 = vld [vmem:[%s2909_s13 + $0xd00] sm:$0xff] }
 0x2e4   : > { %2322 = vst [vmem:[%s2981_s17 + $0x830] sm:$0xff] %v1407_v18  ;;  %2242 = vst [vmem:[%s2981_s17 + $0x5b0] sm:$0xff] %v1375_v19 }
 0x2e7   : > { %1520 = vxpose.xlu1.b32.cont [6/16] %v498_v20, 128  ;;  %v1408_v22 = vpop.trf.xlu1  ;;  %1488 = vxpose.xlu0.b32.cont [6/16] %v497_v21, 128  ;;  %v1376_v23 = vpop.trf.xlu0  ;;  %v620_v20 = vld [vmem:[%s2909_s13 + $0xd48] sm:$0xff]  ;;  %v619_v21 = vld [vmem:[%s2909_s13 + $0xd40] sm:$0xff] }
 0x2e8   : > { %2327 = vst [vmem:[%s2981_s17 + $0x858] sm:$0xff] %v1408_v22  ;;  %2247 = vst [vmem:[%s2981_s17 + $0x5d8] sm:$0xff] %v1376_v23 }
 0x2eb   : > { %1521 = vxpose.xlu1.b32.cont [7/16] %v506_v24, 128  ;;  %v1409_v26 = vpop.trf.xlu1  ;;  %1489 = vxpose.xlu0.b32.cont [7/16] %v505_v25, 128  ;;  %v1377_v27 = vpop.trf.xlu0  ;;  %v628_v24 = vld [vmem:[%s2909_s13 + $0xd88] sm:$0xff]  ;;  %v627_v25 = vld [vmem:[%s2909_s13 + $0xd80] sm:$0xff] }
 0x2ec   : > { %2332 = vst [vmem:[%s2981_s17 + $0x880] sm:$0xff] %v1409_v26  ;;  %2252 = vst [vmem:[%s2981_s17 + $0x600] sm:$0xff] %v1377_v27 }
 0x2ef   : > { %1522 = vxpose.xlu1.b32.cont [8/16] %v514_v28, 128  ;;  %v1410_v30 = vpop.trf.xlu1  ;;  %1490 = vxpose.xlu0.b32.cont [8/16] %v513_v29, 128  ;;  %v1378_v31 = vpop.trf.xlu0  ;;  %v636_v28 = vld [vmem:[%s2909_s13 + $0xdc8] sm:$0xff]  ;;  %v635_v29 = vld [vmem:[%s2909_s13 + $0xdc0] sm:$0xff] }
 0x2f0   : > { %2337 = vst [vmem:[%s2981_s17 + $0x8a8] sm:$0xff] %v1410_v30  ;;  %2257 = vst [vmem:[%s2981_s17 + $0x628] sm:$0xff] %v1378_v31 }
 0x2f3   : > { %1523 = vxpose.xlu1.b32.cont [9/16] %v522_v32, 128  ;;  %v1411_v34 = vpop.trf.xlu1  ;;  %1491 = vxpose.xlu0.b32.cont [9/16] %v521_v33, 128  ;;  %v1379_v35 = vpop.trf.xlu0  ;;  %v644_v32 = vld [vmem:[%s2909_s13 + $0xe08] sm:$0xff]  ;;  %v643_v33 = vld [vmem:[%s2909_s13 + $0xe00] sm:$0xff] }
 0x2f4   : > { %2342 = vst [vmem:[%s2981_s17 + $0x8d0] sm:$0xff] %v1411_v34  ;;  %2262 = vst [vmem:[%s2981_s17 + $0x650] sm:$0xff] %v1379_v35 }
 0x2f7   : > { %1524 = vxpose.xlu1.b32.cont [10/16] %v530_v36, 128  ;;  %v1412_v38 = vpop.trf.xlu1  ;;  %1492 = vxpose.xlu0.b32.cont [10/16] %v529_v37, 128  ;;  %v1380_v39 = vpop.trf.xlu0  ;;  %v652_v36 = vld [vmem:[%s2909_s13 + $0xe48] sm:$0xff]  ;;  %v651_v37 = vld [vmem:[%s2909_s13 + $0xe40] sm:$0xff] }
 0x2f8   : > { %2347 = vst [vmem:[%s2981_s17 + $0x8f8] sm:$0xff] %v1412_v38  ;;  %2267 = vst [vmem:[%s2981_s17 + $0x678] sm:$0xff] %v1380_v39 }
 0x2fb   : > { %1525 = vxpose.xlu1.b32.cont [11/16] %v538_v40, 128  ;;  %v1413_v42 = vpop.trf.xlu1  ;;  %1493 = vxpose.xlu0.b32.cont [11/16] %v537_v41, 128  ;;  %v1381_v43 = vpop.trf.xlu0  ;;  %v660_v40 = vld [vmem:[%s2909_s13 + $0xe88] sm:$0xff]  ;;  %v659_v41 = vld [vmem:[%s2909_s13 + $0xe80] sm:$0xff] }
 0x2fc   : > { %2352 = vst [vmem:[%s2981_s17 + $0x920] sm:$0xff] %v1413_v42  ;;  %2272 = vst [vmem:[%s2981_s17 + $0x6a0] sm:$0xff] %v1381_v43 }
 0x2ff   : > { %1526 = vxpose.xlu1.b32.cont [12/16] %v546_v44, 128  ;;  %v1414_v46 = vpop.trf.xlu1  ;;  %1494 = vxpose.xlu0.b32.cont [12/16] %v545_v45, 128  ;;  %v1382_v47 = vpop.trf.xlu0  ;;  %v668_v44 = vld [vmem:[%s2909_s13 + $0xec8] sm:$0xff]  ;;  %v667_v45 = vld [vmem:[%s2909_s13 + $0xec0] sm:$0xff] }
 0x300   : > { %2357 = vst [vmem:[%s2981_s17 + $0x948] sm:$0xff] %v1414_v46  ;;  %2277 = vst [vmem:[%s2981_s17 + $0x6c8] sm:$0xff] %v1382_v47 }
 0x303   : > { %1527 = vxpose.xlu1.b32.cont [13/16] %v554_v48, 128  ;;  %v1415_v50 = vpop.trf.xlu1  ;;  %1495 = vxpose.xlu0.b32.cont [13/16] %v553_v49, 128  ;;  %v1383_v51 = vpop.trf.xlu0  ;;  %v676_v48 = vld [vmem:[%s2909_s13 + $0xf08] sm:$0xff]  ;;  %v675_v49 = vld [vmem:[%s2909_s13 + $0xf00] sm:$0xff] }
 0x304   : > { %2362 = vst [vmem:[%s2981_s17 + $0x970] sm:$0xff] %v1415_v50  ;;  %2282 = vst [vmem:[%s2981_s17 + $0x6f0] sm:$0xff] %v1383_v51 }
 0x307   : > { %1528 = vxpose.xlu1.b32.cont [14/16] %v562_v52, 128  ;;  %v1416_v54 = vpop.trf.xlu1  ;;  %1496 = vxpose.xlu0.b32.cont [14/16] %v561_v53, 128  ;;  %v1384_v55 = vpop.trf.xlu0  ;;  %v684_v52 = vld [vmem:[%s2909_s13 + $0xf48] sm:$0xff]  ;;  %v683_v53 = vld [vmem:[%s2909_s13 + $0xf40] sm:$0xff] }
 0x308   : > { %2367 = vst [vmem:[%s2981_s17 + $0x998] sm:$0xff] %v1416_v54  ;;  %2287 = vst [vmem:[%s2981_s17 + $0x718] sm:$0xff] %v1384_v55 }
 0x30b   : > { %1529 = vxpose.xlu1.b32.cont [15/16] %v570_v56, 128  ;;  %v1417_v58 = vpop.trf.xlu1  ;;  %1497 = vxpose.xlu0.b32.cont [15/16] %v569_v57, 128  ;;  %v1385_v59 = vpop.trf.xlu0  ;;  %v692_v56 = vld [vmem:[%s2909_s13 + $0xf88] sm:$0xff]  ;;  %v691_v57 = vld [vmem:[%s2909_s13 + $0xf80] sm:$0xff] }
 0x30c   : > { %2372 = vst [vmem:[%s2981_s17 + $0x9c0] sm:$0xff] %v1417_v58  ;;  %2292 = vst [vmem:[%s2981_s17 + $0x740] sm:$0xff] %v1385_v59 }
 0x30f   : > { %1530 = vxpose.xlu1.b32.end [16/16] %v578_v60, 128  ;;  %v1418_v62 = vpop.trf.xlu1  ;;  %1498 = vxpose.xlu0.b32.end [16/16] %v577_v61, 128  ;;  %v1386_v63 = vpop.trf.xlu0  ;;  %v700_v60 = vld [vmem:[%s2909_s13 + $0xfc8] sm:$0xff]  ;;  %v699_v61 = vld [vmem:[%s2909_s13 + $0xfc0] sm:$0xff] }
 0x310   : > { %2377 = vst [vmem:[%s2981_s17 + $0x9e8] sm:$0xff] %v1418_v62  ;;  %2297 = vst [vmem:[%s2981_s17 + $0x768] sm:$0xff] %v1386_v63 }
 0x313   : > { %1579 = vxpose.xlu1.b32.start [1/16] %v580_v0, 128  ;;  %v1467_v2 = vpop.trf.xlu1  ;;  %1547 = vxpose.xlu0.b32.start [1/16] %v579_v1, 128  ;;  %v1435_v3 = vpop.trf.xlu0  ;;  %v582_v0 = vld [vmem:[%s2909_s13 + $0xc18] sm:$0xff]  ;;  %v581_v1 = vld [vmem:[%s2909_s13 + $0xc10] sm:$0xff] }
 0x314   : > { %2462 = vst [vmem:[%s2981_s17 + $0xc90] sm:$0xff] %v1467_v2  ;;  %2382 = vst [vmem:[%s2981_s17 + $0xa10] sm:$0xff] %v1435_v3 }
 0x317   : > { %1580 = vxpose.xlu1.b32.cont [2/16] %v588_v4, 128  ;;  %v1468_v6 = vpop.trf.xlu1  ;;  %1548 = vxpose.xlu0.b32.cont [2/16] %v587_v5, 128  ;;  %v1436_v7 = vpop.trf.xlu0  ;;  %v590_v4 = vld [vmem:[%s2909_s13 + $0xc58] sm:$0xff]  ;;  %v589_v5 = vld [vmem:[%s2909_s13 + $0xc50] sm:$0xff] }
 0x318   : > { %2467 = vst [vmem:[%s2981_s17 + $0xcb8] sm:$0xff] %v1468_v6  ;;  %2387 = vst [vmem:[%s2981_s17 + $0xa38] sm:$0xff] %v1436_v7 }
 0x31b   : > { %1581 = vxpose.xlu1.b32.cont [3/16] %v596_v8, 128  ;;  %v1469_v10 = vpop.trf.xlu1  ;;  %1549 = vxpose.xlu0.b32.cont [3/16] %v595_v9, 128  ;;  %v1437_v11 = vpop.trf.xlu0  ;;  %v598_v8 = vld [vmem:[%s2909_s13 + $0xc98] sm:$0xff]  ;;  %v597_v9 = vld [vmem:[%s2909_s13 + $0xc90] sm:$0xff] }
 0x31c   : > { %2472 = vst [vmem:[%s2981_s17 + $0xce0] sm:$0xff] %v1469_v10  ;;  %2392 = vst [vmem:[%s2981_s17 + $0xa60] sm:$0xff] %v1437_v11 }
 0x31f   : > { %1582 = vxpose.xlu1.b32.cont [4/16] %v604_v12, 128  ;;  %v1470_v14 = vpop.trf.xlu1  ;;  %1550 = vxpose.xlu0.b32.cont [4/16] %v603_v13, 128  ;;  %v1438_v15 = vpop.trf.xlu0  ;;  %v606_v12 = vld [vmem:[%s2909_s13 + $0xcd8] sm:$0xff]  ;;  %v605_v13 = vld [vmem:[%s2909_s13 + $0xcd0] sm:$0xff] }
 0x320   : > { %2477 = vst [vmem:[%s2981_s17 + $0xd08] sm:$0xff] %v1470_v14  ;;  %2397 = vst [vmem:[%s2981_s17 + $0xa88] sm:$0xff] %v1438_v15 }
 0x323   : > { %1583 = vxpose.xlu1.b32.cont [5/16] %v612_v16, 128  ;;  %v1471_v18 = vpop.trf.xlu1  ;;  %1551 = vxpose.xlu0.b32.cont [5/16] %v611_v17, 128  ;;  %v1439_v19 = vpop.trf.xlu0  ;;  %v614_v16 = vld [vmem:[%s2909_s13 + $0xd18] sm:$0xff]  ;;  %v613_v17 = vld [vmem:[%s2909_s13 + $0xd10] sm:$0xff] }
 0x324   : > { %2482 = vst [vmem:[%s2981_s17 + $0xd30] sm:$0xff] %v1471_v18  ;;  %2402 = vst [vmem:[%s2981_s17 + $0xab0] sm:$0xff] %v1439_v19 }
 0x327   : > { %1584 = vxpose.xlu1.b32.cont [6/16] %v620_v20, 128  ;;  %v1472_v22 = vpop.trf.xlu1  ;;  %1552 = vxpose.xlu0.b32.cont [6/16] %v619_v21, 128  ;;  %v1440_v23 = vpop.trf.xlu0  ;;  %v622_v20 = vld [vmem:[%s2909_s13 + $0xd58] sm:$0xff]  ;;  %v621_v21 = vld [vmem:[%s2909_s13 + $0xd50] sm:$0xff] }
 0x328   : > { %2487 = vst [vmem:[%s2981_s17 + $0xd58] sm:$0xff] %v1472_v22  ;;  %2407 = vst [vmem:[%s2981_s17 + $0xad8] sm:$0xff] %v1440_v23 }
 0x32b   : > { %1585 = vxpose.xlu1.b32.cont [7/16] %v628_v24, 128  ;;  %v1473_v26 = vpop.trf.xlu1  ;;  %1553 = vxpose.xlu0.b32.cont [7/16] %v627_v25, 128  ;;  %v1441_v27 = vpop.trf.xlu0  ;;  %v630_v24 = vld [vmem:[%s2909_s13 + $0xd98] sm:$0xff]  ;;  %v629_v25 = vld [vmem:[%s2909_s13 + $0xd90] sm:$0xff] }
 0x32c   : > { %2492 = vst [vmem:[%s2981_s17 + $0xd80] sm:$0xff] %v1473_v26  ;;  %2412 = vst [vmem:[%s2981_s17 + $0xb00] sm:$0xff] %v1441_v27 }
 0x32f   : > { %1586 = vxpose.xlu1.b32.cont [8/16] %v636_v28, 128  ;;  %v1474_v30 = vpop.trf.xlu1  ;;  %1554 = vxpose.xlu0.b32.cont [8/16] %v635_v29, 128  ;;  %v1442_v31 = vpop.trf.xlu0  ;;  %v638_v28 = vld [vmem:[%s2909_s13 + $0xdd8] sm:$0xff]  ;;  %v637_v29 = vld [vmem:[%s2909_s13 + $0xdd0] sm:$0xff] }
 0x330   : > { %2497 = vst [vmem:[%s2981_s17 + $0xda8] sm:$0xff] %v1474_v30  ;;  %2417 = vst [vmem:[%s2981_s17 + $0xb28] sm:$0xff] %v1442_v31 }
 0x333   : > { %1587 = vxpose.xlu1.b32.cont [9/16] %v644_v32, 128  ;;  %v1475_v34 = vpop.trf.xlu1  ;;  %1555 = vxpose.xlu0.b32.cont [9/16] %v643_v33, 128  ;;  %v1443_v35 = vpop.trf.xlu0  ;;  %v646_v32 = vld [vmem:[%s2909_s13 + $0xe18] sm:$0xff]  ;;  %v645_v33 = vld [vmem:[%s2909_s13 + $0xe10] sm:$0xff] }
 0x334   : > { %2502 = vst [vmem:[%s2981_s17 + $0xdd0] sm:$0xff] %v1475_v34  ;;  %2422 = vst [vmem:[%s2981_s17 + $0xb50] sm:$0xff] %v1443_v35 }
 0x337   : > { %1588 = vxpose.xlu1.b32.cont [10/16] %v652_v36, 128  ;;  %v1476_v38 = vpop.trf.xlu1  ;;  %1556 = vxpose.xlu0.b32.cont [10/16] %v651_v37, 128  ;;  %v1444_v39 = vpop.trf.xlu0  ;;  %v654_v36 = vld [vmem:[%s2909_s13 + $0xe58] sm:$0xff]  ;;  %v653_v37 = vld [vmem:[%s2909_s13 + $0xe50] sm:$0xff] }
 0x338   : > { %2507 = vst [vmem:[%s2981_s17 + $0xdf8] sm:$0xff] %v1476_v38  ;;  %2427 = vst [vmem:[%s2981_s17 + $0xb78] sm:$0xff] %v1444_v39 }
 0x33b   : > { %1589 = vxpose.xlu1.b32.cont [11/16] %v660_v40, 128  ;;  %v1477_v42 = vpop.trf.xlu1  ;;  %1557 = vxpose.xlu0.b32.cont [11/16] %v659_v41, 128  ;;  %v1445_v43 = vpop.trf.xlu0  ;;  %v662_v40 = vld [vmem:[%s2909_s13 + $0xe98] sm:$0xff]  ;;  %v661_v41 = vld [vmem:[%s2909_s13 + $0xe90] sm:$0xff] }
 0x33c   : > { %2512 = vst [vmem:[%s2981_s17 + $0xe20] sm:$0xff] %v1477_v42  ;;  %2432 = vst [vmem:[%s2981_s17 + $0xba0] sm:$0xff] %v1445_v43 }
 0x33f   : > { %1590 = vxpose.xlu1.b32.cont [12/16] %v668_v44, 128  ;;  %v1478_v46 = vpop.trf.xlu1  ;;  %1558 = vxpose.xlu0.b32.cont [12/16] %v667_v45, 128  ;;  %v1446_v47 = vpop.trf.xlu0  ;;  %v670_v44 = vld [vmem:[%s2909_s13 + $0xed8] sm:$0xff]  ;;  %v669_v45 = vld [vmem:[%s2909_s13 + $0xed0] sm:$0xff] }
 0x340   : > { %2517 = vst [vmem:[%s2981_s17 + $0xe48] sm:$0xff] %v1478_v46  ;;  %2437 = vst [vmem:[%s2981_s17 + $0xbc8] sm:$0xff] %v1446_v47 }
 0x343   : > { %1591 = vxpose.xlu1.b32.cont [13/16] %v676_v48, 128  ;;  %v1479_v50 = vpop.trf.xlu1  ;;  %1559 = vxpose.xlu0.b32.cont [13/16] %v675_v49, 128  ;;  %v1447_v51 = vpop.trf.xlu0  ;;  %v678_v48 = vld [vmem:[%s2909_s13 + $0xf18] sm:$0xff]  ;;  %v677_v49 = vld [vmem:[%s2909_s13 + $0xf10] sm:$0xff] }
 0x344   : > { %2522 = vst [vmem:[%s2981_s17 + $0xe70] sm:$0xff] %v1479_v50  ;;  %2442 = vst [vmem:[%s2981_s17 + $0xbf0] sm:$0xff] %v1447_v51 }
 0x347   : > { %1592 = vxpose.xlu1.b32.cont [14/16] %v684_v52, 128  ;;  %v1480_v54 = vpop.trf.xlu1  ;;  %1560 = vxpose.xlu0.b32.cont [14/16] %v683_v53, 128  ;;  %v1448_v55 = vpop.trf.xlu0  ;;  %v686_v52 = vld [vmem:[%s2909_s13 + $0xf58] sm:$0xff]  ;;  %v685_v53 = vld [vmem:[%s2909_s13 + $0xf50] sm:$0xff] }
 0x348   : > { %2527 = vst [vmem:[%s2981_s17 + $0xe98] sm:$0xff] %v1480_v54  ;;  %2447 = vst [vmem:[%s2981_s17 + $0xc18] sm:$0xff] %v1448_v55 }
 0x34b   : > { %1593 = vxpose.xlu1.b32.cont [15/16] %v692_v56, 128  ;;  %v1481_v58 = vpop.trf.xlu1  ;;  %1561 = vxpose.xlu0.b32.cont [15/16] %v691_v57, 128  ;;  %v1449_v59 = vpop.trf.xlu0  ;;  %v694_v56 = vld [vmem:[%s2909_s13 + $0xf98] sm:$0xff]  ;;  %v693_v57 = vld [vmem:[%s2909_s13 + $0xf90] sm:$0xff] }
 0x34c   : > { %2532 = vst [vmem:[%s2981_s17 + $0xec0] sm:$0xff] %v1481_v58  ;;  %2452 = vst [vmem:[%s2981_s17 + $0xc40] sm:$0xff] %v1449_v59 }
 0x34f   : > { %1594 = vxpose.xlu1.b32.end [16/16] %v700_v60, 128  ;;  %v1482_v62 = vpop.trf.xlu1  ;;  %1562 = vxpose.xlu0.b32.end [16/16] %v699_v61, 128  ;;  %v1450_v63 = vpop.trf.xlu0  ;;  %v702_v60 = vld [vmem:[%s2909_s13 + $0xfd8] sm:$0xff]  ;;  %v701_v61 = vld [vmem:[%s2909_s13 + $0xfd0] sm:$0xff] }
 0x350   : > { %2537 = vst [vmem:[%s2981_s17 + $0xee8] sm:$0xff] %v1482_v62  ;;  %2457 = vst [vmem:[%s2981_s17 + $0xc68] sm:$0xff] %v1450_v63 }
 0x353   : > { %1643 = vxpose.xlu1.b32.start [1/16] %v582_v0, 128  ;;  %v1531_v2 = vpop.trf.xlu1  ;;  %1611 = vxpose.xlu0.b32.start [1/16] %v581_v1, 128  ;;  %v1499_v3 = vpop.trf.xlu0  ;;  %v584_v0 = vld [vmem:[%s2909_s13 + $0xc28] sm:$0xff]  ;;  %v583_v1 = vld [vmem:[%s2909_s13 + $0xc20] sm:$0xff] }
 0x354   : > { %2622 = vst [vmem:[%s2981_s17 + $0x1190] sm:$0xff] %v1531_v2  ;;  %2542 = vst [vmem:[%s2981_s17 + $0xf10] sm:$0xff] %v1499_v3 }
 0x357   : > { %1644 = vxpose.xlu1.b32.cont [2/16] %v590_v4, 128  ;;  %v1532_v6 = vpop.trf.xlu1  ;;  %1612 = vxpose.xlu0.b32.cont [2/16] %v589_v5, 128  ;;  %v1500_v7 = vpop.trf.xlu0  ;;  %v592_v4 = vld [vmem:[%s2909_s13 + $0xc68] sm:$0xff]  ;;  %v591_v5 = vld [vmem:[%s2909_s13 + $0xc60] sm:$0xff] }
 0x358   : > { %2627 = vst [vmem:[%s2981_s17 + $0x11b8] sm:$0xff] %v1532_v6  ;;  %2547 = vst [vmem:[%s2981_s17 + $0xf38] sm:$0xff] %v1500_v7 }
 0x35b   : > { %1645 = vxpose.xlu1.b32.cont [3/16] %v598_v8, 128  ;;  %v1533_v10 = vpop.trf.xlu1  ;;  %1613 = vxpose.xlu0.b32.cont [3/16] %v597_v9, 128  ;;  %v1501_v11 = vpop.trf.xlu0  ;;  %v600_v8 = vld [vmem:[%s2909_s13 + $0xca8] sm:$0xff]  ;;  %v599_v9 = vld [vmem:[%s2909_s13 + $0xca0] sm:$0xff] }
 0x35c   : > { %2632 = vst [vmem:[%s2981_s17 + $0x11e0] sm:$0xff] %v1533_v10  ;;  %2552 = vst [vmem:[%s2981_s17 + $0xf60] sm:$0xff] %v1501_v11 }
 0x35f   : > { %1646 = vxpose.xlu1.b32.cont [4/16] %v606_v12, 128  ;;  %v1534_v14 = vpop.trf.xlu1  ;;  %1614 = vxpose.xlu0.b32.cont [4/16] %v605_v13, 128  ;;  %v1502_v15 = vpop.trf.xlu0  ;;  %v608_v12 = vld [vmem:[%s2909_s13 + $0xce8] sm:$0xff]  ;;  %v607_v13 = vld [vmem:[%s2909_s13 + $0xce0] sm:$0xff] }
 0x360   : > { %2637 = vst [vmem:[%s2981_s17 + $0x1208] sm:$0xff] %v1534_v14  ;;  %2557 = vst [vmem:[%s2981_s17 + $0xf88] sm:$0xff] %v1502_v15 }
 0x363   : > { %1647 = vxpose.xlu1.b32.cont [5/16] %v614_v16, 128  ;;  %v1535_v18 = vpop.trf.xlu1  ;;  %1615 = vxpose.xlu0.b32.cont [5/16] %v613_v17, 128  ;;  %v1503_v19 = vpop.trf.xlu0  ;;  %v616_v16 = vld [vmem:[%s2909_s13 + $0xd28] sm:$0xff]  ;;  %v615_v17 = vld [vmem:[%s2909_s13 + $0xd20] sm:$0xff] }
 0x364   : > { %2642 = vst [vmem:[%s2981_s17 + $0x1230] sm:$0xff] %v1535_v18  ;;  %2562 = vst [vmem:[%s2981_s17 + $0xfb0] sm:$0xff] %v1503_v19 }
 0x367   : > { %1648 = vxpose.xlu1.b32.cont [6/16] %v622_v20, 128  ;;  %v1536_v22 = vpop.trf.xlu1  ;;  %1616 = vxpose.xlu0.b32.cont [6/16] %v621_v21, 128  ;;  %v1504_v23 = vpop.trf.xlu0  ;;  %v624_v20 = vld [vmem:[%s2909_s13 + $0xd68] sm:$0xff]  ;;  %v623_v21 = vld [vmem:[%s2909_s13 + $0xd60] sm:$0xff] }
 0x368   : > { %2647 = vst [vmem:[%s2981_s17 + $0x1258] sm:$0xff] %v1536_v22  ;;  %2567 = vst [vmem:[%s2981_s17 + $0xfd8] sm:$0xff] %v1504_v23 }
 0x36b   : > { %1649 = vxpose.xlu1.b32.cont [7/16] %v630_v24, 128  ;;  %v1537_v26 = vpop.trf.xlu1  ;;  %1617 = vxpose.xlu0.b32.cont [7/16] %v629_v25, 128  ;;  %v1505_v27 = vpop.trf.xlu0  ;;  %v632_v24 = vld [vmem:[%s2909_s13 + $0xda8] sm:$0xff]  ;;  %v631_v25 = vld [vmem:[%s2909_s13 + $0xda0] sm:$0xff] }
 0x36c   : > { %2652 = vst [vmem:[%s2981_s17 + $0x1280] sm:$0xff] %v1537_v26  ;;  %2572 = vst [vmem:[%s2981_s17 + $0x1000] sm:$0xff] %v1505_v27 }
 0x36f   : > { %1650 = vxpose.xlu1.b32.cont [8/16] %v638_v28, 128  ;;  %v1538_v30 = vpop.trf.xlu1  ;;  %1618 = vxpose.xlu0.b32.cont [8/16] %v637_v29, 128  ;;  %v1506_v31 = vpop.trf.xlu0  ;;  %v640_v28 = vld [vmem:[%s2909_s13 + $0xde8] sm:$0xff]  ;;  %v639_v29 = vld [vmem:[%s2909_s13 + $0xde0] sm:$0xff] }
 0x370   : > { %2657 = vst [vmem:[%s2981_s17 + $0x12a8] sm:$0xff] %v1538_v30  ;;  %2577 = vst [vmem:[%s2981_s17 + $0x1028] sm:$0xff] %v1506_v31 }
 0x373   : > { %1651 = vxpose.xlu1.b32.cont [9/16] %v646_v32, 128  ;;  %v1539_v34 = vpop.trf.xlu1  ;;  %1619 = vxpose.xlu0.b32.cont [9/16] %v645_v33, 128  ;;  %v1507_v35 = vpop.trf.xlu0  ;;  %v648_v32 = vld [vmem:[%s2909_s13 + $0xe28] sm:$0xff]  ;;  %v647_v33 = vld [vmem:[%s2909_s13 + $0xe20] sm:$0xff] }
 0x374   : > { %2662 = vst [vmem:[%s2981_s17 + $0x12d0] sm:$0xff] %v1539_v34  ;;  %2582 = vst [vmem:[%s2981_s17 + $0x1050] sm:$0xff] %v1507_v35 }
 0x377   : > { %1652 = vxpose.xlu1.b32.cont [10/16] %v654_v36, 128  ;;  %v1540_v38 = vpop.trf.xlu1  ;;  %1620 = vxpose.xlu0.b32.cont [10/16] %v653_v37, 128  ;;  %v1508_v39 = vpop.trf.xlu0  ;;  %v656_v36 = vld [vmem:[%s2909_s13 + $0xe68] sm:$0xff]  ;;  %v655_v37 = vld [vmem:[%s2909_s13 + $0xe60] sm:$0xff] }
 0x378   : > { %2667 = vst [vmem:[%s2981_s17 + $0x12f8] sm:$0xff] %v1540_v38  ;;  %2587 = vst [vmem:[%s2981_s17 + $0x1078] sm:$0xff] %v1508_v39 }
 0x37b   : > { %1653 = vxpose.xlu1.b32.cont [11/16] %v662_v40, 128  ;;  %v1541_v42 = vpop.trf.xlu1  ;;  %1621 = vxpose.xlu0.b32.cont [11/16] %v661_v41, 128  ;;  %v1509_v43 = vpop.trf.xlu0  ;;  %v664_v40 = vld [vmem:[%s2909_s13 + $0xea8] sm:$0xff]  ;;  %v663_v41 = vld [vmem:[%s2909_s13 + $0xea0] sm:$0xff] }
 0x37c   : > { %2672 = vst [vmem:[%s2981_s17 + $0x1320] sm:$0xff] %v1541_v42  ;;  %2592 = vst [vmem:[%s2981_s17 + $0x10a0] sm:$0xff] %v1509_v43 }
 0x37f   : > { %1654 = vxpose.xlu1.b32.cont [12/16] %v670_v44, 128  ;;  %v1542_v46 = vpop.trf.xlu1  ;;  %1622 = vxpose.xlu0.b32.cont [12/16] %v669_v45, 128  ;;  %v1510_v47 = vpop.trf.xlu0  ;;  %v672_v44 = vld [vmem:[%s2909_s13 + $0xee8] sm:$0xff]  ;;  %v671_v45 = vld [vmem:[%s2909_s13 + $0xee0] sm:$0xff] }
 0x380   : > { %2677 = vst [vmem:[%s2981_s17 + $0x1348] sm:$0xff] %v1542_v46  ;;  %2597 = vst [vmem:[%s2981_s17 + $0x10c8] sm:$0xff] %v1510_v47 }
 0x383   : > { %1655 = vxpose.xlu1.b32.cont [13/16] %v678_v48, 128  ;;  %v1543_v50 = vpop.trf.xlu1  ;;  %1623 = vxpose.xlu0.b32.cont [13/16] %v677_v49, 128  ;;  %v1511_v51 = vpop.trf.xlu0  ;;  %v680_v48 = vld [vmem:[%s2909_s13 + $0xf28] sm:$0xff]  ;;  %v679_v49 = vld [vmem:[%s2909_s13 + $0xf20] sm:$0xff] }
 0x384   : > { %2682 = vst [vmem:[%s2981_s17 + $0x1370] sm:$0xff] %v1543_v50  ;;  %2602 = vst [vmem:[%s2981_s17 + $0x10f0] sm:$0xff] %v1511_v51 }
 0x387   : > { %1656 = vxpose.xlu1.b32.cont [14/16] %v686_v52, 128  ;;  %v1544_v54 = vpop.trf.xlu1  ;;  %1624 = vxpose.xlu0.b32.cont [14/16] %v685_v53, 128  ;;  %v1512_v55 = vpop.trf.xlu0  ;;  %v688_v52 = vld [vmem:[%s2909_s13 + $0xf68] sm:$0xff]  ;;  %v687_v53 = vld [vmem:[%s2909_s13 + $0xf60] sm:$0xff] }
 0x388   : > { %2687 = vst [vmem:[%s2981_s17 + $0x1398] sm:$0xff] %v1544_v54  ;;  %2607 = vst [vmem:[%s2981_s17 + $0x1118] sm:$0xff] %v1512_v55 }
 0x38b   : > { %1657 = vxpose.xlu1.b32.cont [15/16] %v694_v56, 128  ;;  %v1545_v58 = vpop.trf.xlu1  ;;  %1625 = vxpose.xlu0.b32.cont [15/16] %v693_v57, 128  ;;  %v1513_v59 = vpop.trf.xlu0  ;;  %v696_v56 = vld [vmem:[%s2909_s13 + $0xfa8] sm:$0xff]  ;;  %v695_v57 = vld [vmem:[%s2909_s13 + $0xfa0] sm:$0xff] }
 0x38c   : > { %2692 = vst [vmem:[%s2981_s17 + $0x13c0] sm:$0xff] %v1545_v58  ;;  %2612 = vst [vmem:[%s2981_s17 + $0x1140] sm:$0xff] %v1513_v59 }
 0x38f   : > { %1658 = vxpose.xlu1.b32.end [16/16] %v702_v60, 128  ;;  %v1546_v62 = vpop.trf.xlu1  ;;  %1626 = vxpose.xlu0.b32.end [16/16] %v701_v61, 128  ;;  %v1514_v63 = vpop.trf.xlu0  ;;  %v704_v60 = vld [vmem:[%s2909_s13 + $0xfe8] sm:$0xff]  ;;  %v703_v61 = vld [vmem:[%s2909_s13 + $0xfe0] sm:$0xff] }
 0x390   : > { %2697 = vst [vmem:[%s2981_s17 + $0x13e8] sm:$0xff] %v1546_v62  ;;  %2617 = vst [vmem:[%s2981_s17 + $0x1168] sm:$0xff] %v1514_v63 }
 0x393   : > { %1707 = vxpose.xlu1.b32.start [1/16] %v584_v0, 128  ;;  %v1595_v2 = vpop.trf.xlu1  ;;  %1675 = vxpose.xlu0.b32.start [1/16] %v583_v1, 128  ;;  %v1563_v3 = vpop.trf.xlu0  ;;  %v586_v0 = vld [vmem:[%s2909_s13 + $0xc38] sm:$0xff]  ;;  %v585_v1 = vld [vmem:[%s2909_s13 + $0xc30] sm:$0xff] }
 0x394   : > { %2143 = vst [vmem:[%s2981_s17 + $0x298] sm:$0xff] %v1595_v2  ;;  %2062 = vst [vmem:[%s2981_s17 + $0x18] sm:$0xff] %v1563_v3 }
 0x397   : > { %1708 = vxpose.xlu1.b32.cont [2/16] %v592_v4, 128  ;;  %v1596_v6 = vpop.trf.xlu1  ;;  %1676 = vxpose.xlu0.b32.cont [2/16] %v591_v5, 128  ;;  %v1564_v7 = vpop.trf.xlu0  ;;  %v594_v4 = vld [vmem:[%s2909_s13 + $0xc78] sm:$0xff]  ;;  %v593_v5 = vld [vmem:[%s2909_s13 + $0xc70] sm:$0xff] }
 0x398   : > { %2148 = vst [vmem:[%s2981_s17 + $0x2c0] sm:$0xff] %v1596_v6  ;;  %2068 = vst [vmem:[%s2981_s17 + $0x40] sm:$0xff] %v1564_v7 }
 0x39b   : > { %1709 = vxpose.xlu1.b32.cont [3/16] %v600_v8, 128  ;;  %v1597_v10 = vpop.trf.xlu1  ;;  %1677 = vxpose.xlu0.b32.cont [3/16] %v599_v9, 128  ;;  %v1565_v11 = vpop.trf.xlu0  ;;  %v602_v8 = vld [vmem:[%s2909_s13 + $0xcb8] sm:$0xff]  ;;  %v601_v9 = vld [vmem:[%s2909_s13 + $0xcb0] sm:$0xff] }
 0x39c   : > { %2153 = vst [vmem:[%s2981_s17 + $0x2e8] sm:$0xff] %v1597_v10  ;;  %2073 = vst [vmem:[%s2981_s17 + $0x68] sm:$0xff] %v1565_v11 }
 0x39f   : > { %1710 = vxpose.xlu1.b32.cont [4/16] %v608_v12, 128  ;;  %v1598_v14 = vpop.trf.xlu1  ;;  %1678 = vxpose.xlu0.b32.cont [4/16] %v607_v13, 128  ;;  %v1566_v15 = vpop.trf.xlu0  ;;  %v610_v12 = vld [vmem:[%s2909_s13 + $0xcf8] sm:$0xff]  ;;  %v609_v13 = vld [vmem:[%s2909_s13 + $0xcf0] sm:$0xff] }
 0x3a0   : > { %2158 = vst [vmem:[%s2981_s17 + $0x310] sm:$0xff] %v1598_v14  ;;  %2078 = vst [vmem:[%s2981_s17 + $0x90] sm:$0xff] %v1566_v15 }
 0x3a3   : > { %1711 = vxpose.xlu1.b32.cont [5/16] %v616_v16, 128  ;;  %v1599_v18 = vpop.trf.xlu1  ;;  %1679 = vxpose.xlu0.b32.cont [5/16] %v615_v17, 128  ;;  %v1567_v19 = vpop.trf.xlu0  ;;  %v618_v16 = vld [vmem:[%s2909_s13 + $0xd38] sm:$0xff]  ;;  %v617_v17 = vld [vmem:[%s2909_s13 + $0xd30] sm:$0xff] }
 0x3a4   : > { %2163 = vst [vmem:[%s2981_s17 + $0x338] sm:$0xff] %v1599_v18  ;;  %2083 = vst [vmem:[%s2981_s17 + $0xb8] sm:$0xff] %v1567_v19 }
 0x3a7   : > { %1712 = vxpose.xlu1.b32.cont [6/16] %v624_v20, 128  ;;  %v1600_v22 = vpop.trf.xlu1  ;;  %1680 = vxpose.xlu0.b32.cont [6/16] %v623_v21, 128  ;;  %v1568_v23 = vpop.trf.xlu0  ;;  %v626_v20 = vld [vmem:[%s2909_s13 + $0xd78] sm:$0xff]  ;;  %v625_v21 = vld [vmem:[%s2909_s13 + $0xd70] sm:$0xff] }
 0x3a8   : > { %2168 = vst [vmem:[%s2981_s17 + $0x360] sm:$0xff] %v1600_v22  ;;  %2088 = vst [vmem:[%s2981_s17 + $0xe0] sm:$0xff] %v1568_v23 }
 0x3ab   : > { %1713 = vxpose.xlu1.b32.cont [7/16] %v632_v24, 128  ;;  %v1601_v26 = vpop.trf.xlu1  ;;  %1681 = vxpose.xlu0.b32.cont [7/16] %v631_v25, 128  ;;  %v1569_v27 = vpop.trf.xlu0  ;;  %v634_v24 = vld [vmem:[%s2909_s13 + $0xdb8] sm:$0xff]  ;;  %v633_v25 = vld [vmem:[%s2909_s13 + $0xdb0] sm:$0xff] }
 0x3ac   : > { %2173 = vst [vmem:[%s2981_s17 + $0x388] sm:$0xff] %v1601_v26  ;;  %2093 = vst [vmem:[%s2981_s17 + $0x108] sm:$0xff] %v1569_v27 }
 0x3af   : > { %1714 = vxpose.xlu1.b32.cont [8/16] %v640_v28, 128  ;;  %v1602_v30 = vpop.trf.xlu1  ;;  %1682 = vxpose.xlu0.b32.cont [8/16] %v639_v29, 128  ;;  %v1570_v31 = vpop.trf.xlu0  ;;  %v642_v28 = vld [vmem:[%s2909_s13 + $0xdf8] sm:$0xff]  ;;  %v641_v29 = vld [vmem:[%s2909_s13 + $0xdf0] sm:$0xff] }
 0x3b0   : > { %2178 = vst [vmem:[%s2981_s17 + $0x3b0] sm:$0xff] %v1602_v30  ;;  %2098 = vst [vmem:[%s2981_s17 + $0x130] sm:$0xff] %v1570_v31 }
 0x3b3   : > { %1715 = vxpose.xlu1.b32.cont [9/16] %v648_v32, 128  ;;  %v1603_v34 = vpop.trf.xlu1  ;;  %1683 = vxpose.xlu0.b32.cont [9/16] %v647_v33, 128  ;;  %v1571_v35 = vpop.trf.xlu0  ;;  %v650_v32 = vld [vmem:[%s2909_s13 + $0xe38] sm:$0xff]  ;;  %v649_v33 = vld [vmem:[%s2909_s13 + $0xe30] sm:$0xff] }
 0x3b4   : > { %2183 = vst [vmem:[%s2981_s17 + $0x3d8] sm:$0xff] %v1603_v34  ;;  %2103 = vst [vmem:[%s2981_s17 + $0x158] sm:$0xff] %v1571_v35 }
 0x3b7   : > { %1716 = vxpose.xlu1.b32.cont [10/16] %v656_v36, 128  ;;  %v1604_v38 = vpop.trf.xlu1  ;;  %1684 = vxpose.xlu0.b32.cont [10/16] %v655_v37, 128  ;;  %v1572_v39 = vpop.trf.xlu0  ;;  %v658_v36 = vld [vmem:[%s2909_s13 + $0xe78] sm:$0xff]  ;;  %v657_v37 = vld [vmem:[%s2909_s13 + $0xe70] sm:$0xff] }
 0x3b8   : > { %2188 = vst [vmem:[%s2981_s17 + $0x400] sm:$0xff] %v1604_v38  ;;  %2108 = vst [vmem:[%s2981_s17 + $0x180] sm:$0xff] %v1572_v39 }
 0x3bb   : > { %1717 = vxpose.xlu1.b32.cont [11/16] %v664_v40, 128  ;;  %v1605_v42 = vpop.trf.xlu1  ;;  %1685 = vxpose.xlu0.b32.cont [11/16] %v663_v41, 128  ;;  %v1573_v43 = vpop.trf.xlu0  ;;  %v666_v40 = vld [vmem:[%s2909_s13 + $0xeb8] sm:$0xff]  ;;  %v665_v41 = vld [vmem:[%s2909_s13 + $0xeb0] sm:$0xff] }
 0x3bc   : > { %2193 = vst [vmem:[%s2981_s17 + $0x428] sm:$0xff] %v1605_v42  ;;  %2113 = vst [vmem:[%s2981_s17 + $0x1a8] sm:$0xff] %v1573_v43 }
 0x3bf   : > { %1718 = vxpose.xlu1.b32.cont [12/16] %v672_v44, 128  ;;  %v1606_v46 = vpop.trf.xlu1  ;;  %1686 = vxpose.xlu0.b32.cont [12/16] %v671_v45, 128  ;;  %v1574_v47 = vpop.trf.xlu0  ;;  %v674_v44 = vld [vmem:[%s2909_s13 + $0xef8] sm:$0xff]  ;;  %v673_v45 = vld [vmem:[%s2909_s13 + $0xef0] sm:$0xff] }
 0x3c0   : > { %2198 = vst [vmem:[%s2981_s17 + $0x450] sm:$0xff] %v1606_v46  ;;  %2118 = vst [vmem:[%s2981_s17 + $0x1d0] sm:$0xff] %v1574_v47 }
 0x3c3   : > { %1719 = vxpose.xlu1.b32.cont [13/16] %v680_v48, 128  ;;  %v1607_v50 = vpop.trf.xlu1  ;;  %1687 = vxpose.xlu0.b32.cont [13/16] %v679_v49, 128  ;;  %v1575_v51 = vpop.trf.xlu0  ;;  %v682_v48 = vld [vmem:[%s2909_s13 + $0xf38] sm:$0xff]  ;;  %v681_v49 = vld [vmem:[%s2909_s13 + $0xf30] sm:$0xff] }
 0x3c4   : > { %2203 = vst [vmem:[%s2981_s17 + $0x478] sm:$0xff] %v1607_v50  ;;  %2123 = vst [vmem:[%s2981_s17 + $0x1f8] sm:$0xff] %v1575_v51 }
 0x3c7   : > { %1720 = vxpose.xlu1.b32.cont [14/16] %v688_v52, 128  ;;  %v1608_v54 = vpop.trf.xlu1  ;;  %1688 = vxpose.xlu0.b32.cont [14/16] %v687_v53, 128  ;;  %v1576_v55 = vpop.trf.xlu0  ;;  %v690_v52 = vld [vmem:[%s2909_s13 + $0xf78] sm:$0xff]  ;;  %v689_v53 = vld [vmem:[%s2909_s13 + $0xf70] sm:$0xff] }
 0x3c8   : > { %2208 = vst [vmem:[%s2981_s17 + $0x4a0] sm:$0xff] %v1608_v54  ;;  %2128 = vst [vmem:[%s2981_s17 + $0x220] sm:$0xff] %v1576_v55 }
 0x3cb   : > { %1721 = vxpose.xlu1.b32.cont [15/16] %v696_v56, 128  ;;  %v1609_v58 = vpop.trf.xlu1  ;;  %1689 = vxpose.xlu0.b32.cont [15/16] %v695_v57, 128  ;;  %v1577_v59 = vpop.trf.xlu0  ;;  %v698_v56 = vld [vmem:[%s2909_s13 + $0xfb8] sm:$0xff]  ;;  %v697_v57 = vld [vmem:[%s2909_s13 + $0xfb0] sm:$0xff] }
 0x3cc   : > { %2213 = vst [vmem:[%s2981_s17 + $0x4c8] sm:$0xff] %v1609_v58  ;;  %2133 = vst [vmem:[%s2981_s17 + $0x248] sm:$0xff] %v1577_v59 }
 0x3cf   : > { %1722 = vxpose.xlu1.b32.end [16/16] %v704_v60, 128  ;;  %v1610_v62 = vpop.trf.xlu1  ;;  %1690 = vxpose.xlu0.b32.end [16/16] %v703_v61, 128  ;;  %v1578_v63 = vpop.trf.xlu0  ;;  %v706_v60 = vld [vmem:[%s2909_s13 + $0xff8] sm:$0xff]  ;;  %v705_v61 = vld [vmem:[%s2909_s13 + $0xff0] sm:$0xff] }
 0x3d0   : > { %2218 = vst [vmem:[%s2981_s17 + $0x4f0] sm:$0xff] %v1610_v62  ;;  %2138 = vst [vmem:[%s2981_s17 + $0x270] sm:$0xff] %v1578_v63 }
 0x3d3   : > { %1771 = vxpose.xlu1.b32.start [1/16] %v586_v0, 128  ;;  %v1659_v2 = vpop.trf.xlu1  ;;  %1739 = vxpose.xlu0.b32.start [1/16] %v585_v1, 128  ;;  %v1627_v3 = vpop.trf.xlu0  ;;  %v708_v0 = vld [vmem:[%s2909_s13 + $0x1008] sm:$0xff]  ;;  %v707_v1 = vld [vmem:[%s2909_s13 + $0x1000] sm:$0xff] }
 0x3d4   : > { %2303 = vst [vmem:[%s2981_s17 + $0x798] sm:$0xff] %v1659_v2  ;;  %2223 = vst [vmem:[%s2981_s17 + $0x518] sm:$0xff] %v1627_v3 }
 0x3d7   : > { %1772 = vxpose.xlu1.b32.cont [2/16] %v594_v4, 128  ;;  %v1660_v6 = vpop.trf.xlu1  ;;  %1740 = vxpose.xlu0.b32.cont [2/16] %v593_v5, 128  ;;  %v1628_v7 = vpop.trf.xlu0  ;;  %v716_v4 = vld [vmem:[%s2909_s13 + $0x1048] sm:$0xff]  ;;  %v715_v5 = vld [vmem:[%s2909_s13 + $0x1040] sm:$0xff] }
 0x3d8   : > { %2308 = vst [vmem:[%s2981_s17 + $0x7c0] sm:$0xff] %v1660_v6  ;;  %2228 = vst [vmem:[%s2981_s17 + $0x540] sm:$0xff] %v1628_v7 }
 0x3db   : > { %1773 = vxpose.xlu1.b32.cont [3/16] %v602_v8, 128  ;;  %v1661_v10 = vpop.trf.xlu1  ;;  %1741 = vxpose.xlu0.b32.cont [3/16] %v601_v9, 128  ;;  %v1629_v11 = vpop.trf.xlu0  ;;  %v724_v8 = vld [vmem:[%s2909_s13 + $0x1088] sm:$0xff]  ;;  %v723_v9 = vld [vmem:[%s2909_s13 + $0x1080] sm:$0xff] }
 0x3dc   : > { %2313 = vst [vmem:[%s2981_s17 + $0x7e8] sm:$0xff] %v1661_v10  ;;  %2233 = vst [vmem:[%s2981_s17 + $0x568] sm:$0xff] %v1629_v11 }
 0x3df   : > { %1774 = vxpose.xlu1.b32.cont [4/16] %v610_v12, 128  ;;  %v1662_v14 = vpop.trf.xlu1  ;;  %1742 = vxpose.xlu0.b32.cont [4/16] %v609_v13, 128  ;;  %v1630_v15 = vpop.trf.xlu0  ;;  %v732_v12 = vld [vmem:[%s2909_s13 + $0x10c8] sm:$0xff]  ;;  %v731_v13 = vld [vmem:[%s2909_s13 + $0x10c0] sm:$0xff] }
 0x3e0   : > { %2318 = vst [vmem:[%s2981_s17 + $0x810] sm:$0xff] %v1662_v14  ;;  %2238 = vst [vmem:[%s2981_s17 + $0x590] sm:$0xff] %v1630_v15 }
 0x3e3   : > { %1775 = vxpose.xlu1.b32.cont [5/16] %v618_v16, 128  ;;  %v1663_v18 = vpop.trf.xlu1  ;;  %1743 = vxpose.xlu0.b32.cont [5/16] %v617_v17, 128  ;;  %v1631_v19 = vpop.trf.xlu0  ;;  %v740_v16 = vld [vmem:[%s2909_s13 + $0x1108] sm:$0xff]  ;;  %v739_v17 = vld [vmem:[%s2909_s13 + $0x1100] sm:$0xff] }
 0x3e4   : > { %2323 = vst [vmem:[%s2981_s17 + $0x838] sm:$0xff] %v1663_v18  ;;  %2243 = vst [vmem:[%s2981_s17 + $0x5b8] sm:$0xff] %v1631_v19 }
 0x3e7   : > { %1776 = vxpose.xlu1.b32.cont [6/16] %v626_v20, 128  ;;  %v1664_v22 = vpop.trf.xlu1  ;;  %1744 = vxpose.xlu0.b32.cont [6/16] %v625_v21, 128  ;;  %v1632_v23 = vpop.trf.xlu0  ;;  %v748_v20 = vld [vmem:[%s2909_s13 + $0x1148] sm:$0xff]  ;;  %v747_v21 = vld [vmem:[%s2909_s13 + $0x1140] sm:$0xff] }
 0x3e8   : > { %2328 = vst [vmem:[%s2981_s17 + $0x860] sm:$0xff] %v1664_v22  ;;  %2248 = vst [vmem:[%s2981_s17 + $0x5e0] sm:$0xff] %v1632_v23 }
 0x3eb   : > { %1777 = vxpose.xlu1.b32.cont [7/16] %v634_v24, 128  ;;  %v1665_v26 = vpop.trf.xlu1  ;;  %1745 = vxpose.xlu0.b32.cont [7/16] %v633_v25, 128  ;;  %v1633_v27 = vpop.trf.xlu0  ;;  %v756_v24 = vld [vmem:[%s2909_s13 + $0x1188] sm:$0xff]  ;;  %v755_v25 = vld [vmem:[%s2909_s13 + $0x1180] sm:$0xff] }
 0x3ec   : > { %2333 = vst [vmem:[%s2981_s17 + $0x888] sm:$0xff] %v1665_v26  ;;  %2253 = vst [vmem:[%s2981_s17 + $0x608] sm:$0xff] %v1633_v27 }
 0x3ef   : > { %1778 = vxpose.xlu1.b32.cont [8/16] %v642_v28, 128  ;;  %v1666_v30 = vpop.trf.xlu1  ;;  %1746 = vxpose.xlu0.b32.cont [8/16] %v641_v29, 128  ;;  %v1634_v31 = vpop.trf.xlu0  ;;  %v764_v28 = vld [vmem:[%s2909_s13 + $0x11c8] sm:$0xff]  ;;  %v763_v29 = vld [vmem:[%s2909_s13 + $0x11c0] sm:$0xff] }
 0x3f0   : > { %2338 = vst [vmem:[%s2981_s17 + $0x8b0] sm:$0xff] %v1666_v30  ;;  %2258 = vst [vmem:[%s2981_s17 + $0x630] sm:$0xff] %v1634_v31 }
 0x3f3   : > { %1779 = vxpose.xlu1.b32.cont [9/16] %v650_v32, 128  ;;  %v1667_v34 = vpop.trf.xlu1  ;;  %1747 = vxpose.xlu0.b32.cont [9/16] %v649_v33, 128  ;;  %v1635_v35 = vpop.trf.xlu0  ;;  %v772_v32 = vld [vmem:[%s2909_s13 + $0x1208] sm:$0x1]  ;;  %v771_v33 = vld [vmem:[%s2909_s13 + $0x1200] sm:$0x1] }
 0x3f4   : > { %2343 = vst [vmem:[%s2981_s17 + $0x8d8] sm:$0xff] %v1667_v34  ;;  %2263 = vst [vmem:[%s2981_s17 + $0x658] sm:$0xff] %v1635_v35 }
 0x3f7   : > { %1780 = vxpose.xlu1.b32.cont [10/16] %v658_v36, 128  ;;  %v1668_v38 = vpop.trf.xlu1  ;;  %1748 = vxpose.xlu0.b32.cont [10/16] %v657_v37, 128  ;;  %v1636_v39 = vpop.trf.xlu0 }
 0x3f8   : > { %2348 = vst [vmem:[%s2981_s17 + $0x900] sm:$0xff] %v1668_v38  ;;  %2268 = vst [vmem:[%s2981_s17 + $0x680] sm:$0xff] %v1636_v39 }
 0x3fb   : > { %1781 = vxpose.xlu1.b32.cont [11/16] %v666_v40, 128  ;;  %v1669_v42 = vpop.trf.xlu1  ;;  %1749 = vxpose.xlu0.b32.cont [11/16] %v665_v41, 128  ;;  %v1637_v43 = vpop.trf.xlu0 }
 0x3fc   : > { %2353 = vst [vmem:[%s2981_s17 + $0x928] sm:$0xff] %v1669_v42  ;;  %2273 = vst [vmem:[%s2981_s17 + $0x6a8] sm:$0xff] %v1637_v43 }
 0x3ff   : > { %1782 = vxpose.xlu1.b32.cont [12/16] %v674_v44, 128  ;;  %v1670_v46 = vpop.trf.xlu1  ;;  %1750 = vxpose.xlu0.b32.cont [12/16] %v673_v45, 128  ;;  %v1638_v47 = vpop.trf.xlu0 }
 0x400   : > { %2358 = vst [vmem:[%s2981_s17 + $0x950] sm:$0xff] %v1670_v46  ;;  %2278 = vst [vmem:[%s2981_s17 + $0x6d0] sm:$0xff] %v1638_v47 }
 0x403   : > { %1783 = vxpose.xlu1.b32.cont [13/16] %v682_v48, 128  ;;  %v1671_v50 = vpop.trf.xlu1  ;;  %1751 = vxpose.xlu0.b32.cont [13/16] %v681_v49, 128  ;;  %v1639_v51 = vpop.trf.xlu0  ;;  %v710_v48 = vld [vmem:[%s2909_s13 + $0x1018] sm:$0xff]  ;;  %v709_v49 = vld [vmem:[%s2909_s13 + $0x1010] sm:$0xff] }
 0x404   : > { %2363 = vst [vmem:[%s2981_s17 + $0x978] sm:$0xff] %v1671_v50  ;;  %2283 = vst [vmem:[%s2981_s17 + $0x6f8] sm:$0xff] %v1639_v51 }
 0x407   : > { %1784 = vxpose.xlu1.b32.cont [14/16] %v690_v52, 128  ;;  %v1672_v54 = vpop.trf.xlu1  ;;  %1752 = vxpose.xlu0.b32.cont [14/16] %v689_v53, 128  ;;  %v1640_v55 = vpop.trf.xlu0  ;;  %v718_v52 = vld [vmem:[%s2909_s13 + $0x1058] sm:$0xff]  ;;  %v717_v53 = vld [vmem:[%s2909_s13 + $0x1050] sm:$0xff] }
 0x408   : > { %2368 = vst [vmem:[%s2981_s17 + $0x9a0] sm:$0xff] %v1672_v54  ;;  %2288 = vst [vmem:[%s2981_s17 + $0x720] sm:$0xff] %v1640_v55 }
 0x40b   : > { %1785 = vxpose.xlu1.b32.cont [15/16] %v698_v56, 128  ;;  %v1673_v58 = vpop.trf.xlu1  ;;  %1753 = vxpose.xlu0.b32.cont [15/16] %v697_v57, 128  ;;  %v1641_v59 = vpop.trf.xlu0  ;;  %v726_v56 = vld [vmem:[%s2909_s13 + $0x1098] sm:$0xff]  ;;  %v725_v57 = vld [vmem:[%s2909_s13 + $0x1090] sm:$0xff] }
 0x40c   : > { %2373 = vst [vmem:[%s2981_s17 + $0x9c8] sm:$0xff] %v1673_v58  ;;  %2293 = vst [vmem:[%s2981_s17 + $0x748] sm:$0xff] %v1641_v59 }
 0x40f   : > { %1786 = vxpose.xlu1.b32.end [16/16] %v706_v60, 128  ;;  %v1674_v62 = vpop.trf.xlu1  ;;  %1754 = vxpose.xlu0.b32.end [16/16] %v705_v61, 128  ;;  %v1642_v63 = vpop.trf.xlu0  ;;  %v734_v60 = vld [vmem:[%s2909_s13 + $0x10d8] sm:$0xff]  ;;  %v733_v61 = vld [vmem:[%s2909_s13 + $0x10d0] sm:$0xff] }
 0x410   : > { %2378 = vst [vmem:[%s2981_s17 + $0x9f0] sm:$0xff] %v1674_v62  ;;  %2298 = vst [vmem:[%s2981_s17 + $0x770] sm:$0xff] %v1642_v63 }
 0x413   : > { %1835 = vxpose.xlu1.b32.start [1/9] (short) %v708_v0, 128  ;;  %v1723_v2 = vpop.trf.xlu1  ;;  %1803 = vxpose.xlu0.b32.start [1/9] (short) %v707_v1, 128  ;;  %v1691_v3 = vpop.trf.xlu0  ;;  %v742_v0 = vld [vmem:[%s2909_s13 + $0x1118] sm:$0xff]  ;;  %v741_v1 = vld [vmem:[%s2909_s13 + $0x1110] sm:$0xff] }
 0x414   : > { %2463 = vst [vmem:[%s2981_s17 + $0xc98] sm:$0xff] %v1723_v2  ;;  %2383 = vst [vmem:[%s2981_s17 + $0xa18] sm:$0xff] %v1691_v3 }
 0x417   : > { %1836 = vxpose.xlu1.b32.cont [2/9] (short) %v716_v4, 128  ;;  %v1724_v6 = vpop.trf.xlu1  ;;  %1804 = vxpose.xlu0.b32.cont [2/9] (short) %v715_v5, 128  ;;  %v1692_v7 = vpop.trf.xlu0  ;;  %v750_v4 = vld [vmem:[%s2909_s13 + $0x1158] sm:$0xff]  ;;  %v749_v5 = vld [vmem:[%s2909_s13 + $0x1150] sm:$0xff] }
 0x418   : > { %2468 = vst [vmem:[%s2981_s17 + $0xcc0] sm:$0xff] %v1724_v6  ;;  %2388 = vst [vmem:[%s2981_s17 + $0xa40] sm:$0xff] %v1692_v7 }
 0x41b   : > { %1837 = vxpose.xlu1.b32.cont [3/9] (short) %v724_v8, 128  ;;  %v1725_v10 = vpop.trf.xlu1  ;;  %1805 = vxpose.xlu0.b32.cont [3/9] (short) %v723_v9, 128  ;;  %v1693_v11 = vpop.trf.xlu0  ;;  %v758_v8 = vld [vmem:[%s2909_s13 + $0x1198] sm:$0xff]  ;;  %v757_v9 = vld [vmem:[%s2909_s13 + $0x1190] sm:$0xff] }
 0x41c   : > { %2473 = vst [vmem:[%s2981_s17 + $0xce8] sm:$0xff] %v1725_v10  ;;  %2393 = vst [vmem:[%s2981_s17 + $0xa68] sm:$0xff] %v1693_v11 }
 0x41f   : > { %1838 = vxpose.xlu1.b32.cont [4/9] (short) %v732_v12, 128  ;;  %v1726_v14 = vpop.trf.xlu1  ;;  %1806 = vxpose.xlu0.b32.cont [4/9] (short) %v731_v13, 128  ;;  %v1694_v15 = vpop.trf.xlu0  ;;  %v766_v12 = vld [vmem:[%s2909_s13 + $0x11d8] sm:$0xff]  ;;  %v765_v13 = vld [vmem:[%s2909_s13 + $0x11d0] sm:$0xff] }
 0x420   : > { %2478 = vst [vmem:[%s2981_s17 + $0xd10] sm:$0xff] %v1726_v14  ;;  %2398 = vst [vmem:[%s2981_s17 + $0xa90] sm:$0xff] %v1694_v15 }
 0x423   : > { %1839 = vxpose.xlu1.b32.cont [5/9] (short) %v740_v16, 128  ;;  %v1727_v18 = vpop.trf.xlu1  ;;  %1807 = vxpose.xlu0.b32.cont [5/9] (short) %v739_v17, 128  ;;  %v1695_v19 = vpop.trf.xlu0  ;;  %v774_v16 = vld [vmem:[%s2909_s13 + $0x1218] sm:$0x1]  ;;  %v773_v17 = vld [vmem:[%s2909_s13 + $0x1210] sm:$0x1] }
 0x424   : > { %2483 = vst [vmem:[%s2981_s17 + $0xd38] sm:$0xff] %v1727_v18  ;;  %2403 = vst [vmem:[%s2981_s17 + $0xab8] sm:$0xff] %v1695_v19 }
 0x427   : > { %1840 = vxpose.xlu1.b32.cont [6/9] (short) %v748_v20, 128  ;;  %v1728_v22 = vpop.trf.xlu1  ;;  %1808 = vxpose.xlu0.b32.cont [6/9] (short) %v747_v21, 128  ;;  %v1696_v23 = vpop.trf.xlu0 }
 0x428   : > { %2488 = vst [vmem:[%s2981_s17 + $0xd60] sm:$0xff] %v1728_v22  ;;  %2408 = vst [vmem:[%s2981_s17 + $0xae0] sm:$0xff] %v1696_v23 }
 0x42b   : > { %1841 = vxpose.xlu1.b32.cont [7/9] (short) %v756_v24, 128  ;;  %v1729_v26 = vpop.trf.xlu1  ;;  %1809 = vxpose.xlu0.b32.cont [7/9] (short) %v755_v25, 128  ;;  %v1697_v27 = vpop.trf.xlu0 }
 0x42c   : > { %2493 = vst [vmem:[%s2981_s17 + $0xd88] sm:$0xff] %v1729_v26  ;;  %2413 = vst [vmem:[%s2981_s17 + $0xb08] sm:$0xff] %v1697_v27 }
 0x42f   : > { %1842 = vxpose.xlu1.b32.cont [8/9] (short) %v764_v28, 128  ;;  %v1730_v30 = vpop.trf.xlu1  ;;  %1810 = vxpose.xlu0.b32.cont [8/9] (short) %v763_v29, 128  ;;  %v1698_v31 = vpop.trf.xlu0 }
 0x430   : > { %2498 = vst [vmem:[%s2981_s17 + $0xdb0] sm:$0xff] %v1730_v30  ;;  %2418 = vst [vmem:[%s2981_s17 + $0xb30] sm:$0xff] %v1698_v31 }
 0x433   : > { %1843 = vxpose.xlu1.b32.end [9/9] (short) %v772_v32, 128  ;;  %v1731_v34 = vpop.trf.xlu1  ;;  %1811 = vxpose.xlu0.b32.end [9/9] (short) %v771_v33, 128  ;;  %v1699_v35 = vpop.trf.xlu0  ;;  %v712_v32 = vld [vmem:[%s2909_s13 + $0x1028] sm:$0xff]  ;;  %v711_v33 = vld [vmem:[%s2909_s13 + $0x1020] sm:$0xff] }
 0x434   : > { %2503 = vst [vmem:[%s2981_s17 + $0xdd8] sm:$0xff] %v1731_v34  ;;  %2423 = vst [vmem:[%s2981_s17 + $0xb58] sm:$0xff] %v1699_v35 }
 0x437   : > { %v1732_v36 = vpop.trf.xlu1  ;;  %v1700_v37 = vpop.trf.xlu0 }
 0x438   : > { %2508 = vst [vmem:[%s2981_s17 + $0xe00] sm:$0xff] %v1732_v36  ;;  %2428 = vst [vmem:[%s2981_s17 + $0xb80] sm:$0xff] %v1700_v37  ;;  %v720_v36 = vld [vmem:[%s2909_s13 + $0x1068] sm:$0xff]  ;;  %v719_v37 = vld [vmem:[%s2909_s13 + $0x1060] sm:$0xff] }
 0x43b   : > { %v1733_v38 = vpop.trf.xlu1  ;;  %v1701_v39 = vpop.trf.xlu0 }
 0x43c   : > { %2513 = vst [vmem:[%s2981_s17 + $0xe28] sm:$0xff] %v1733_v38  ;;  %2433 = vst [vmem:[%s2981_s17 + $0xba8] sm:$0xff] %v1701_v39 }
 0x43f   : > { %v1734_v40 = vpop.trf.xlu1  ;;  %v1702_v41 = vpop.trf.xlu0 }
 0x440   : > { %2518 = vst [vmem:[%s2981_s17 + $0xe50] sm:$0xff] %v1734_v40  ;;  %2438 = vst [vmem:[%s2981_s17 + $0xbd0] sm:$0xff] %v1702_v41  ;;  %v728_v40 = vld [vmem:[%s2909_s13 + $0x10a8] sm:$0xff]  ;;  %v727_v41 = vld [vmem:[%s2909_s13 + $0x10a0] sm:$0xff] }
 0x443   : > { %v1735_v42 = vpop.trf.xlu1  ;;  %v1703_v43 = vpop.trf.xlu0 }
 0x444   : > { %2523 = vst [vmem:[%s2981_s17 + $0xe78] sm:$0xff] %v1735_v42  ;;  %2443 = vst [vmem:[%s2981_s17 + $0xbf8] sm:$0xff] %v1703_v43 }
 0x447   : > { %v1736_v44 = vpop.trf.xlu1  ;;  %v1704_v45 = vpop.trf.xlu0 }
 0x448   : > { %2528 = vst [vmem:[%s2981_s17 + $0xea0] sm:$0xff] %v1736_v44  ;;  %2448 = vst [vmem:[%s2981_s17 + $0xc20] sm:$0xff] %v1704_v45  ;;  %v736_v44 = vld [vmem:[%s2909_s13 + $0x10e8] sm:$0xff]  ;;  %v735_v45 = vld [vmem:[%s2909_s13 + $0x10e0] sm:$0xff] }
 0x44b   : > { %v1737_v46 = vpop.trf.xlu1  ;;  %v1705_v47 = vpop.trf.xlu0 }
 0x44c   : > { %2533 = vst [vmem:[%s2981_s17 + $0xec8] sm:$0xff] %v1737_v46  ;;  %2453 = vst [vmem:[%s2981_s17 + $0xc48] sm:$0xff] %v1705_v47 }
 0x44f   : > { %v1738_v50 = vpop.trf.xlu1  ;;  %v1706_v51 = vpop.trf.xlu0 }
 0x450   : > { %2538 = vst [vmem:[%s2981_s17 + $0xef0] sm:$0xff] %v1738_v50  ;;  %2458 = vst [vmem:[%s2981_s17 + $0xc70] sm:$0xff] %v1706_v51  ;;  %1899 = vxpose.xlu1.b32.start [1/9] (short) %v710_v48, 128  ;;  %1867 = vxpose.xlu0.b32.start [1/9] (short) %v709_v49, 128  ;;  %v744_v48 = vld [vmem:[%s2909_s13 + $0x1128] sm:$0xff]  ;;  %v743_v49 = vld [vmem:[%s2909_s13 + $0x1120] sm:$0xff] }
 0x453   : > { %v1787_v54 = vpop.trf.xlu1  ;;  %v1755_v55 = vpop.trf.xlu0 }
 0x454   : > { %2623 = vst [vmem:[%s2981_s17 + $0x1198] sm:$0xff] %v1787_v54  ;;  %2543 = vst [vmem:[%s2981_s17 + $0xf18] sm:$0xff] %v1755_v55  ;;  %1900 = vxpose.xlu1.b32.cont [2/9] (short) %v718_v52, 128  ;;  %1868 = vxpose.xlu0.b32.cont [2/9] (short) %v717_v53, 128  ;;  %v752_v52 = vld [vmem:[%s2909_s13 + $0x1168] sm:$0xff]  ;;  %v751_v53 = vld [vmem:[%s2909_s13 + $0x1160] sm:$0xff] }
 0x457   : > { %v1788_v58 = vpop.trf.xlu1  ;;  %v1756_v59 = vpop.trf.xlu0 }
 0x458   : > { %2628 = vst [vmem:[%s2981_s17 + $0x11c0] sm:$0xff] %v1788_v58  ;;  %2548 = vst [vmem:[%s2981_s17 + $0xf40] sm:$0xff] %v1756_v59  ;;  %1901 = vxpose.xlu1.b32.cont [3/9] (short) %v726_v56, 128  ;;  %1869 = vxpose.xlu0.b32.cont [3/9] (short) %v725_v57, 128  ;;  %v760_v56 = vld [vmem:[%s2909_s13 + $0x11a8] sm:$0xff]  ;;  %v759_v57 = vld [vmem:[%s2909_s13 + $0x11a0] sm:$0xff] }
 0x45b   : > { %v1789_v62 = vpop.trf.xlu1  ;;  %v1757_v63 = vpop.trf.xlu0 }
 0x45c   : > { %2633 = vst [vmem:[%s2981_s17 + $0x11e8] sm:$0xff] %v1789_v62  ;;  %2553 = vst [vmem:[%s2981_s17 + $0xf68] sm:$0xff] %v1757_v63  ;;  %1902 = vxpose.xlu1.b32.cont [4/9] (short) %v734_v60, 128  ;;  %1870 = vxpose.xlu0.b32.cont [4/9] (short) %v733_v61, 128  ;;  %v768_v60 = vld [vmem:[%s2909_s13 + $0x11e8] sm:$0xff]  ;;  %v767_v61 = vld [vmem:[%s2909_s13 + $0x11e0] sm:$0xff] }
 0x45f   : > { %v1790_v2 = vpop.trf.xlu1  ;;  %v1758_v3 = vpop.trf.xlu0 }
 0x460   : > { %2638 = vst [vmem:[%s2981_s17 + $0x1210] sm:$0xff] %v1790_v2  ;;  %2558 = vst [vmem:[%s2981_s17 + $0xf90] sm:$0xff] %v1758_v3  ;;  %1903 = vxpose.xlu1.b32.cont [5/9] (short) %v742_v0, 128  ;;  %1871 = vxpose.xlu0.b32.cont [5/9] (short) %v741_v1, 128  ;;  %v776_v0 = vld [vmem:[%s2909_s13 + $0x1228] sm:$0x1]  ;;  %v775_v1 = vld [vmem:[%s2909_s13 + $0x1220] sm:$0x1] }
 0x463   : > { %v1791_v6 = vpop.trf.xlu1  ;;  %v1759_v7 = vpop.trf.xlu0 }
 0x464   : > { %2643 = vst [vmem:[%s2981_s17 + $0x1238] sm:$0xff] %v1791_v6  ;;  %2563 = vst [vmem:[%s2981_s17 + $0xfb8] sm:$0xff] %v1759_v7  ;;  %1904 = vxpose.xlu1.b32.cont [6/9] (short) %v750_v4, 128  ;;  %1872 = vxpose.xlu0.b32.cont [6/9] (short) %v749_v5, 128 }
 0x467   : > { %v1792_v10 = vpop.trf.xlu1  ;;  %v1760_v11 = vpop.trf.xlu0 }
 0x468   : > { %2648 = vst [vmem:[%s2981_s17 + $0x1260] sm:$0xff] %v1792_v10  ;;  %2568 = vst [vmem:[%s2981_s17 + $0xfe0] sm:$0xff] %v1760_v11  ;;  %1905 = vxpose.xlu1.b32.cont [7/9] (short) %v758_v8, 128  ;;  %1873 = vxpose.xlu0.b32.cont [7/9] (short) %v757_v9, 128 }
 0x46b   : > { %v1793_v14 = vpop.trf.xlu1  ;;  %v1761_v15 = vpop.trf.xlu0 }
 0x46c   : > { %2653 = vst [vmem:[%s2981_s17 + $0x1288] sm:$0xff] %v1793_v14  ;;  %2573 = vst [vmem:[%s2981_s17 + $0x1008] sm:$0xff] %v1761_v15  ;;  %1906 = vxpose.xlu1.b32.cont [8/9] (short) %v766_v12, 128  ;;  %1874 = vxpose.xlu0.b32.cont [8/9] (short) %v765_v13, 128 }
 0x46f   : > { %v1794_v18 = vpop.trf.xlu1  ;;  %v1762_v19 = vpop.trf.xlu0 }
 0x470   : > { %2658 = vst [vmem:[%s2981_s17 + $0x12b0] sm:$0xff] %v1794_v18  ;;  %2578 = vst [vmem:[%s2981_s17 + $0x1030] sm:$0xff] %v1762_v19  ;;  %1907 = vxpose.xlu1.b32.end [9/9] (short) %v774_v16, 128  ;;  %1875 = vxpose.xlu0.b32.end [9/9] (short) %v773_v17, 128  ;;  %v714_v18 = vld [vmem:[%s2909_s13 + $0x1038] sm:$0xff]  ;;  %v713_v19 = vld [vmem:[%s2909_s13 + $0x1030] sm:$0xff] }
 0x473   : > { %v1795_v20 = vpop.trf.xlu1  ;;  %v1763_v21 = vpop.trf.xlu0 }
 0x474   : > { %2663 = vst [vmem:[%s2981_s17 + $0x12d8] sm:$0xff] %v1795_v20  ;;  %2583 = vst [vmem:[%s2981_s17 + $0x1058] sm:$0xff] %v1763_v21 }
 0x477   : > { %v1796_v22 = vpop.trf.xlu1  ;;  %v1764_v23 = vpop.trf.xlu0 }
 0x478   : > { %2668 = vst [vmem:[%s2981_s17 + $0x1300] sm:$0xff] %v1796_v22  ;;  %2588 = vst [vmem:[%s2981_s17 + $0x1080] sm:$0xff] %v1764_v23  ;;  %v722_v22 = vld [vmem:[%s2909_s13 + $0x1078] sm:$0xff]  ;;  %v721_v23 = vld [vmem:[%s2909_s13 + $0x1070] sm:$0xff] }
 0x47b   : > { %v1797_v24 = vpop.trf.xlu1  ;;  %v1765_v25 = vpop.trf.xlu0 }
 0x47c   : > { %2673 = vst [vmem:[%s2981_s17 + $0x1328] sm:$0xff] %v1797_v24  ;;  %2593 = vst [vmem:[%s2981_s17 + $0x10a8] sm:$0xff] %v1765_v25 }
 0x47f   : > { %v1798_v26 = vpop.trf.xlu1  ;;  %v1766_v27 = vpop.trf.xlu0 }
 0x480   : > { %2678 = vst [vmem:[%s2981_s17 + $0x1350] sm:$0xff] %v1798_v26  ;;  %2598 = vst [vmem:[%s2981_s17 + $0x10d0] sm:$0xff] %v1766_v27  ;;  %v730_v26 = vld [vmem:[%s2909_s13 + $0x10b8] sm:$0xff]  ;;  %v729_v27 = vld [vmem:[%s2909_s13 + $0x10b0] sm:$0xff] }
 0x483   : > { %v1799_v28 = vpop.trf.xlu1  ;;  %v1767_v29 = vpop.trf.xlu0 }
 0x484   : > { %2683 = vst [vmem:[%s2981_s17 + $0x1378] sm:$0xff] %v1799_v28  ;;  %2603 = vst [vmem:[%s2981_s17 + $0x10f8] sm:$0xff] %v1767_v29 }
 0x487   : > { %v1800_v30 = vpop.trf.xlu1  ;;  %v1768_v31 = vpop.trf.xlu0 }
 0x488   : > { %2688 = vst [vmem:[%s2981_s17 + $0x13a0] sm:$0xff] %v1800_v30  ;;  %2608 = vst [vmem:[%s2981_s17 + $0x1120] sm:$0xff] %v1768_v31  ;;  %v738_v30 = vld [vmem:[%s2909_s13 + $0x10f8] sm:$0xff]  ;;  %v737_v31 = vld [vmem:[%s2909_s13 + $0x10f0] sm:$0xff] }
 0x48b   : > { %v1801_v34 = vpop.trf.xlu1  ;;  %v1769_v35 = vpop.trf.xlu0 }
 0x48c   : > { %2693 = vst [vmem:[%s2981_s17 + $0x13c8] sm:$0xff] %v1801_v34  ;;  %2613 = vst [vmem:[%s2981_s17 + $0x1148] sm:$0xff] %v1769_v35  ;;  %v746_v34 = vld [vmem:[%s2909_s13 + $0x1138] sm:$0xff]  ;;  %v745_v35 = vld [vmem:[%s2909_s13 + $0x1130] sm:$0xff] }
 0x48d   : > { %1963 = vxpose.xlu1.b32.start [1/9] (short) %v712_v32, 128  ;;  %1931 = vxpose.xlu0.b32.start [1/9] (short) %v711_v33, 128 }
 0x48f   : > { %v1802_v38 = vpop.trf.xlu1  ;;  %v1770_v39 = vpop.trf.xlu0 }
 0x490   : > { %2698 = vst [vmem:[%s2981_s17 + $0x13f0] sm:$0xff] %v1802_v38  ;;  %2618 = vst [vmem:[%s2981_s17 + $0x1170] sm:$0xff] %v1770_v39  ;;  %v754_v38 = vld [vmem:[%s2909_s13 + $0x1178] sm:$0xff]  ;;  %v753_v39 = vld [vmem:[%s2909_s13 + $0x1170] sm:$0xff] }
 0x491   : > { %1964 = vxpose.xlu1.b32.cont [2/9] (short) %v720_v36, 128  ;;  %1932 = vxpose.xlu0.b32.cont [2/9] (short) %v719_v37, 128 }
 0x493   : > { %v1851_v42 = vpop.trf.xlu1  ;;  %v1819_v43 = vpop.trf.xlu0 }
 0x494   : > { %2144 = vst.msk [vmem:[%s2981_s17 + $0x2a0] sm:$0xff] %vm2063_vm0, %v1851_v42  ;;  %2064 = vst.msk [vmem:[%s2981_s17 + $0x20] sm:$0xff] %vm2063_vm0, %v1819_v43  ;;  %v762_v42 = vld [vmem:[%s2909_s13 + $0x11b8] sm:$0xff]  ;;  %v761_v43 = vld [vmem:[%s2909_s13 + $0x11b0] sm:$0xff] }
 0x495   : > { %1965 = vxpose.xlu1.b32.cont [3/9] (short) %v728_v40, 128  ;;  %1933 = vxpose.xlu0.b32.cont [3/9] (short) %v727_v41, 128 }
 0x497   : > { %v1852_v46 = vpop.trf.xlu1  ;;  %v1820_v47 = vpop.trf.xlu0 }
 0x498   : > { %2149 = vst.msk [vmem:[%s2981_s17 + $0x2c8] sm:$0xff] %vm2063_vm0, %v1852_v46  ;;  %2069 = vst.msk [vmem:[%s2981_s17 + $0x48] sm:$0xff] %vm2063_vm0, %v1820_v47  ;;  %v770_v46 = vld [vmem:[%s2909_s13 + $0x11f8] sm:$0xff]  ;;  %v769_v47 = vld [vmem:[%s2909_s13 + $0x11f0] sm:$0xff] }
 0x499   : > { %1966 = vxpose.xlu1.b32.cont [4/9] (short) %v736_v44, 128  ;;  %1934 = vxpose.xlu0.b32.cont [4/9] (short) %v735_v45, 128 }
 0x49b   : > { %v1853_v50 = vpop.trf.xlu1  ;;  %v1821_v51 = vpop.trf.xlu0 }
 0x49c   : > { %2154 = vst.msk [vmem:[%s2981_s17 + $0x2f0] sm:$0xff] %vm2063_vm0, %v1853_v50  ;;  %2074 = vst.msk [vmem:[%s2981_s17 + $0x70] sm:$0xff] %vm2063_vm0, %v1821_v51  ;;  %v778_v50 = vld [vmem:[%s2909_s13 + $0x1238] sm:$0x1]  ;;  %v777_v51 = vld [vmem:[%s2909_s13 + $0x1230] sm:$0x1] }
 0x49d   : > { %1967 = vxpose.xlu1.b32.cont [5/9] (short) %v744_v48, 128  ;;  %1935 = vxpose.xlu0.b32.cont [5/9] (short) %v743_v49, 128 }
 0x49f   : > { %v1854_v54 = vpop.trf.xlu1  ;;  %v1822_v55 = vpop.trf.xlu0 }
 0x4a0   : > { %2159 = vst.msk [vmem:[%s2981_s17 + $0x318] sm:$0xff] %vm2063_vm0, %v1854_v54  ;;  %2079 = vst.msk [vmem:[%s2981_s17 + $0x98] sm:$0xff] %vm2063_vm0, %v1822_v55 }
 0x4a1   : > { %1968 = vxpose.xlu1.b32.cont [6/9] (short) %v752_v52, 128  ;;  %1936 = vxpose.xlu0.b32.cont [6/9] (short) %v751_v53, 128 }
 0x4a3   : > { %v1855_v58 = vpop.trf.xlu1  ;;  %v1823_v59 = vpop.trf.xlu0 }
 0x4a4   : > { %2164 = vst.msk [vmem:[%s2981_s17 + $0x340] sm:$0xff] %vm2063_vm0, %v1855_v58  ;;  %2084 = vst.msk [vmem:[%s2981_s17 + $0xc0] sm:$0xff] %vm2063_vm0, %v1823_v59 }
 0x4a5   : > { %1969 = vxpose.xlu1.b32.cont [7/9] (short) %v760_v56, 128  ;;  %1937 = vxpose.xlu0.b32.cont [7/9] (short) %v759_v57, 128 }
 0x4a7   : > { %v1856_v62 = vpop.trf.xlu1  ;;  %v1824_v63 = vpop.trf.xlu0 }
 0x4a8   : > { %2169 = vst.msk [vmem:[%s2981_s17 + $0x368] sm:$0xff] %vm2063_vm0, %v1856_v62  ;;  %2089 = vst.msk [vmem:[%s2981_s17 + $0xe8] sm:$0xff] %vm2063_vm0, %v1824_v63 }
 0x4a9   : > { %1970 = vxpose.xlu1.b32.cont [8/9] (short) %v768_v60, 128  ;;  %1938 = vxpose.xlu0.b32.cont [8/9] (short) %v767_v61, 128 }
 0x4ab   : > { %v1857_v2 = vpop.trf.xlu1  ;;  %v1825_v3 = vpop.trf.xlu0 }
 0x4ac   : > { %2174 = vst.msk [vmem:[%s2981_s17 + $0x390] sm:$0xff] %vm2063_vm0, %v1857_v2  ;;  %2094 = vst.msk [vmem:[%s2981_s17 + $0x110] sm:$0xff] %vm2063_vm0, %v1825_v3 }
 0x4ad   : > { %1971 = vxpose.xlu1.b32.end [9/9] (short) %v776_v0, 128  ;;  %1939 = vxpose.xlu0.b32.end [9/9] (short) %v775_v1, 128 }
 0x4af   : > { %v1858_v4 = vpop.trf.xlu1  ;;  %v1826_v5 = vpop.trf.xlu0 }
 0x4b0   : > { %2179 = vst.msk [vmem:[%s2981_s17 + $0x3b8] sm:$0xff] %vm2063_vm0, %v1858_v4  ;;  %2099 = vst.msk [vmem:[%s2981_s17 + $0x138] sm:$0xff] %vm2063_vm0, %v1826_v5 }
 0x4b3   : > { %v1859_v6 = vpop.trf.xlu1  ;;  %v1827_v7 = vpop.trf.xlu0 }
 0x4b4   : > { %2184 = vst.msk [vmem:[%s2981_s17 + $0x3e0] sm:$0xff] %vm2063_vm0, %v1859_v6  ;;  %2104 = vst.msk [vmem:[%s2981_s17 + $0x160] sm:$0xff] %vm2063_vm0, %v1827_v7 }
 0x4b7   : > { %v1860_v8 = vpop.trf.xlu1  ;;  %v1828_v9 = vpop.trf.xlu0 }
 0x4b8   : > { %2189 = vst.msk [vmem:[%s2981_s17 + $0x408] sm:$0xff] %vm2063_vm0, %v1860_v8  ;;  %2109 = vst.msk [vmem:[%s2981_s17 + $0x188] sm:$0xff] %vm2063_vm0, %v1828_v9 }
 0x4bb   : > { %v1861_v10 = vpop.trf.xlu1  ;;  %v1829_v11 = vpop.trf.xlu0 }
 0x4bc   : > { %2194 = vst.msk [vmem:[%s2981_s17 + $0x430] sm:$0xff] %vm2063_vm0, %v1861_v10  ;;  %2114 = vst.msk [vmem:[%s2981_s17 + $0x1b0] sm:$0xff] %vm2063_vm0, %v1829_v11 }
 0x4bf   : > { %v1862_v12 = vpop.trf.xlu1  ;;  %v1830_v13 = vpop.trf.xlu0 }
 0x4c0   : > { %2199 = vst.msk [vmem:[%s2981_s17 + $0x458] sm:$0xff] %vm2063_vm0, %v1862_v12  ;;  %2119 = vst.msk [vmem:[%s2981_s17 + $0x1d8] sm:$0xff] %vm2063_vm0, %v1830_v13 }
 0x4c3   : > { %v1863_v14 = vpop.trf.xlu1  ;;  %v1831_v15 = vpop.trf.xlu0 }
 0x4c4   : > { %2204 = vst.msk [vmem:[%s2981_s17 + $0x480] sm:$0xff] %vm2063_vm0, %v1863_v14  ;;  %2124 = vst.msk [vmem:[%s2981_s17 + $0x200] sm:$0xff] %vm2063_vm0, %v1831_v15 }
 0x4c7   : > { %v1864_v16 = vpop.trf.xlu1  ;;  %v1832_v17 = vpop.trf.xlu0 }
 0x4c8   : > { %2209 = vst.msk [vmem:[%s2981_s17 + $0x4a8] sm:$0xff] %vm2063_vm0, %v1864_v16  ;;  %2129 = vst.msk [vmem:[%s2981_s17 + $0x228] sm:$0xff] %vm2063_vm0, %v1832_v17 }
 0x4cb   : > { %v1865_v20 = vpop.trf.xlu1  ;;  %v1833_v21 = vpop.trf.xlu0  ;;  %2027 = vxpose.xlu1.b32.start [1/9] (short) %v714_v18, 128  ;;  %1995 = vxpose.xlu0.b32.start [1/9] (short) %v713_v19, 128 }
 0x4cc   : > { %2214 = vst.msk [vmem:[%s2981_s17 + $0x4d0] sm:$0xff] %vm2063_vm0, %v1865_v20  ;;  %2134 = vst.msk [vmem:[%s2981_s17 + $0x250] sm:$0xff] %vm2063_vm0, %v1833_v21 }
 0x4cf   : > { %v1866_v24 = vpop.trf.xlu1  ;;  %v1834_v25 = vpop.trf.xlu0  ;;  %2028 = vxpose.xlu1.b32.cont [2/9] (short) %v722_v22, 128  ;;  %1996 = vxpose.xlu0.b32.cont [2/9] (short) %v721_v23, 128 }
 0x4d0   : > { %2219 = vst.msk [vmem:[%s2981_s17 + $0x4f8] sm:$0xff] %vm2063_vm0, %v1866_v24  ;;  %2139 = vst.msk [vmem:[%s2981_s17 + $0x278] sm:$0xff] %vm2063_vm0, %v1834_v25 }
 0x4d3   : > { %v1915_v28 = vpop.trf.xlu1  ;;  %v1883_v29 = vpop.trf.xlu0  ;;  %2029 = vxpose.xlu1.b32.cont [3/9] (short) %v730_v26, 128  ;;  %1997 = vxpose.xlu0.b32.cont [3/9] (short) %v729_v27, 128 }
 0x4d4   : > { %2304 = vst.msk [vmem:[%s2981_s17 + $0x7a0] sm:$0xff] %vm2063_vm0, %v1915_v28  ;;  %2224 = vst.msk [vmem:[%s2981_s17 + $0x520] sm:$0xff] %vm2063_vm0, %v1883_v29 }
 0x4d7   : > { %v1916_v32 = vpop.trf.xlu1  ;;  %v1884_v33 = vpop.trf.xlu0  ;;  %2030 = vxpose.xlu1.b32.cont [4/9] (short) %v738_v30, 128  ;;  %1998 = vxpose.xlu0.b32.cont [4/9] (short) %v737_v31, 128 }
 0x4d8   : > { %2309 = vst.msk [vmem:[%s2981_s17 + $0x7c8] sm:$0xff] %vm2063_vm0, %v1916_v32  ;;  %2229 = vst.msk [vmem:[%s2981_s17 + $0x548] sm:$0xff] %vm2063_vm0, %v1884_v33 }
 0x4db   : > { %v1917_v36 = vpop.trf.xlu1  ;;  %v1885_v37 = vpop.trf.xlu0  ;;  %2031 = vxpose.xlu1.b32.cont [5/9] (short) %v746_v34, 128  ;;  %1999 = vxpose.xlu0.b32.cont [5/9] (short) %v745_v35, 128 }
 0x4dc   : > { %2314 = vst.msk [vmem:[%s2981_s17 + $0x7f0] sm:$0xff] %vm2063_vm0, %v1917_v36  ;;  %2234 = vst.msk [vmem:[%s2981_s17 + $0x570] sm:$0xff] %vm2063_vm0, %v1885_v37 }
 0x4df   : > { %v1918_v40 = vpop.trf.xlu1  ;;  %v1886_v41 = vpop.trf.xlu0  ;;  %2032 = vxpose.xlu1.b32.cont [6/9] (short) %v754_v38, 128  ;;  %2000 = vxpose.xlu0.b32.cont [6/9] (short) %v753_v39, 128 }
 0x4e0   : > { %2319 = vst.msk [vmem:[%s2981_s17 + $0x818] sm:$0xff] %vm2063_vm0, %v1918_v40  ;;  %2239 = vst.msk [vmem:[%s2981_s17 + $0x598] sm:$0xff] %vm2063_vm0, %v1886_v41 }
 0x4e3   : > { %v1919_v44 = vpop.trf.xlu1  ;;  %v1887_v45 = vpop.trf.xlu0  ;;  %2033 = vxpose.xlu1.b32.cont [7/9] (short) %v762_v42, 128  ;;  %2001 = vxpose.xlu0.b32.cont [7/9] (short) %v761_v43, 128 }
 0x4e4   : > { %2324 = vst.msk [vmem:[%s2981_s17 + $0x840] sm:$0xff] %vm2063_vm0, %v1919_v44  ;;  %2244 = vst.msk [vmem:[%s2981_s17 + $0x5c0] sm:$0xff] %vm2063_vm0, %v1887_v45 }
 0x4e7   : > { %v1920_v48 = vpop.trf.xlu1  ;;  %v1888_v49 = vpop.trf.xlu0  ;;  %2034 = vxpose.xlu1.b32.cont [8/9] (short) %v770_v46, 128  ;;  %2002 = vxpose.xlu0.b32.cont [8/9] (short) %v769_v47, 128 }
 0x4e8   : > { %2329 = vst.msk [vmem:[%s2981_s17 + $0x868] sm:$0xff] %vm2063_vm0, %v1920_v48  ;;  %2249 = vst.msk [vmem:[%s2981_s17 + $0x5e8] sm:$0xff] %vm2063_vm0, %v1888_v49 }
 0x4eb   : > { %v1921_v52 = vpop.trf.xlu1  ;;  %v1889_v53 = vpop.trf.xlu0  ;;  %2035 = vxpose.xlu1.b32.end [9/9] (short) %v778_v50, 128  ;;  %2003 = vxpose.xlu0.b32.end [9/9] (short) %v777_v51, 128 }
 0x4ec   : > { %2334 = vst.msk [vmem:[%s2981_s17 + $0x890] sm:$0xff] %vm2063_vm0, %v1921_v52  ;;  %2254 = vst.msk [vmem:[%s2981_s17 + $0x610] sm:$0xff] %vm2063_vm0, %v1889_v53 }
 0x4ef   : > { %v1922_v54 = vpop.trf.xlu1  ;;  %v1890_v55 = vpop.trf.xlu0 }
 0x4f0   : > { %2339 = vst.msk [vmem:[%s2981_s17 + $0x8b8] sm:$0xff] %vm2063_vm0, %v1922_v54  ;;  %2259 = vst.msk [vmem:[%s2981_s17 + $0x638] sm:$0xff] %vm2063_vm0, %v1890_v55 }
 0x4f3   : > { %v1923_v56 = vpop.trf.xlu1  ;;  %v1891_v57 = vpop.trf.xlu0 }
 0x4f4   : > { %2344 = vst.msk [vmem:[%s2981_s17 + $0x8e0] sm:$0xff] %vm2063_vm0, %v1923_v56  ;;  %2264 = vst.msk [vmem:[%s2981_s17 + $0x660] sm:$0xff] %vm2063_vm0, %v1891_v57 }
 0x4f7   : > { %v1924_v58 = vpop.trf.xlu1  ;;  %v1892_v59 = vpop.trf.xlu0 }
 0x4f8   : > { %2349 = vst.msk [vmem:[%s2981_s17 + $0x908] sm:$0xff] %vm2063_vm0, %v1924_v58  ;;  %2269 = vst.msk [vmem:[%s2981_s17 + $0x688] sm:$0xff] %vm2063_vm0, %v1892_v59 }
 0x4fb   : > { %v1925_v60 = vpop.trf.xlu1  ;;  %v1893_v61 = vpop.trf.xlu0 }
 0x4fc   : > { %2354 = vst.msk [vmem:[%s2981_s17 + $0x930] sm:$0xff] %vm2063_vm0, %v1925_v60  ;;  %2274 = vst.msk [vmem:[%s2981_s17 + $0x6b0] sm:$0xff] %vm2063_vm0, %v1893_v61 }
 0x4ff   : > { %v1926_v62 = vpop.trf.xlu1  ;;  %v1894_v63 = vpop.trf.xlu0 }
 0x500   : > { %2359 = vst.msk [vmem:[%s2981_s17 + $0x958] sm:$0xff] %vm2063_vm0, %v1926_v62  ;;  %2279 = vst.msk [vmem:[%s2981_s17 + $0x6d8] sm:$0xff] %vm2063_vm0, %v1894_v63 }
 0x503   : > { %v1927_v0 = vpop.trf.xlu1  ;;  %v1895_v1 = vpop.trf.xlu0 }
 0x504   : > { %2364 = vst.msk [vmem:[%s2981_s17 + $0x980] sm:$0xff] %vm2063_vm0, %v1927_v0  ;;  %2284 = vst.msk [vmem:[%s2981_s17 + $0x700] sm:$0xff] %vm2063_vm0, %v1895_v1 }
 0x507   : > { %v1928_v2 = vpop.trf.xlu1  ;;  %v1896_v3 = vpop.trf.xlu0 }
 0x508   : > { %2369 = vst.msk [vmem:[%s2981_s17 + $0x9a8] sm:$0xff] %vm2063_vm0, %v1928_v2  ;;  %2289 = vst.msk [vmem:[%s2981_s17 + $0x728] sm:$0xff] %vm2063_vm0, %v1896_v3 }
 0x50b   : > { %v1929_v4 = vpop.trf.xlu1  ;;  %v1897_v5 = vpop.trf.xlu0 }
 0x50c   : > { %2374 = vst.msk [vmem:[%s2981_s17 + $0x9d0] sm:$0xff] %vm2063_vm0, %v1929_v4  ;;  %2294 = vst.msk [vmem:[%s2981_s17 + $0x750] sm:$0xff] %vm2063_vm0, %v1897_v5 }
 0x50f   : > { %v1930_v6 = vpop.trf.xlu1  ;;  %v1898_v7 = vpop.trf.xlu0 }
 0x510   : > { %2379 = vst.msk [vmem:[%s2981_s17 + $0x9f8] sm:$0xff] %vm2063_vm0, %v1930_v6  ;;  %2299 = vst.msk [vmem:[%s2981_s17 + $0x778] sm:$0xff] %vm2063_vm0, %v1898_v7 }
 0x513   : > { %v1979_v8 = vpop.trf.xlu1  ;;  %v1947_v9 = vpop.trf.xlu0 }
 0x514   : > { %2464 = vst.msk [vmem:[%s2981_s17 + $0xca0] sm:$0xff] %vm2063_vm0, %v1979_v8  ;;  %2384 = vst.msk [vmem:[%s2981_s17 + $0xa20] sm:$0xff] %vm2063_vm0, %v1947_v9 }
 0x517   : > { %v1980_v10 = vpop.trf.xlu1  ;;  %v1948_v11 = vpop.trf.xlu0 }
 0x518   : > { %2469 = vst.msk [vmem:[%s2981_s17 + $0xcc8] sm:$0xff] %vm2063_vm0, %v1980_v10  ;;  %2389 = vst.msk [vmem:[%s2981_s17 + $0xa48] sm:$0xff] %vm2063_vm0, %v1948_v11 }
 0x51b   : > { %v1981_v12 = vpop.trf.xlu1  ;;  %v1949_v13 = vpop.trf.xlu0 }
 0x51c   : > { %2474 = vst.msk [vmem:[%s2981_s17 + $0xcf0] sm:$0xff] %vm2063_vm0, %v1981_v12  ;;  %2394 = vst.msk [vmem:[%s2981_s17 + $0xa70] sm:$0xff] %vm2063_vm0, %v1949_v13 }
 0x51f   : > { %v1982_v14 = vpop.trf.xlu1  ;;  %v1950_v15 = vpop.trf.xlu0 }
 0x520   : > { %2479 = vst.msk [vmem:[%s2981_s17 + $0xd18] sm:$0xff] %vm2063_vm0, %v1982_v14  ;;  %2399 = vst.msk [vmem:[%s2981_s17 + $0xa98] sm:$0xff] %vm2063_vm0, %v1950_v15 }
 0x523   : > { %v1983_v16 = vpop.trf.xlu1  ;;  %v1951_v17 = vpop.trf.xlu0 }
 0x524   : > { %2484 = vst.msk [vmem:[%s2981_s17 + $0xd40] sm:$0xff] %vm2063_vm0, %v1983_v16  ;;  %2404 = vst.msk [vmem:[%s2981_s17 + $0xac0] sm:$0xff] %vm2063_vm0, %v1951_v17 }
 0x527   : > { %v1984_v18 = vpop.trf.xlu1  ;;  %v1952_v19 = vpop.trf.xlu0 }
 0x528   : > { %2489 = vst.msk [vmem:[%s2981_s17 + $0xd68] sm:$0xff] %vm2063_vm0, %v1984_v18  ;;  %2409 = vst.msk [vmem:[%s2981_s17 + $0xae8] sm:$0xff] %vm2063_vm0, %v1952_v19 }
 0x52b   : > { %v1985_v20 = vpop.trf.xlu1  ;;  %v1953_v21 = vpop.trf.xlu0 }
 0x52c   : > { %2494 = vst.msk [vmem:[%s2981_s17 + $0xd90] sm:$0xff] %vm2063_vm0, %v1985_v20  ;;  %2414 = vst.msk [vmem:[%s2981_s17 + $0xb10] sm:$0xff] %vm2063_vm0, %v1953_v21 }
 0x52f   : > { %v1986_v22 = vpop.trf.xlu1  ;;  %v1954_v23 = vpop.trf.xlu0 }
 0x530   : > { %2499 = vst.msk [vmem:[%s2981_s17 + $0xdb8] sm:$0xff] %vm2063_vm0, %v1986_v22  ;;  %2419 = vst.msk [vmem:[%s2981_s17 + $0xb38] sm:$0xff] %vm2063_vm0, %v1954_v23 }
 0x533   : > { %v1987_v24 = vpop.trf.xlu1  ;;  %v1955_v25 = vpop.trf.xlu0 }
 0x534   : > { %2504 = vst.msk [vmem:[%s2981_s17 + $0xde0] sm:$0xff] %vm2063_vm0, %v1987_v24  ;;  %2424 = vst.msk [vmem:[%s2981_s17 + $0xb60] sm:$0xff] %vm2063_vm0, %v1955_v25 }
 0x537   : > { %v1988_v26 = vpop.trf.xlu1  ;;  %v1956_v27 = vpop.trf.xlu0 }
 0x538   : > { %2509 = vst.msk [vmem:[%s2981_s17 + $0xe08] sm:$0xff] %vm2063_vm0, %v1988_v26  ;;  %2429 = vst.msk [vmem:[%s2981_s17 + $0xb88] sm:$0xff] %vm2063_vm0, %v1956_v27 }
 0x53b   : > { %v1989_v28 = vpop.trf.xlu1  ;;  %v1957_v29 = vpop.trf.xlu0 }
 0x53c   : > { %2514 = vst.msk [vmem:[%s2981_s17 + $0xe30] sm:$0xff] %vm2063_vm0, %v1989_v28  ;;  %2434 = vst.msk [vmem:[%s2981_s17 + $0xbb0] sm:$0xff] %vm2063_vm0, %v1957_v29 }
 0x53f   : > { %v1990_v30 = vpop.trf.xlu1  ;;  %v1958_v31 = vpop.trf.xlu0 }
 0x540   : > { %2519 = vst.msk [vmem:[%s2981_s17 + $0xe58] sm:$0xff] %vm2063_vm0, %v1990_v30  ;;  %2439 = vst.msk [vmem:[%s2981_s17 + $0xbd8] sm:$0xff] %vm2063_vm0, %v1958_v31 }
 0x543   : > { %v1991_v32 = vpop.trf.xlu1  ;;  %v1959_v33 = vpop.trf.xlu0 }
 0x544   : > { %2524 = vst.msk [vmem:[%s2981_s17 + $0xe80] sm:$0xff] %vm2063_vm0, %v1991_v32  ;;  %2444 = vst.msk [vmem:[%s2981_s17 + $0xc00] sm:$0xff] %vm2063_vm0, %v1959_v33 }
 0x547   : > { %v1992_v34 = vpop.trf.xlu1  ;;  %v1960_v35 = vpop.trf.xlu0 }
 0x548   : > { %2529 = vst.msk [vmem:[%s2981_s17 + $0xea8] sm:$0xff] %vm2063_vm0, %v1992_v34  ;;  %2449 = vst.msk [vmem:[%s2981_s17 + $0xc28] sm:$0xff] %vm2063_vm0, %v1960_v35 }
 0x54b   : > { %v1993_v36 = vpop.trf.xlu1  ;;  %v1961_v37 = vpop.trf.xlu0 }
 0x54c   : > { %2534 = vst.msk [vmem:[%s2981_s17 + $0xed0] sm:$0xff] %vm2063_vm0, %v1993_v36  ;;  %2454 = vst.msk [vmem:[%s2981_s17 + $0xc50] sm:$0xff] %vm2063_vm0, %v1961_v37 }
 0x54f   : > { %v1994_v38 = vpop.trf.xlu1  ;;  %v1962_v39 = vpop.trf.xlu0 }
 0x550   : > { %2539 = vst.msk [vmem:[%s2981_s17 + $0xef8] sm:$0xff] %vm2063_vm0, %v1994_v38  ;;  %2459 = vst.msk [vmem:[%s2981_s17 + $0xc78] sm:$0xff] %vm2063_vm0, %v1962_v39 }
 0x553   : > { %v2043_v40 = vpop.trf.xlu1  ;;  %v2011_v41 = vpop.trf.xlu0 }
 0x554   : > { %2624 = vst.msk [vmem:[%s2981_s17 + $0x11a0] sm:$0xff] %vm2063_vm0, %v2043_v40  ;;  %2544 = vst.msk [vmem:[%s2981_s17 + $0xf20] sm:$0xff] %vm2063_vm0, %v2011_v41 }
 0x557   : > { %v2044_v42 = vpop.trf.xlu1  ;;  %v2012_v43 = vpop.trf.xlu0 }
 0x558   : > { %2629 = vst.msk [vmem:[%s2981_s17 + $0x11c8] sm:$0xff] %vm2063_vm0, %v2044_v42  ;;  %2549 = vst.msk [vmem:[%s2981_s17 + $0xf48] sm:$0xff] %vm2063_vm0, %v2012_v43 }
 0x55b   : > { %v2045_v44 = vpop.trf.xlu1  ;;  %v2013_v45 = vpop.trf.xlu0 }
 0x55c   : > { %2634 = vst.msk [vmem:[%s2981_s17 + $0x11f0] sm:$0xff] %vm2063_vm0, %v2045_v44  ;;  %2554 = vst.msk [vmem:[%s2981_s17 + $0xf70] sm:$0xff] %vm2063_vm0, %v2013_v45 }
 0x55f   : > { %v2046_v46 = vpop.trf.xlu1  ;;  %v2014_v47 = vpop.trf.xlu0 }
 0x560   : > { %2639 = vst.msk [vmem:[%s2981_s17 + $0x1218] sm:$0xff] %vm2063_vm0, %v2046_v46  ;;  %2559 = vst.msk [vmem:[%s2981_s17 + $0xf98] sm:$0xff] %vm2063_vm0, %v2014_v47 }
 0x563   : > { %v2047_v48 = vpop.trf.xlu1  ;;  %v2015_v49 = vpop.trf.xlu0 }
 0x564   : > { %2644 = vst.msk [vmem:[%s2981_s17 + $0x1240] sm:$0xff] %vm2063_vm0, %v2047_v48  ;;  %2564 = vst.msk [vmem:[%s2981_s17 + $0xfc0] sm:$0xff] %vm2063_vm0, %v2015_v49 }
 0x567   : > { %v2048_v50 = vpop.trf.xlu1  ;;  %v2016_v51 = vpop.trf.xlu0 }
 0x568   : > { %2649 = vst.msk [vmem:[%s2981_s17 + $0x1268] sm:$0xff] %vm2063_vm0, %v2048_v50  ;;  %2569 = vst.msk [vmem:[%s2981_s17 + $0xfe8] sm:$0xff] %vm2063_vm0, %v2016_v51 }
 0x56b   : > { %v2049_v52 = vpop.trf.xlu1  ;;  %v2017_v53 = vpop.trf.xlu0 }
 0x56c   : > { %2654 = vst.msk [vmem:[%s2981_s17 + $0x1290] sm:$0xff] %vm2063_vm0, %v2049_v52  ;;  %2574 = vst.msk [vmem:[%s2981_s17 + $0x1010] sm:$0xff] %vm2063_vm0, %v2017_v53 }
 0x56f   : > { %v2050_v54 = vpop.trf.xlu1  ;;  %v2018_v55 = vpop.trf.xlu0 }
 0x570   : > { %2659 = vst.msk [vmem:[%s2981_s17 + $0x12b8] sm:$0xff] %vm2063_vm0, %v2050_v54  ;;  %2579 = vst.msk [vmem:[%s2981_s17 + $0x1038] sm:$0xff] %vm2063_vm0, %v2018_v55 }
 0x573   : > { %v2051_v56 = vpop.trf.xlu1  ;;  %v2019_v57 = vpop.trf.xlu0 }
 0x574   : > { %2664 = vst.msk [vmem:[%s2981_s17 + $0x12e0] sm:$0xff] %vm2063_vm0, %v2051_v56  ;;  %2584 = vst.msk [vmem:[%s2981_s17 + $0x1060] sm:$0xff] %vm2063_vm0, %v2019_v57 }
 0x577   : > { %v2052_v58 = vpop.trf.xlu1  ;;  %v2020_v59 = vpop.trf.xlu0 }
 0x578   : > { %2669 = vst.msk [vmem:[%s2981_s17 + $0x1308] sm:$0xff] %vm2063_vm0, %v2052_v58  ;;  %2589 = vst.msk [vmem:[%s2981_s17 + $0x1088] sm:$0xff] %vm2063_vm0, %v2020_v59 }
 0x57b   : > { %v2053_v60 = vpop.trf.xlu1  ;;  %v2021_v61 = vpop.trf.xlu0 }
 0x57c   : > { %2674 = vst.msk [vmem:[%s2981_s17 + $0x1330] sm:$0xff] %vm2063_vm0, %v2053_v60  ;;  %2594 = vst.msk [vmem:[%s2981_s17 + $0x10b0] sm:$0xff] %vm2063_vm0, %v2021_v61 }
 0x57f   : > { %v2054_v62 = vpop.trf.xlu1  ;;  %v2022_v63 = vpop.trf.xlu0 }
 0x580   : > { %2679 = vst.msk [vmem:[%s2981_s17 + $0x1358] sm:$0xff] %vm2063_vm0, %v2054_v62  ;;  %2599 = vst.msk [vmem:[%s2981_s17 + $0x10d8] sm:$0xff] %vm2063_vm0, %v2022_v63 }
 0x583   : > { %v2055_v0 = vpop.trf.xlu1  ;;  %v2023_v1 = vpop.trf.xlu0 }
 0x584   : > { %2684 = vst.msk [vmem:[%s2981_s17 + $0x1380] sm:$0xff] %vm2063_vm0, %v2055_v0  ;;  %2604 = vst.msk [vmem:[%s2981_s17 + $0x1100] sm:$0xff] %vm2063_vm0, %v2023_v1 }
 0x587   : > { %v2056_v2 = vpop.trf.xlu1  ;;  %v2024_v3 = vpop.trf.xlu0 }
 0x588   : > { %2689 = vst.msk [vmem:[%s2981_s17 + $0x13a8] sm:$0xff] %vm2063_vm0, %v2056_v2  ;;  %2609 = vst.msk [vmem:[%s2981_s17 + $0x1128] sm:$0xff] %vm2063_vm0, %v2024_v3 }
 0x58b   : > { %v2057_v4 = vpop.trf.xlu1  ;;  %v2025_v5 = vpop.trf.xlu0 }
 0x58c   : > { %2694 = vst.msk [vmem:[%s2981_s17 + $0x13d0] sm:$0xff] %vm2063_vm0, %v2057_v4  ;;  %2614 = vst.msk [vmem:[%s2981_s17 + $0x1150] sm:$0xff] %vm2063_vm0, %v2025_v5 }
 0x58f   : > { %v2058_v6 = vpop.trf.xlu1  ;;  %v2026_v7 = vpop.trf.xlu0 }
 0x590   : > { %2699 = vst.msk [vmem:[%s2981_s17 + $0x13f8] sm:$0xff] %vm2063_vm0, %v2058_v6  ;;  %2619 = vst.msk [vmem:[%s2981_s17 + $0x1178] sm:$0xff] %vm2063_vm0, %v2026_v7 }
 0x591 PF: > { %s11_s8 = sadd.s32 1, %s2873_s8   ;;  %s4280_s6 = smov %s2869_s7 }
 0x592   : > { %p8_p5 = scmp.ge.s32.totalorder %s11_s8, 4   ;;  %s4281_s7 = smov %s4283_s9 }
 0x594   :  { %10 = sbr.rel (!%p8_p5) target bundleno = 2 (0x2), region = 54 }

</bundles_post_ra>
